<compile_context>
chip_gen: v7x
topology: tpu7x:2x2x1
jax: 0.10.0
libtpu: 0.0.40
codegen_flags: <defaults>
</compile_context>

<pallas_src>
import numpy as np
import jax
import jax.numpy as jnp
from jax import lax
from jax.experimental import pallas as pl
from jax.experimental.pallas import tpu as pltpu

EPS = 1e-5       # torch.nn.InstanceNorm3d default (affine=False, no running stats)
DROP_P = 0.3     # F.dropout3d(p=0.3)
_CH_IN_ALIGN = 16   # conv-input channel padding (bf16 sublane tile)
_CH_OUT_ALIGN = 8   # final-output channel padding (f32 sublane tile)


def _round_up(c, m):
    return max(m, ((c + m - 1) // m) * m)


def _tap_offsets(H, W):
    # tap order t = kd*9 + kh*3 + kw  (od = kd-1, ...)
    return [od * H * W + oh * W + ow
            for od in (-1, 0, 1) for oh in (-1, 0, 1) for ow in (-1, 0, 1)]


def _boundary_masks(D, H, W):
    """(27, D*H*W) {0,1} masks: tap t is valid at voxel p iff the shifted voxel
    lies inside the unpadded volume (re-creates the conv zero halo in-kernel)."""
    m = np.zeros((27, D, H, W), np.float32)
    t = 0
    for od in (-1, 0, 1):
        for oh in (-1, 0, 1):
            for ow in (-1, 0, 1):
                dd = (np.arange(D) + od >= 0) & (np.arange(D) + od < D)
                hh = (np.arange(H) + oh >= 0) & (np.arange(H) + oh < H)
                ww = (np.arange(W) + ow >= 0) & (np.arange(W) + ow < W)
                m[t] = dd[:, None, None] & hh[None, :, None] & ww[None, None, :]
                t += 1
    return m.reshape(27, D * H * W)


def _pack_weight(w, cin_p, cout_p):
    """PyTorch (Cout, Cin, 3, 3, 3) -> (cout_p, 27*cin_p) bf16; column index
    = tap*cin_p + ci with tap = kd*9 + kh*3 + kw (matches the kernel im2col rows)."""
    cout, cin = w.shape[:2]
    wp = jnp.zeros((cout_p, cin_p, 3, 3, 3), w.dtype).at[:cout, :cin].set(w)
    wp = jnp.transpose(wp, (0, 2, 3, 4, 1))          # (cout_p, kd, kh, kw, cin_p)
    return wp.reshape(cout_p, 27 * cin_p).astype(jnp.bfloat16)


def _make_kernel(D, H, W):
    L = D * H * W
    offsets = _tap_offsets(H, W)
    # lane padding for the flattened shifts; multiple of 128 keeps concat aligned
    padl = ((H * W + W + 1 + 127) // 128) * 128

    def conv_in_relu(x_bf, w_mat, masks, col_ref):
        # x_bf: (C, L) bf16, w_mat: (Co_p, 27*C) bf16, masks: (27, L) bf16
        C = x_bf.shape[0]
        zpad = jnp.zeros((C, padl), jnp.bfloat16)
        xlin = jnp.concatenate([zpad, x_bf, zpad], axis=1)          # (C, L + 2*padl)
        # im2col: each 3x3x3 tap is a static lane shift of the flattened volume;
        # the boundary mask restores the zero padding.  Staged in VMEM scratch.
        for t, off in enumerate(offsets):
            col_ref[t * C:(t + 1) * C, :] = (
                xlin[:, padl + off:padl + off + L] * masks[t:t + 1, :])
        # single MXU contraction with K = 27*C, f32 accumulation
        acc = jnp.dot(w_mat, col_ref[0:27 * C, :],
                      preferred_element_type=jnp.float32)           # (Co_p, L) f32
        # InstanceNorm3d (biased variance, no affine) + ReLU, in f32.
        mean = jnp.mean(acc, axis=1, keepdims=True)
        cen = acc - mean
        var = jnp.mean(cen * cen, axis=1, keepdims=True)
        return jnp.maximum(cen * lax.rsqrt(var + EPS), 0.0)

    def kernel(x_ref, m_ref, w1_ref, w2_ref, o_ref, col_ref):
        masks = m_ref[...]
        h = conv_in_relu(x_ref[0], w1_ref[...], masks, col_ref)        # conv1+IN+ReLU
        y = conv_in_relu(h.astype(jnp.bfloat16), w2_ref[...], masks, col_ref)
        o_ref[0] = y                                                    # conv2+IN+ReLU

    return kernel


@jax.jit
def vgg_block_mc_forward(x, w1, b1, w2, b2, channel_scale):
    """VGGBlock_MC forward.  x: (N, Cin, D, H, W) f32; weights in PyTorch layout
    (Cout, Cin, 3, 3, 3); channel_scale: (N, Cin) dropout3d keep-mask / (1-p)
    (ones for eval).  b1/b2 are accepted but unused: a per-channel bias is an
    exact no-op under the affine-free InstanceNorm that follows each conv."""
    del b1, b2
    N, Cin, D, H, W = x.shape
    Cmid, Cout = w1.shape[0], w2.shape[0]
    L = D * H * W
    cin_p = _round_up(Cin, _CH_IN_ALIGN)
    cmid_p = _round_up(Cmid, _CH_IN_ALIGN)
    cout_p = _round_up(Cout, _CH_OUT_ALIGN)

    # dropout3d scale + flatten + small channel pad + bf16 cast: one fused XLA
    # preprocessing step that produces the lane-dense (N, Cin_p, D*H*W) input.
    xs = (x * channel_scale[:, :, None, None, None]).reshape(N, Cin, L)
    xs = jnp.pad(xs, ((0, 0), (0, cin_p - Cin), (0, 0))).astype(jnp.bfloat16)

    masks = jnp.asarray(_boundary_masks(D, H, W), jnp.bfloat16)       # (27, L)
    w1m = _pack_weight(w1, cin_p, cmid_p)                             # (cmid_p, 27*cin_p)
    w2m = _pack_weight(w2, cmid_p, cout_p)                            # (cout_p, 27*cmid_p)

    out = pl.pallas_call(
        _make_kernel(D, H, W),
        out_shape=jax.ShapeDtypeStruct((N, cout_p, L), jnp.float32),
        grid=(N,),
        in_specs=[
            pl.BlockSpec((1, cin_p, L), lambda n: (n, 0, 0)),
            pl.BlockSpec((27, L), lambda n: (0, 0)),
            pl.BlockSpec((cmid_p, 27 * cin_p), lambda n: (0, 0)),
            pl.BlockSpec((cout_p, 27 * cmid_p), lambda n: (0, 0)),
        ],
        out_specs=pl.BlockSpec((1, cout_p, L), lambda n: (n, 0, 0)),
        scratch_shapes=[pltpu.VMEM((27 * max(cin_p, cmid_p), L), jnp.bfloat16)],
        compiler_params=pltpu.CompilerParams(
            dimension_semantics=("parallel",),
            vmem_limit_bytes=32 * 1024 * 1024,
        ),
    )(xs, masks, w1m, w2m)

    # TODO(synk): for realistic D*H*W, add a spatial grid axis (extra 'parallel'
    # dim + two-pass sum/sumsq InstanceNorm) so the working set fits v7x's
    # 64 MiB VMEM and both of its TensorCores get work when N is small.
    return out[:, :Cout, :].reshape(N, Cout, D, H, W)


# ---------------- pure-XLA reference (same mixed-precision policy) -----------
def _ref_forward(x, w1, b1, w2, b2, channel_scale):
    """lax.conv reference mirroring PyTorch semantics (biases included) with the
    kernel's precision policy: bf16 conv operands, f32 accumulation / norm."""
    def conv(h, w, b):
        y = lax.conv_general_dilated(
            h.astype(jnp.bfloat16), w.astype(jnp.bfloat16),
            window_strides=(1, 1, 1), padding=((1, 1), (1, 1), (1, 1)),
            dimension_numbers=("NCDHW", "OIDHW", "NCDHW"),
            preferred_element_type=jnp.float32)
        return y + b.reshape(1, -1, 1, 1, 1)

    def inorm_relu(y):
        mean = jnp.mean(y, axis=(2, 3, 4), keepdims=True)
        var = jnp.mean((y - mean) ** 2, axis=(2, 3, 4), keepdims=True)
        return jnp.maximum((y - mean) * lax.rsqrt(var + EPS), 0.0)

    h = x * channel_scale[:, :, None, None, None]     # dropout3d (shared mask)
    h = inorm_relu(conv(h, w1, b1))
    h = inorm_relu(conv(h, w2, b2))
    return h


# ---------------------------------- main ------------------------------------
def _init_conv(key, cin, cout):
    kw, kb = jax.random.split(key)
    bound = 1.0 / (cin * 27) ** 0.5
    w = jax.random.uniform(kw, (cout, cin, 3, 3, 3), jnp.float32, -bound, bound)
    b = jax.random.uniform(kb, (cout,), jnp.float32, -bound, bound)
    return w, b


if __name__ == "__main__":
    key = jax.random.PRNGKey(0)
    kx, kc1, kc2, kdrop = jax.random.split(key, 4)

    N, C_IN, C_MID, C_OUT = 2, 4, 8, 4
    D = H = W = 8

    x = jax.random.normal(kx, (N, C_IN, D, H, W), jnp.float32)   # NCDHW like PyTorch
    w1, b1 = _init_conv(kc1, C_IN, C_MID)
    w2, b2 = _init_conv(kc2, C_MID, C_OUT)

    # dropout3d(p=0.3, training=True): per-(sample, channel) keep mask scaled by
    # 1/(1-p); drawn once so kernel and reference use the identical mask.
    keep = jax.random.bernoulli(kdrop, 1.0 - DROP_P, (N, C_IN))
    channel_scale = keep.astype(jnp.float32) / (1.0 - DROP_P)

    out = vgg_block_mc_forward(x, w1, b1, w2, b2, channel_scale)
    out = jax.block_until_ready(out)

    ref = _ref_forward(x, w1, b1, w2, b2, channel_scale)
    err = float(jnp.max(jnp.abs(out - ref)))
    assert out.shape == (N, C_OUT, D, H, W), out.shape
    assert jnp.allclose(out, ref, atol=1e-2, rtol=1e-2), f"max abs err = {err}"

    print("KERNEL_OK")
</pallas_src>

<mosaic_0001>
module attributes {stable_mosaic.version = 11 : i64} {
  func.func @kernel(%arg0: i32, %arg1: memref<1x16x512xbf16, #tpu.memory_space<vmem>>, %arg2: memref<27x512xbf16, #tpu.memory_space<vmem>>, %arg3: memref<16x432xbf16, #tpu.memory_space<vmem>>, %arg4: memref<8x432xbf16, #tpu.memory_space<vmem>>, %arg5: memref<1x8x512xf32, #tpu.memory_space<vmem>>, %arg6: memref<432x512xbf16, #tpu.memory_space<vmem>>) attributes {dimension_semantics = [#tpu.dimension_semantics<parallel>], iteration_bounds = array<i64: 2>, scalar_prefetch = 0 : i64, scratch_operands = 1 : i64, tpu.core_type = #tpu.core_type<tc>, window_params = [{transform_indices = @transform_0, window_bounds = array<i64: 1, 16, 512>}, {pipeline_mode = #tpu.pipeline_mode<synchronous>, transform_indices = @transform_1, window_bounds = array<i64: 27, 512>}, {pipeline_mode = #tpu.pipeline_mode<synchronous>, transform_indices = @transform_2, window_bounds = array<i64: 16, 432>}, {pipeline_mode = #tpu.pipeline_mode<synchronous>, transform_indices = @transform_3, window_bounds = array<i64: 8, 432>}, {transform_indices = @transform_4, window_bounds = array<i64: 1, 8, 512>}]} {
    %c0 = arith.constant 0 : index
    %c0_0 = arith.constant 0 : index
    %0 = vector.load %arg2[%c0, %c0_0] : memref<27x512xbf16, #tpu.memory_space<vmem>>, vector<27x512xbf16>
    %c0_1 = arith.constant 0 : index
    %c0_2 = arith.constant 0 : index
    %c0_3 = arith.constant 0 : index
    %1 = vector.load %arg1[%c0_1, %c0_2, %c0_3] : memref<1x16x512xbf16, #tpu.memory_space<vmem>>, vector<1x16x512xbf16>
    %2 = vector.shape_cast %1 : vector<1x16x512xbf16> to vector<16x512xbf16>
    %c0_4 = arith.constant 0 : index
    %c0_5 = arith.constant 0 : index
    %3 = vector.load %arg3[%c0_4, %c0_5] : memref<16x432xbf16, #tpu.memory_space<vmem>>, vector<16x432xbf16>
    %cst = arith.constant 0.000000e+00 : bf16
    %4 = vector.broadcast %cst : bf16 to vector<16x128xbf16>
    %5 = tpu.concatenate %4, %2, %4 in 1 : vector<16x128xbf16>, vector<16x512xbf16>, vector<16x128xbf16> -> vector<16x768xbf16>
    %6 = vector.extract_strided_slice %5 {offsets = [0, 55], sizes = [16, 512], strides = [1, 1]} : vector<16x768xbf16> to vector<16x512xbf16>
    %7 = vector.extract_strided_slice %0 {offsets = [0, 0], sizes = [1, 512], strides = [1, 1]} : vector<27x512xbf16> to vector<1x512xbf16>
    %8 = vector.broadcast %7 : vector<1x512xbf16> to vector<16x512xbf16>
    %9 = arith.mulf %6, %8 : vector<16x512xbf16>
    %c0_6 = arith.constant 0 : index
    %c0_7 = arith.constant 0 : index
    %10 = vector.load %arg6[%c0_6, %c0_7] : memref<432x512xbf16, #tpu.memory_space<vmem>>, vector<16x512xbf16>
    tpu.vector_store %arg6[%c0_6, %c0_7], %9 {strides = array<i32>} : memref<432x512xbf16, #tpu.memory_space<vmem>>, vector<16x512xbf16>,
    %11 = vector.extract_strided_slice %5 {offsets = [0, 56], sizes = [16, 512], strides = [1, 1]} : vector<16x768xbf16> to vector<16x512xbf16>
    %12 = vector.extract_strided_slice %0 {offsets = [1, 0], sizes = [1, 512], strides = [1, 1]} : vector<27x512xbf16> to vector<1x512xbf16>
    %13 = vector.broadcast %12 : vector<1x512xbf16> to vector<16x512xbf16>
    %14 = arith.mulf %11, %13 : vector<16x512xbf16>
    %c16 = arith.constant 16 : index
    %c0_8 = arith.constant 0 : index
    %15 = vector.load %arg6[%c16, %c0_8] : memref<432x512xbf16, #tpu.memory_space<vmem>>, vector<16x512xbf16>
    tpu.vector_store %arg6[%c16, %c0_8], %14 {strides = array<i32>} : memref<432x512xbf16, #tpu.memory_space<vmem>>, vector<16x512xbf16>,
    %16 = vector.extract_strided_slice %5 {offsets = [0, 57], sizes = [16, 512], strides = [1, 1]} : vector<16x768xbf16> to vector<16x512xbf16>
    %17 = vector.extract_strided_slice %0 {offsets = [2, 0], sizes = [1, 512], strides = [1, 1]} : vector<27x512xbf16> to vector<1x512xbf16>
    %18 = vector.broadcast %17 : vector<1x512xbf16> to vector<16x512xbf16>
    %19 = arith.mulf %16, %18 : vector<16x512xbf16>
    %c32 = arith.constant 32 : index
    %c0_9 = arith.constant 0 : index
    %20 = vector.load %arg6[%c32, %c0_9] : memref<432x512xbf16, #tpu.memory_space<vmem>>, vector<16x512xbf16>
    tpu.vector_store %arg6[%c32, %c0_9], %19 {strides = array<i32>} : memref<432x512xbf16, #tpu.memory_space<vmem>>, vector<16x512xbf16>,
    %21 = vector.extract_strided_slice %5 {offsets = [0, 63], sizes = [16, 512], strides = [1, 1]} : vector<16x768xbf16> to vector<16x512xbf16>
    %22 = vector.extract_strided_slice %0 {offsets = [3, 0], sizes = [1, 512], strides = [1, 1]} : vector<27x512xbf16> to vector<1x512xbf16>
    %23 = vector.broadcast %22 : vector<1x512xbf16> to vector<16x512xbf16>
    %24 = arith.mulf %21, %23 : vector<16x512xbf16>
    %c48 = arith.constant 48 : index
    %c0_10 = arith.constant 0 : index
    %25 = vector.load %arg6[%c48, %c0_10] : memref<432x512xbf16, #tpu.memory_space<vmem>>, vector<16x512xbf16>
    tpu.vector_store %arg6[%c48, %c0_10], %24 {strides = array<i32>} : memref<432x512xbf16, #tpu.memory_space<vmem>>, vector<16x512xbf16>,
    %26 = vector.extract_strided_slice %5 {offsets = [0, 64], sizes = [16, 512], strides = [1, 1]} : vector<16x768xbf16> to vector<16x512xbf16>
    %27 = vector.extract_strided_slice %0 {offsets = [4, 0], sizes = [1, 512], strides = [1, 1]} : vector<27x512xbf16> to vector<1x512xbf16>
    %28 = vector.broadcast %27 : vector<1x512xbf16> to vector<16x512xbf16>
    %29 = arith.mulf %26, %28 : vector<16x512xbf16>
    %c64 = arith.constant 64 : index
    %c0_11 = arith.constant 0 : index
    %30 = vector.load %arg6[%c64, %c0_11] : memref<432x512xbf16, #tpu.memory_space<vmem>>, vector<16x512xbf16>
    tpu.vector_store %arg6[%c64, %c0_11], %29 {strides = array<i32>} : memref<432x512xbf16, #tpu.memory_space<vmem>>, vector<16x512xbf16>,
    %31 = vector.extract_strided_slice %5 {offsets = [0, 65], sizes = [16, 512], strides = [1, 1]} : vector<16x768xbf16> to vector<16x512xbf16>
    %32 = vector.extract_strided_slice %0 {offsets = [5, 0], sizes = [1, 512], strides = [1, 1]} : vector<27x512xbf16> to vector<1x512xbf16>
    %33 = vector.broadcast %32 : vector<1x512xbf16> to vector<16x512xbf16>
    %34 = arith.mulf %31, %33 : vector<16x512xbf16>
    %c80 = arith.constant 80 : index
    %c0_12 = arith.constant 0 : index
    %35 = vector.load %arg6[%c80, %c0_12] : memref<432x512xbf16, #tpu.memory_space<vmem>>, vector<16x512xbf16>
    tpu.vector_store %arg6[%c80, %c0_12], %34 {strides = array<i32>} : memref<432x512xbf16, #tpu.memory_space<vmem>>, vector<16x512xbf16>,
    %36 = vector.extract_strided_slice %5 {offsets = [0, 71], sizes = [16, 512], strides = [1, 1]} : vector<16x768xbf16> to vector<16x512xbf16>
    %37 = vector.extract_strided_slice %0 {offsets = [6, 0], sizes = [1, 512], strides = [1, 1]} : vector<27x512xbf16> to vector<1x512xbf16>
    %38 = vector.broadcast %37 : vector<1x512xbf16> to vector<16x512xbf16>
    %39 = arith.mulf %36, %38 : vector<16x512xbf16>
    %c96 = arith.constant 96 : index
    %c0_13 = arith.constant 0 : index
    %40 = vector.load %arg6[%c96, %c0_13] : memref<432x512xbf16, #tpu.memory_space<vmem>>, vector<16x512xbf16>
    tpu.vector_store %arg6[%c96, %c0_13], %39 {strides = array<i32>} : memref<432x512xbf16, #tpu.memory_space<vmem>>, vector<16x512xbf16>,
    %41 = vector.extract_strided_slice %5 {offsets = [0, 72], sizes = [16, 512], strides = [1, 1]} : vector<16x768xbf16> to vector<16x512xbf16>
    %42 = vector.extract_strided_slice %0 {offsets = [7, 0], sizes = [1, 512], strides = [1, 1]} : vector<27x512xbf16> to vector<1x512xbf16>
    %43 = vector.broadcast %42 : vector<1x512xbf16> to vector<16x512xbf16>
    %44 = arith.mulf %41, %43 : vector<16x512xbf16>
    %c112 = arith.constant 112 : index
    %c0_14 = arith.constant 0 : index
    %45 = vector.load %arg6[%c112, %c0_14] : memref<432x512xbf16, #tpu.memory_space<vmem>>, vector<16x512xbf16>
    tpu.vector_store %arg6[%c112, %c0_14], %44 {strides = array<i32>} : memref<432x512xbf16, #tpu.memory_space<vmem>>, vector<16x512xbf16>,
    %46 = vector.extract_strided_slice %5 {offsets = [0, 73], sizes = [16, 512], strides = [1, 1]} : vector<16x768xbf16> to vector<16x512xbf16>
    %47 = vector.extract_strided_slice %0 {offsets = [8, 0], sizes = [1, 512], strides = [1, 1]} : vector<27x512xbf16> to vector<1x512xbf16>
    %48 = vector.broadcast %47 : vector<1x512xbf16> to vector<16x512xbf16>
    %49 = arith.mulf %46, %48 : vector<16x512xbf16>
    %c128 = arith.constant 128 : index
    %c0_15 = arith.constant 0 : index
    %50 = vector.load %arg6[%c128, %c0_15] : memref<432x512xbf16, #tpu.memory_space<vmem>>, vector<16x512xbf16>
    tpu.vector_store %arg6[%c128, %c0_15], %49 {strides = array<i32>} : memref<432x512xbf16, #tpu.memory_space<vmem>>, vector<16x512xbf16>,
    %51 = vector.extract_strided_slice %5 {offsets = [0, 119], sizes = [16, 512], strides = [1, 1]} : vector<16x768xbf16> to vector<16x512xbf16>
    %52 = vector.extract_strided_slice %0 {offsets = [9, 0], sizes = [1, 512], strides = [1, 1]} : vector<27x512xbf16> to vector<1x512xbf16>
    %53 = vector.broadcast %52 : vector<1x512xbf16> to vector<16x512xbf16>
    %54 = arith.mulf %51, %53 : vector<16x512xbf16>
    %c144 = arith.constant 144 : index
    %c0_16 = arith.constant 0 : index
    %55 = vector.load %arg6[%c144, %c0_16] : memref<432x512xbf16, #tpu.memory_space<vmem>>, vector<16x512xbf16>
    tpu.vector_store %arg6[%c144, %c0_16], %54 {strides = array<i32>} : memref<432x512xbf16, #tpu.memory_space<vmem>>, vector<16x512xbf16>,
    %56 = vector.extract_strided_slice %5 {offsets = [0, 120], sizes = [16, 512], strides = [1, 1]} : vector<16x768xbf16> to vector<16x512xbf16>
    %57 = vector.extract_strided_slice %0 {offsets = [10, 0], sizes = [1, 512], strides = [1, 1]} : vector<27x512xbf16> to vector<1x512xbf16>
    %58 = vector.broadcast %57 : vector<1x512xbf16> to vector<16x512xbf16>
    %59 = arith.mulf %56, %58 : vector<16x512xbf16>
    %c160 = arith.constant 160 : index
    %c0_17 = arith.constant 0 : index
    %60 = vector.load %arg6[%c160, %c0_17] : memref<432x512xbf16, #tpu.memory_space<vmem>>, vector<16x512xbf16>
    tpu.vector_store %arg6[%c160, %c0_17], %59 {strides = array<i32>} : memref<432x512xbf16, #tpu.memory_space<vmem>>, vector<16x512xbf16>,
    %61 = vector.extract_strided_slice %5 {offsets = [0, 121], sizes = [16, 512], strides = [1, 1]} : vector<16x768xbf16> to vector<16x512xbf16>
    %62 = vector.extract_strided_slice %0 {offsets = [11, 0], sizes = [1, 512], strides = [1, 1]} : vector<27x512xbf16> to vector<1x512xbf16>
    %63 = vector.broadcast %62 : vector<1x512xbf16> to vector<16x512xbf16>
    %64 = arith.mulf %61, %63 : vector<16x512xbf16>
    %c176 = arith.constant 176 : index
    %c0_18 = arith.constant 0 : index
    %65 = vector.load %arg6[%c176, %c0_18] : memref<432x512xbf16, #tpu.memory_space<vmem>>, vector<16x512xbf16>
    tpu.vector_store %arg6[%c176, %c0_18], %64 {strides = array<i32>} : memref<432x512xbf16, #tpu.memory_space<vmem>>, vector<16x512xbf16>,
    %66 = vector.extract_strided_slice %5 {offsets = [0, 127], sizes = [16, 512], strides = [1, 1]} : vector<16x768xbf16> to vector<16x512xbf16>
    %67 = vector.extract_strided_slice %0 {offsets = [12, 0], sizes = [1, 512], strides = [1, 1]} : vector<27x512xbf16> to vector<1x512xbf16>
    %68 = vector.broadcast %67 : vector<1x512xbf16> to vector<16x512xbf16>
    %69 = arith.mulf %66, %68 : vector<16x512xbf16>
    %c192 = arith.constant 192 : index
    %c0_19 = arith.constant 0 : index
    %70 = vector.load %arg6[%c192, %c0_19] : memref<432x512xbf16, #tpu.memory_space<vmem>>, vector<16x512xbf16>
    tpu.vector_store %arg6[%c192, %c0_19], %69 {strides = array<i32>} : memref<432x512xbf16, #tpu.memory_space<vmem>>, vector<16x512xbf16>,
    %71 = vector.extract_strided_slice %5 {offsets = [0, 128], sizes = [16, 512], strides = [1, 1]} : vector<16x768xbf16> to vector<16x512xbf16>
    %72 = vector.extract_strided_slice %0 {offsets = [13, 0], sizes = [1, 512], strides = [1, 1]} : vector<27x512xbf16> to vector<1x512xbf16>
    %73 = vector.broadcast %72 : vector<1x512xbf16> to vector<16x512xbf16>
    %74 = arith.mulf %71, %73 : vector<16x512xbf16>
    %c208 = arith.constant 208 : index
    %c0_20 = arith.constant 0 : index
    %75 = vector.load %arg6[%c208, %c0_20] : memref<432x512xbf16, #tpu.memory_space<vmem>>, vector<16x512xbf16>
    tpu.vector_store %arg6[%c208, %c0_20], %74 {strides = array<i32>} : memref<432x512xbf16, #tpu.memory_space<vmem>>, vector<16x512xbf16>,
    %76 = vector.extract_strided_slice %5 {offsets = [0, 129], sizes = [16, 512], strides = [1, 1]} : vector<16x768xbf16> to vector<16x512xbf16>
    %77 = vector.extract_strided_slice %0 {offsets = [14, 0], sizes = [1, 512], strides = [1, 1]} : vector<27x512xbf16> to vector<1x512xbf16>
    %78 = vector.broadcast %77 : vector<1x512xbf16> to vector<16x512xbf16>
    %79 = arith.mulf %76, %78 : vector<16x512xbf16>
    %c224 = arith.constant 224 : index
    %c0_21 = arith.constant 0 : index
    %80 = vector.load %arg6[%c224, %c0_21] : memref<432x512xbf16, #tpu.memory_space<vmem>>, vector<16x512xbf16>
    tpu.vector_store %arg6[%c224, %c0_21], %79 {strides = array<i32>} : memref<432x512xbf16, #tpu.memory_space<vmem>>, vector<16x512xbf16>,
    %81 = vector.extract_strided_slice %5 {offsets = [0, 135], sizes = [16, 512], strides = [1, 1]} : vector<16x768xbf16> to vector<16x512xbf16>
    %82 = vector.extract_strided_slice %0 {offsets = [15, 0], sizes = [1, 512], strides = [1, 1]} : vector<27x512xbf16> to vector<1x512xbf16>
    %83 = vector.broadcast %82 : vector<1x512xbf16> to vector<16x512xbf16>
    %84 = arith.mulf %81, %83 : vector<16x512xbf16>
    %c240 = arith.constant 240 : index
    %c0_22 = arith.constant 0 : index
    %85 = vector.load %arg6[%c240, %c0_22] : memref<432x512xbf16, #tpu.memory_space<vmem>>, vector<16x512xbf16>
    tpu.vector_store %arg6[%c240, %c0_22], %84 {strides = array<i32>} : memref<432x512xbf16, #tpu.memory_space<vmem>>, vector<16x512xbf16>,
    %86 = vector.extract_strided_slice %5 {offsets = [0, 136], sizes = [16, 512], strides = [1, 1]} : vector<16x768xbf16> to vector<16x512xbf16>
    %87 = vector.extract_strided_slice %0 {offsets = [16, 0], sizes = [1, 512], strides = [1, 1]} : vector<27x512xbf16> to vector<1x512xbf16>
    %88 = vector.broadcast %87 : vector<1x512xbf16> to vector<16x512xbf16>
    %89 = arith.mulf %86, %88 : vector<16x512xbf16>
    %c256 = arith.constant 256 : index
    %c0_23 = arith.constant 0 : index
    %90 = vector.load %arg6[%c256, %c0_23] : memref<432x512xbf16, #tpu.memory_space<vmem>>, vector<16x512xbf16>
    tpu.vector_store %arg6[%c256, %c0_23], %89 {strides = array<i32>} : memref<432x512xbf16, #tpu.memory_space<vmem>>, vector<16x512xbf16>,
    %91 = vector.extract_strided_slice %5 {offsets = [0, 137], sizes = [16, 512], strides = [1, 1]} : vector<16x768xbf16> to vector<16x512xbf16>
    %92 = vector.extract_strided_slice %0 {offsets = [17, 0], sizes = [1, 512], strides = [1, 1]} : vector<27x512xbf16> to vector<1x512xbf16>
    %93 = vector.broadcast %92 : vector<1x512xbf16> to vector<16x512xbf16>
    %94 = arith.mulf %91, %93 : vector<16x512xbf16>
    %c272 = arith.constant 272 : index
    %c0_24 = arith.constant 0 : index
    %95 = vector.load %arg6[%c272, %c0_24] : memref<432x512xbf16, #tpu.memory_space<vmem>>, vector<16x512xbf16>
    tpu.vector_store %arg6[%c272, %c0_24], %94 {strides = array<i32>} : memref<432x512xbf16, #tpu.memory_space<vmem>>, vector<16x512xbf16>,
    %96 = vector.extract_strided_slice %5 {offsets = [0, 183], sizes = [16, 512], strides = [1, 1]} : vector<16x768xbf16> to vector<16x512xbf16>
    %97 = vector.extract_strided_slice %0 {offsets = [18, 0], sizes = [1, 512], strides = [1, 1]} : vector<27x512xbf16> to vector<1x512xbf16>
    %98 = vector.broadcast %97 : vector<1x512xbf16> to vector<16x512xbf16>
    %99 = arith.mulf %96, %98 : vector<16x512xbf16>
    %c288 = arith.constant 288 : index
    %c0_25 = arith.constant 0 : index
    %100 = vector.load %arg6[%c288, %c0_25] : memref<432x512xbf16, #tpu.memory_space<vmem>>, vector<16x512xbf16>
    tpu.vector_store %arg6[%c288, %c0_25], %99 {strides = array<i32>} : memref<432x512xbf16, #tpu.memory_space<vmem>>, vector<16x512xbf16>,
    %101 = vector.extract_strided_slice %5 {offsets = [0, 184], sizes = [16, 512], strides = [1, 1]} : vector<16x768xbf16> to vector<16x512xbf16>
    %102 = vector.extract_strided_slice %0 {offsets = [19, 0], sizes = [1, 512], strides = [1, 1]} : vector<27x512xbf16> to vector<1x512xbf16>
    %103 = vector.broadcast %102 : vector<1x512xbf16> to vector<16x512xbf16>
    %104 = arith.mulf %101, %103 : vector<16x512xbf16>
    %c304 = arith.constant 304 : index
    %c0_26 = arith.constant 0 : index
    %105 = vector.load %arg6[%c304, %c0_26] : memref<432x512xbf16, #tpu.memory_space<vmem>>, vector<16x512xbf16>
    tpu.vector_store %arg6[%c304, %c0_26], %104 {strides = array<i32>} : memref<432x512xbf16, #tpu.memory_space<vmem>>, vector<16x512xbf16>,
    %106 = vector.extract_strided_slice %5 {offsets = [0, 185], sizes = [16, 512], strides = [1, 1]} : vector<16x768xbf16> to vector<16x512xbf16>
    %107 = vector.extract_strided_slice %0 {offsets = [20, 0], sizes = [1, 512], strides = [1, 1]} : vector<27x512xbf16> to vector<1x512xbf16>
    %108 = vector.broadcast %107 : vector<1x512xbf16> to vector<16x512xbf16>
    %109 = arith.mulf %106, %108 : vector<16x512xbf16>
    %c320 = arith.constant 320 : index
    %c0_27 = arith.constant 0 : index
    %110 = vector.load %arg6[%c320, %c0_27] : memref<432x512xbf16, #tpu.memory_space<vmem>>, vector<16x512xbf16>
    tpu.vector_store %arg6[%c320, %c0_27], %109 {strides = array<i32>} : memref<432x512xbf16, #tpu.memory_space<vmem>>, vector<16x512xbf16>,
    %111 = vector.extract_strided_slice %5 {offsets = [0, 191], sizes = [16, 512], strides = [1, 1]} : vector<16x768xbf16> to vector<16x512xbf16>
    %112 = vector.extract_strided_slice %0 {offsets = [21, 0], sizes = [1, 512], strides = [1, 1]} : vector<27x512xbf16> to vector<1x512xbf16>
    %113 = vector.broadcast %112 : vector<1x512xbf16> to vector<16x512xbf16>
    %114 = arith.mulf %111, %113 : vector<16x512xbf16>
    %c336 = arith.constant 336 : index
    %c0_28 = arith.constant 0 : index
    %115 = vector.load %arg6[%c336, %c0_28] : memref<432x512xbf16, #tpu.memory_space<vmem>>, vector<16x512xbf16>
    tpu.vector_store %arg6[%c336, %c0_28], %114 {strides = array<i32>} : memref<432x512xbf16, #tpu.memory_space<vmem>>, vector<16x512xbf16>,
    %116 = vector.extract_strided_slice %5 {offsets = [0, 192], sizes = [16, 512], strides = [1, 1]} : vector<16x768xbf16> to vector<16x512xbf16>
    %117 = vector.extract_strided_slice %0 {offsets = [22, 0], sizes = [1, 512], strides = [1, 1]} : vector<27x512xbf16> to vector<1x512xbf16>
    %118 = vector.broadcast %117 : vector<1x512xbf16> to vector<16x512xbf16>
    %119 = arith.mulf %116, %118 : vector<16x512xbf16>
    %c352 = arith.constant 352 : index
    %c0_29 = arith.constant 0 : index
    %120 = vector.load %arg6[%c352, %c0_29] : memref<432x512xbf16, #tpu.memory_space<vmem>>, vector<16x512xbf16>
    tpu.vector_store %arg6[%c352, %c0_29], %119 {strides = array<i32>} : memref<432x512xbf16, #tpu.memory_space<vmem>>, vector<16x512xbf16>,
    %121 = vector.extract_strided_slice %5 {offsets = [0, 193], sizes = [16, 512], strides = [1, 1]} : vector<16x768xbf16> to vector<16x512xbf16>
    %122 = vector.extract_strided_slice %0 {offsets = [23, 0], sizes = [1, 512], strides = [1, 1]} : vector<27x512xbf16> to vector<1x512xbf16>
    %123 = vector.broadcast %122 : vector<1x512xbf16> to vector<16x512xbf16>
    %124 = arith.mulf %121, %123 : vector<16x512xbf16>
    %c368 = arith.constant 368 : index
    %c0_30 = arith.constant 0 : index
    %125 = vector.load %arg6[%c368, %c0_30] : memref<432x512xbf16, #tpu.memory_space<vmem>>, vector<16x512xbf16>
    tpu.vector_store %arg6[%c368, %c0_30], %124 {strides = array<i32>} : memref<432x512xbf16, #tpu.memory_space<vmem>>, vector<16x512xbf16>,
    %126 = vector.extract_strided_slice %5 {offsets = [0, 199], sizes = [16, 512], strides = [1, 1]} : vector<16x768xbf16> to vector<16x512xbf16>
    %127 = vector.extract_strided_slice %0 {offsets = [24, 0], sizes = [1, 512], strides = [1, 1]} : vector<27x512xbf16> to vector<1x512xbf16>
    %128 = vector.broadcast %127 : vector<1x512xbf16> to vector<16x512xbf16>
    %129 = arith.mulf %126, %128 : vector<16x512xbf16>
    %c384 = arith.constant 384 : index
    %c0_31 = arith.constant 0 : index
    %130 = vector.load %arg6[%c384, %c0_31] : memref<432x512xbf16, #tpu.memory_space<vmem>>, vector<16x512xbf16>
    tpu.vector_store %arg6[%c384, %c0_31], %129 {strides = array<i32>} : memref<432x512xbf16, #tpu.memory_space<vmem>>, vector<16x512xbf16>,
    %131 = vector.extract_strided_slice %5 {offsets = [0, 200], sizes = [16, 512], strides = [1, 1]} : vector<16x768xbf16> to vector<16x512xbf16>
    %132 = vector.extract_strided_slice %0 {offsets = [25, 0], sizes = [1, 512], strides = [1, 1]} : vector<27x512xbf16> to vector<1x512xbf16>
    %133 = vector.broadcast %132 : vector<1x512xbf16> to vector<16x512xbf16>
    %134 = arith.mulf %131, %133 : vector<16x512xbf16>
    %c400 = arith.constant 400 : index
    %c0_32 = arith.constant 0 : index
    %135 = vector.load %arg6[%c400, %c0_32] : memref<432x512xbf16, #tpu.memory_space<vmem>>, vector<16x512xbf16>
    tpu.vector_store %arg6[%c400, %c0_32], %134 {strides = array<i32>} : memref<432x512xbf16, #tpu.memory_space<vmem>>, vector<16x512xbf16>,
    %136 = vector.extract_strided_slice %5 {offsets = [0, 201], sizes = [16, 512], strides = [1, 1]} : vector<16x768xbf16> to vector<16x512xbf16>
    %137 = vector.extract_strided_slice %0 {offsets = [26, 0], sizes = [1, 512], strides = [1, 1]} : vector<27x512xbf16> to vector<1x512xbf16>
    %138 = vector.broadcast %137 : vector<1x512xbf16> to vector<16x512xbf16>
    %139 = arith.mulf %136, %138 : vector<16x512xbf16>
    %c416 = arith.constant 416 : index
    %c0_33 = arith.constant 0 : index
    %140 = vector.load %arg6[%c416, %c0_33] : memref<432x512xbf16, #tpu.memory_space<vmem>>, vector<16x512xbf16>
    tpu.vector_store %arg6[%c416, %c0_33], %139 {strides = array<i32>} : memref<432x512xbf16, #tpu.memory_space<vmem>>, vector<16x512xbf16>,
    %c0_34 = arith.constant 0 : index
    %c0_35 = arith.constant 0 : index
    %141 = vector.load %arg6[%c0_34, %c0_35] : memref<432x512xbf16, #tpu.memory_space<vmem>>, vector<432x512xbf16>
    %cst_36 = arith.constant dense<0.000000e+00> : vector<16x512xf32>
    %142 = tpu.matmul %3, %141, %cst_36 {dimension_numbers = #tpu.dot_dimension_numbers<[1], [0], [0], [1], [0, 0, 1, 1], [], []>} : vector<16x432xbf16>, vector<432x512xbf16>, vector<16x512xf32> -> vector<16x512xf32>
    %cst_37 = arith.constant dense<0.000000e+00> : vector<16xf32>
    %143 = vector.multi_reduction <add>, %142, %cst_37 [1] : vector<16x512xf32> to vector<16xf32>
    %144 = vector.shape_cast %143 : vector<16xf32> to vector<16x1xf32>
    %cst_38 = arith.constant 5.120000e+02 : f32
    %145 = vector.broadcast %cst_38 : f32 to vector<16x1xf32>
    %146 = arith.divf %144, %145 : vector<16x1xf32>
    %147 = vector.broadcast %146 : vector<16x1xf32> to vector<16x512xf32>
    %148 = arith.subf %142, %147 : vector<16x512xf32>
    %149 = arith.mulf %148, %148 : vector<16x512xf32>
    %cst_39 = arith.constant dense<0.000000e+00> : vector<16xf32>
    %150 = vector.multi_reduction <add>, %149, %cst_39 [1] : vector<16x512xf32> to vector<16xf32>
    %151 = vector.shape_cast %150 : vector<16xf32> to vector<16x1xf32>
    %cst_40 = arith.constant 5.120000e+02 : f32
    %152 = vector.broadcast %cst_40 : f32 to vector<16x1xf32>
    %153 = arith.divf %151, %152 : vector<16x1xf32>
    %cst_41 = arith.constant 9.99999974E-6 : f32
    %154 = vector.broadcast %cst_41 : f32 to vector<16x1xf32>
    %155 = arith.addf %153, %154 : vector<16x1xf32>
    %156 = math.rsqrt %155 : vector<16x1xf32>
    %157 = vector.broadcast %156 : vector<16x1xf32> to vector<16x512xf32>
    %158 = arith.mulf %148, %157 : vector<16x512xf32>
    %cst_42 = arith.constant 0.000000e+00 : f32
    %159 = vector.broadcast %cst_42 : f32 to vector<16x512xf32>
    %160 = arith.maximumf %158, %159 : vector<16x512xf32>
    %161 = arith.truncf %160 : vector<16x512xf32> to vector<16x512xbf16>
    %c0_43 = arith.constant 0 : index
    %c0_44 = arith.constant 0 : index
    %162 = vector.load %arg4[%c0_43, %c0_44] : memref<8x432xbf16, #tpu.memory_space<vmem>>, vector<8x432xbf16>
    %cst_45 = arith.constant 0.000000e+00 : bf16
    %163 = vector.broadcast %cst_45 : bf16 to vector<16x128xbf16>
    %164 = tpu.concatenate %163, %161, %163 in 1 : vector<16x128xbf16>, vector<16x512xbf16>, vector<16x128xbf16> -> vector<16x768xbf16>
    %165 = vector.extract_strided_slice %164 {offsets = [0, 55], sizes = [16, 512], strides = [1, 1]} : vector<16x768xbf16> to vector<16x512xbf16>
    %166 = vector.extract_strided_slice %0 {offsets = [0, 0], sizes = [1, 512], strides = [1, 1]} : vector<27x512xbf16> to vector<1x512xbf16>
    %167 = vector.broadcast %166 : vector<1x512xbf16> to vector<16x512xbf16>
    %168 = arith.mulf %165, %167 : vector<16x512xbf16>
    %c0_46 = arith.constant 0 : index
    %c0_47 = arith.constant 0 : index
    %169 = vector.load %arg6[%c0_46, %c0_47] : memref<432x512xbf16, #tpu.memory_space<vmem>>, vector<16x512xbf16>
    tpu.vector_store %arg6[%c0_46, %c0_47], %168 {strides = array<i32>} : memref<432x512xbf16, #tpu.memory_space<vmem>>, vector<16x512xbf16>,
    %170 = vector.extract_strided_slice %164 {offsets = [0, 56], sizes = [16, 512], strides = [1, 1]} : vector<16x768xbf16> to vector<16x512xbf16>
    %171 = vector.extract_strided_slice %0 {offsets = [1, 0], sizes = [1, 512], strides = [1, 1]} : vector<27x512xbf16> to vector<1x512xbf16>
    %172 = vector.broadcast %171 : vector<1x512xbf16> to vector<16x512xbf16>
    %173 = arith.mulf %170, %172 : vector<16x512xbf16>
    %c16_48 = arith.constant 16 : index
    %c0_49 = arith.constant 0 : index
    %174 = vector.load %arg6[%c16_48, %c0_49] : memref<432x512xbf16, #tpu.memory_space<vmem>>, vector<16x512xbf16>
    tpu.vector_store %arg6[%c16_48, %c0_49], %173 {strides = array<i32>} : memref<432x512xbf16, #tpu.memory_space<vmem>>, vector<16x512xbf16>,
    %175 = vector.extract_strided_slice %164 {offsets = [0, 57], sizes = [16, 512], strides = [1, 1]} : vector<16x768xbf16> to vector<16x512xbf16>
    %176 = vector.extract_strided_slice %0 {offsets = [2, 0], sizes = [1, 512], strides = [1, 1]} : vector<27x512xbf16> to vector<1x512xbf16>
    %177 = vector.broadcast %176 : vector<1x512xbf16> to vector<16x512xbf16>
    %178 = arith.mulf %175, %177 : vector<16x512xbf16>
    %c32_50 = arith.constant 32 : index
    %c0_51 = arith.constant 0 : index
    %179 = vector.load %arg6[%c32_50, %c0_51] : memref<432x512xbf16, #tpu.memory_space<vmem>>, vector<16x512xbf16>
    tpu.vector_store %arg6[%c32_50, %c0_51], %178 {strides = array<i32>} : memref<432x512xbf16, #tpu.memory_space<vmem>>, vector<16x512xbf16>,
    %180 = vector.extract_strided_slice %164 {offsets = [0, 63], sizes = [16, 512], strides = [1, 1]} : vector<16x768xbf16> to vector<16x512xbf16>
    %181 = vector.extract_strided_slice %0 {offsets = [3, 0], sizes = [1, 512], strides = [1, 1]} : vector<27x512xbf16> to vector<1x512xbf16>
    %182 = vector.broadcast %181 : vector<1x512xbf16> to vector<16x512xbf16>
    %183 = arith.mulf %180, %182 : vector<16x512xbf16>
    %c48_52 = arith.constant 48 : index
    %c0_53 = arith.constant 0 : index
    %184 = vector.load %arg6[%c48_52, %c0_53] : memref<432x512xbf16, #tpu.memory_space<vmem>>, vector<16x512xbf16>
    tpu.vector_store %arg6[%c48_52, %c0_53], %183 {strides = array<i32>} : memref<432x512xbf16, #tpu.memory_space<vmem>>, vector<16x512xbf16>,
    %185 = vector.extract_strided_slice %164 {offsets = [0, 64], sizes = [16, 512], strides = [1, 1]} : vector<16x768xbf16> to vector<16x512xbf16>
    %186 = vector.extract_strided_slice %0 {offsets = [4, 0], sizes = [1, 512], strides = [1, 1]} : vector<27x512xbf16> to vector<1x512xbf16>
    %187 = vector.broadcast %186 : vector<1x512xbf16> to vector<16x512xbf16>
    %188 = arith.mulf %185, %187 : vector<16x512xbf16>
    %c64_54 = arith.constant 64 : index
    %c0_55 = arith.constant 0 : index
    %189 = vector.load %arg6[%c64_54, %c0_55] : memref<432x512xbf16, #tpu.memory_space<vmem>>, vector<16x512xbf16>
    tpu.vector_store %arg6[%c64_54, %c0_55], %188 {strides = array<i32>} : memref<432x512xbf16, #tpu.memory_space<vmem>>, vector<16x512xbf16>,
    %190 = vector.extract_strided_slice %164 {offsets = [0, 65], sizes = [16, 512], strides = [1, 1]} : vector<16x768xbf16> to vector<16x512xbf16>
    %191 = vector.extract_strided_slice %0 {offsets = [5, 0], sizes = [1, 512], strides = [1, 1]} : vector<27x512xbf16> to vector<1x512xbf16>
    %192 = vector.broadcast %191 : vector<1x512xbf16> to vector<16x512xbf16>
    %193 = arith.mulf %190, %192 : vector<16x512xbf16>
    %c80_56 = arith.constant 80 : index
    %c0_57 = arith.constant 0 : index
    %194 = vector.load %arg6[%c80_56, %c0_57] : memref<432x512xbf16, #tpu.memory_space<vmem>>, vector<16x512xbf16>
    tpu.vector_store %arg6[%c80_56, %c0_57], %193 {strides = array<i32>} : memref<432x512xbf16, #tpu.memory_space<vmem>>, vector<16x512xbf16>,
    %195 = vector.extract_strided_slice %164 {offsets = [0, 71], sizes = [16, 512], strides = [1, 1]} : vector<16x768xbf16> to vector<16x512xbf16>
    %196 = vector.extract_strided_slice %0 {offsets = [6, 0], sizes = [1, 512], strides = [1, 1]} : vector<27x512xbf16> to vector<1x512xbf16>
    %197 = vector.broadcast %196 : vector<1x512xbf16> to vector<16x512xbf16>
    %198 = arith.mulf %195, %197 : vector<16x512xbf16>
    %c96_58 = arith.constant 96 : index
    %c0_59 = arith.constant 0 : index
    %199 = vector.load %arg6[%c96_58, %c0_59] : memref<432x512xbf16, #tpu.memory_space<vmem>>, vector<16x512xbf16>
    tpu.vector_store %arg6[%c96_58, %c0_59], %198 {strides = array<i32>} : memref<432x512xbf16, #tpu.memory_space<vmem>>, vector<16x512xbf16>,
    %200 = vector.extract_strided_slice %164 {offsets = [0, 72], sizes = [16, 512], strides = [1, 1]} : vector<16x768xbf16> to vector<16x512xbf16>
    %201 = vector.extract_strided_slice %0 {offsets = [7, 0], sizes = [1, 512], strides = [1, 1]} : vector<27x512xbf16> to vector<1x512xbf16>
    %202 = vector.broadcast %201 : vector<1x512xbf16> to vector<16x512xbf16>
    %203 = arith.mulf %200, %202 : vector<16x512xbf16>
    %c112_60 = arith.constant 112 : index
    %c0_61 = arith.constant 0 : index
    %204 = vector.load %arg6[%c112_60, %c0_61] : memref<432x512xbf16, #tpu.memory_space<vmem>>, vector<16x512xbf16>
    tpu.vector_store %arg6[%c112_60, %c0_61], %203 {strides = array<i32>} : memref<432x512xbf16, #tpu.memory_space<vmem>>, vector<16x512xbf16>,
    %205 = vector.extract_strided_slice %164 {offsets = [0, 73], sizes = [16, 512], strides = [1, 1]} : vector<16x768xbf16> to vector<16x512xbf16>
    %206 = vector.extract_strided_slice %0 {offsets = [8, 0], sizes = [1, 512], strides = [1, 1]} : vector<27x512xbf16> to vector<1x512xbf16>
    %207 = vector.broadcast %206 : vector<1x512xbf16> to vector<16x512xbf16>
    %208 = arith.mulf %205, %207 : vector<16x512xbf16>
    %c128_62 = arith.constant 128 : index
    %c0_63 = arith.constant 0 : index
    %209 = vector.load %arg6[%c128_62, %c0_63] : memref<432x512xbf16, #tpu.memory_space<vmem>>, vector<16x512xbf16>
    tpu.vector_store %arg6[%c128_62, %c0_63], %208 {strides = array<i32>} : memref<432x512xbf16, #tpu.memory_space<vmem>>, vector<16x512xbf16>,
    %210 = vector.extract_strided_slice %164 {offsets = [0, 119], sizes = [16, 512], strides = [1, 1]} : vector<16x768xbf16> to vector<16x512xbf16>
    %211 = vector.extract_strided_slice %0 {offsets = [9, 0], sizes = [1, 512], strides = [1, 1]} : vector<27x512xbf16> to vector<1x512xbf16>
    %212 = vector.broadcast %211 : vector<1x512xbf16> to vector<16x512xbf16>
    %213 = arith.mulf %210, %212 : vector<16x512xbf16>
    %c144_64 = arith.constant 144 : index
    %c0_65 = arith.constant 0 : index
    %214 = vector.load %arg6[%c144_64, %c0_65] : memref<432x512xbf16, #tpu.memory_space<vmem>>, vector<16x512xbf16>
    tpu.vector_store %arg6[%c144_64, %c0_65], %213 {strides = array<i32>} : memref<432x512xbf16, #tpu.memory_space<vmem>>, vector<16x512xbf16>,
    %215 = vector.extract_strided_slice %164 {offsets = [0, 120], sizes = [16, 512], strides = [1, 1]} : vector<16x768xbf16> to vector<16x512xbf16>
    %216 = vector.extract_strided_slice %0 {offsets = [10, 0], sizes = [1, 512], strides = [1, 1]} : vector<27x512xbf16> to vector<1x512xbf16>
    %217 = vector.broadcast %216 : vector<1x512xbf16> to vector<16x512xbf16>
    %218 = arith.mulf %215, %217 : vector<16x512xbf16>
    %c160_66 = arith.constant 160 : index
    %c0_67 = arith.constant 0 : index
    %219 = vector.load %arg6[%c160_66, %c0_67] : memref<432x512xbf16, #tpu.memory_space<vmem>>, vector<16x512xbf16>
    tpu.vector_store %arg6[%c160_66, %c0_67], %218 {strides = array<i32>} : memref<432x512xbf16, #tpu.memory_space<vmem>>, vector<16x512xbf16>,
    %220 = vector.extract_strided_slice %164 {offsets = [0, 121], sizes = [16, 512], strides = [1, 1]} : vector<16x768xbf16> to vector<16x512xbf16>
    %221 = vector.extract_strided_slice %0 {offsets = [11, 0], sizes = [1, 512], strides = [1, 1]} : vector<27x512xbf16> to vector<1x512xbf16>
    %222 = vector.broadcast %221 : vector<1x512xbf16> to vector<16x512xbf16>
    %223 = arith.mulf %220, %222 : vector<16x512xbf16>
    %c176_68 = arith.constant 176 : index
    %c0_69 = arith.constant 0 : index
    %224 = vector.load %arg6[%c176_68, %c0_69] : memref<432x512xbf16, #tpu.memory_space<vmem>>, vector<16x512xbf16>
    tpu.vector_store %arg6[%c176_68, %c0_69], %223 {strides = array<i32>} : memref<432x512xbf16, #tpu.memory_space<vmem>>, vector<16x512xbf16>,
    %225 = vector.extract_strided_slice %164 {offsets = [0, 127], sizes = [16, 512], strides = [1, 1]} : vector<16x768xbf16> to vector<16x512xbf16>
    %226 = vector.extract_strided_slice %0 {offsets = [12, 0], sizes = [1, 512], strides = [1, 1]} : vector<27x512xbf16> to vector<1x512xbf16>
    %227 = vector.broadcast %226 : vector<1x512xbf16> to vector<16x512xbf16>
    %228 = arith.mulf %225, %227 : vector<16x512xbf16>
    %c192_70 = arith.constant 192 : index
    %c0_71 = arith.constant 0 : index
    %229 = vector.load %arg6[%c192_70, %c0_71] : memref<432x512xbf16, #tpu.memory_space<vmem>>, vector<16x512xbf16>
    tpu.vector_store %arg6[%c192_70, %c0_71], %228 {strides = array<i32>} : memref<432x512xbf16, #tpu.memory_space<vmem>>, vector<16x512xbf16>,
    %230 = vector.extract_strided_slice %164 {offsets = [0, 128], sizes = [16, 512], strides = [1, 1]} : vector<16x768xbf16> to vector<16x512xbf16>
    %231 = vector.extract_strided_slice %0 {offsets = [13, 0], sizes = [1, 512], strides = [1, 1]} : vector<27x512xbf16> to vector<1x512xbf16>
    %232 = vector.broadcast %231 : vector<1x512xbf16> to vector<16x512xbf16>
    %233 = arith.mulf %230, %232 : vector<16x512xbf16>
    %c208_72 = arith.constant 208 : index
    %c0_73 = arith.constant 0 : index
    %234 = vector.load %arg6[%c208_72, %c0_73] : memref<432x512xbf16, #tpu.memory_space<vmem>>, vector<16x512xbf16>
    tpu.vector_store %arg6[%c208_72, %c0_73], %233 {strides = array<i32>} : memref<432x512xbf16, #tpu.memory_space<vmem>>, vector<16x512xbf16>,
    %235 = vector.extract_strided_slice %164 {offsets = [0, 129], sizes = [16, 512], strides = [1, 1]} : vector<16x768xbf16> to vector<16x512xbf16>
    %236 = vector.extract_strided_slice %0 {offsets = [14, 0], sizes = [1, 512], strides = [1, 1]} : vector<27x512xbf16> to vector<1x512xbf16>
    %237 = vector.broadcast %236 : vector<1x512xbf16> to vector<16x512xbf16>
    %238 = arith.mulf %235, %237 : vector<16x512xbf16>
    %c224_74 = arith.constant 224 : index
    %c0_75 = arith.constant 0 : index
    %239 = vector.load %arg6[%c224_74, %c0_75] : memref<432x512xbf16, #tpu.memory_space<vmem>>, vector<16x512xbf16>
    tpu.vector_store %arg6[%c224_74, %c0_75], %238 {strides = array<i32>} : memref<432x512xbf16, #tpu.memory_space<vmem>>, vector<16x512xbf16>,
    %240 = vector.extract_strided_slice %164 {offsets = [0, 135], sizes = [16, 512], strides = [1, 1]} : vector<16x768xbf16> to vector<16x512xbf16>
    %241 = vector.extract_strided_slice %0 {offsets = [15, 0], sizes = [1, 512], strides = [1, 1]} : vector<27x512xbf16> to vector<1x512xbf16>
    %242 = vector.broadcast %241 : vector<1x512xbf16> to vector<16x512xbf16>
    %243 = arith.mulf %240, %242 : vector<16x512xbf16>
    %c240_76 = arith.constant 240 : index
    %c0_77 = arith.constant 0 : index
    %244 = vector.load %arg6[%c240_76, %c0_77] : memref<432x512xbf16, #tpu.memory_space<vmem>>, vector<16x512xbf16>
    tpu.vector_store %arg6[%c240_76, %c0_77], %243 {strides = array<i32>} : memref<432x512xbf16, #tpu.memory_space<vmem>>, vector<16x512xbf16>,
    %245 = vector.extract_strided_slice %164 {offsets = [0, 136], sizes = [16, 512], strides = [1, 1]} : vector<16x768xbf16> to vector<16x512xbf16>
    %246 = vector.extract_strided_slice %0 {offsets = [16, 0], sizes = [1, 512], strides = [1, 1]} : vector<27x512xbf16> to vector<1x512xbf16>
    %247 = vector.broadcast %246 : vector<1x512xbf16> to vector<16x512xbf16>
    %248 = arith.mulf %245, %247 : vector<16x512xbf16>
    %c256_78 = arith.constant 256 : index
    %c0_79 = arith.constant 0 : index
    %249 = vector.load %arg6[%c256_78, %c0_79] : memref<432x512xbf16, #tpu.memory_space<vmem>>, vector<16x512xbf16>
    tpu.vector_store %arg6[%c256_78, %c0_79], %248 {strides = array<i32>} : memref<432x512xbf16, #tpu.memory_space<vmem>>, vector<16x512xbf16>,
    %250 = vector.extract_strided_slice %164 {offsets = [0, 137], sizes = [16, 512], strides = [1, 1]} : vector<16x768xbf16> to vector<16x512xbf16>
    %251 = vector.extract_strided_slice %0 {offsets = [17, 0], sizes = [1, 512], strides = [1, 1]} : vector<27x512xbf16> to vector<1x512xbf16>
    %252 = vector.broadcast %251 : vector<1x512xbf16> to vector<16x512xbf16>
    %253 = arith.mulf %250, %252 : vector<16x512xbf16>
    %c272_80 = arith.constant 272 : index
    %c0_81 = arith.constant 0 : index
    %254 = vector.load %arg6[%c272_80, %c0_81] : memref<432x512xbf16, #tpu.memory_space<vmem>>, vector<16x512xbf16>
    tpu.vector_store %arg6[%c272_80, %c0_81], %253 {strides = array<i32>} : memref<432x512xbf16, #tpu.memory_space<vmem>>, vector<16x512xbf16>,
    %255 = vector.extract_strided_slice %164 {offsets = [0, 183], sizes = [16, 512], strides = [1, 1]} : vector<16x768xbf16> to vector<16x512xbf16>
    %256 = vector.extract_strided_slice %0 {offsets = [18, 0], sizes = [1, 512], strides = [1, 1]} : vector<27x512xbf16> to vector<1x512xbf16>
    %257 = vector.broadcast %256 : vector<1x512xbf16> to vector<16x512xbf16>
    %258 = arith.mulf %255, %257 : vector<16x512xbf16>
    %c288_82 = arith.constant 288 : index
    %c0_83 = arith.constant 0 : index
    %259 = vector.load %arg6[%c288_82, %c0_83] : memref<432x512xbf16, #tpu.memory_space<vmem>>, vector<16x512xbf16>
    tpu.vector_store %arg6[%c288_82, %c0_83], %258 {strides = array<i32>} : memref<432x512xbf16, #tpu.memory_space<vmem>>, vector<16x512xbf16>,
    %260 = vector.extract_strided_slice %164 {offsets = [0, 184], sizes = [16, 512], strides = [1, 1]} : vector<16x768xbf16> to vector<16x512xbf16>
    %261 = vector.extract_strided_slice %0 {offsets = [19, 0], sizes = [1, 512], strides = [1, 1]} : vector<27x512xbf16> to vector<1x512xbf16>
    %262 = vector.broadcast %261 : vector<1x512xbf16> to vector<16x512xbf16>
    %263 = arith.mulf %260, %262 : vector<16x512xbf16>
    %c304_84 = arith.constant 304 : index
    %c0_85 = arith.constant 0 : index
    %264 = vector.load %arg6[%c304_84, %c0_85] : memref<432x512xbf16, #tpu.memory_space<vmem>>, vector<16x512xbf16>
    tpu.vector_store %arg6[%c304_84, %c0_85], %263 {strides = array<i32>} : memref<432x512xbf16, #tpu.memory_space<vmem>>, vector<16x512xbf16>,
    %265 = vector.extract_strided_slice %164 {offsets = [0, 185], sizes = [16, 512], strides = [1, 1]} : vector<16x768xbf16> to vector<16x512xbf16>
    %266 = vector.extract_strided_slice %0 {offsets = [20, 0], sizes = [1, 512], strides = [1, 1]} : vector<27x512xbf16> to vector<1x512xbf16>
    %267 = vector.broadcast %266 : vector<1x512xbf16> to vector<16x512xbf16>
    %268 = arith.mulf %265, %267 : vector<16x512xbf16>
    %c320_86 = arith.constant 320 : index
    %c0_87 = arith.constant 0 : index
    %269 = vector.load %arg6[%c320_86, %c0_87] : memref<432x512xbf16, #tpu.memory_space<vmem>>, vector<16x512xbf16>
    tpu.vector_store %arg6[%c320_86, %c0_87], %268 {strides = array<i32>} : memref<432x512xbf16, #tpu.memory_space<vmem>>, vector<16x512xbf16>,
    %270 = vector.extract_strided_slice %164 {offsets = [0, 191], sizes = [16, 512], strides = [1, 1]} : vector<16x768xbf16> to vector<16x512xbf16>
    %271 = vector.extract_strided_slice %0 {offsets = [21, 0], sizes = [1, 512], strides = [1, 1]} : vector<27x512xbf16> to vector<1x512xbf16>
    %272 = vector.broadcast %271 : vector<1x512xbf16> to vector<16x512xbf16>
    %273 = arith.mulf %270, %272 : vector<16x512xbf16>
    %c336_88 = arith.constant 336 : index
    %c0_89 = arith.constant 0 : index
    %274 = vector.load %arg6[%c336_88, %c0_89] : memref<432x512xbf16, #tpu.memory_space<vmem>>, vector<16x512xbf16>
    tpu.vector_store %arg6[%c336_88, %c0_89], %273 {strides = array<i32>} : memref<432x512xbf16, #tpu.memory_space<vmem>>, vector<16x512xbf16>,
    %275 = vector.extract_strided_slice %164 {offsets = [0, 192], sizes = [16, 512], strides = [1, 1]} : vector<16x768xbf16> to vector<16x512xbf16>
    %276 = vector.extract_strided_slice %0 {offsets = [22, 0], sizes = [1, 512], strides = [1, 1]} : vector<27x512xbf16> to vector<1x512xbf16>
    %277 = vector.broadcast %276 : vector<1x512xbf16> to vector<16x512xbf16>
    %278 = arith.mulf %275, %277 : vector<16x512xbf16>
    %c352_90 = arith.constant 352 : index
    %c0_91 = arith.constant 0 : index
    %279 = vector.load %arg6[%c352_90, %c0_91] : memref<432x512xbf16, #tpu.memory_space<vmem>>, vector<16x512xbf16>
    tpu.vector_store %arg6[%c352_90, %c0_91], %278 {strides = array<i32>} : memref<432x512xbf16, #tpu.memory_space<vmem>>, vector<16x512xbf16>,
    %280 = vector.extract_strided_slice %164 {offsets = [0, 193], sizes = [16, 512], strides = [1, 1]} : vector<16x768xbf16> to vector<16x512xbf16>
    %281 = vector.extract_strided_slice %0 {offsets = [23, 0], sizes = [1, 512], strides = [1, 1]} : vector<27x512xbf16> to vector<1x512xbf16>
    %282 = vector.broadcast %281 : vector<1x512xbf16> to vector<16x512xbf16>
    %283 = arith.mulf %280, %282 : vector<16x512xbf16>
    %c368_92 = arith.constant 368 : index
    %c0_93 = arith.constant 0 : index
    %284 = vector.load %arg6[%c368_92, %c0_93] : memref<432x512xbf16, #tpu.memory_space<vmem>>, vector<16x512xbf16>
    tpu.vector_store %arg6[%c368_92, %c0_93], %283 {strides = array<i32>} : memref<432x512xbf16, #tpu.memory_space<vmem>>, vector<16x512xbf16>,
    %285 = vector.extract_strided_slice %164 {offsets = [0, 199], sizes = [16, 512], strides = [1, 1]} : vector<16x768xbf16> to vector<16x512xbf16>
    %286 = vector.extract_strided_slice %0 {offsets = [24, 0], sizes = [1, 512], strides = [1, 1]} : vector<27x512xbf16> to vector<1x512xbf16>
    %287 = vector.broadcast %286 : vector<1x512xbf16> to vector<16x512xbf16>
    %288 = arith.mulf %285, %287 : vector<16x512xbf16>
    %c384_94 = arith.constant 384 : index
    %c0_95 = arith.constant 0 : index
    %289 = vector.load %arg6[%c384_94, %c0_95] : memref<432x512xbf16, #tpu.memory_space<vmem>>, vector<16x512xbf16>
    tpu.vector_store %arg6[%c384_94, %c0_95], %288 {strides = array<i32>} : memref<432x512xbf16, #tpu.memory_space<vmem>>, vector<16x512xbf16>,
    %290 = vector.extract_strided_slice %164 {offsets = [0, 200], sizes = [16, 512], strides = [1, 1]} : vector<16x768xbf16> to vector<16x512xbf16>
    %291 = vector.extract_strided_slice %0 {offsets = [25, 0], sizes = [1, 512], strides = [1, 1]} : vector<27x512xbf16> to vector<1x512xbf16>
    %292 = vector.broadcast %291 : vector<1x512xbf16> to vector<16x512xbf16>
    %293 = arith.mulf %290, %292 : vector<16x512xbf16>
    %c400_96 = arith.constant 400 : index
    %c0_97 = arith.constant 0 : index
    %294 = vector.load %arg6[%c400_96, %c0_97] : memref<432x512xbf16, #tpu.memory_space<vmem>>, vector<16x512xbf16>
    tpu.vector_store %arg6[%c400_96, %c0_97], %293 {strides = array<i32>} : memref<432x512xbf16, #tpu.memory_space<vmem>>, vector<16x512xbf16>,
    %295 = vector.extract_strided_slice %164 {offsets = [0, 201], sizes = [16, 512], strides = [1, 1]} : vector<16x768xbf16> to vector<16x512xbf16>
    %296 = vector.extract_strided_slice %0 {offsets = [26, 0], sizes = [1, 512], strides = [1, 1]} : vector<27x512xbf16> to vector<1x512xbf16>
    %297 = vector.broadcast %296 : vector<1x512xbf16> to vector<16x512xbf16>
    %298 = arith.mulf %295, %297 : vector<16x512xbf16>
    %c416_98 = arith.constant 416 : index
    %c0_99 = arith.constant 0 : index
    %299 = vector.load %arg6[%c416_98, %c0_99] : memref<432x512xbf16, #tpu.memory_space<vmem>>, vector<16x512xbf16>
    tpu.vector_store %arg6[%c416_98, %c0_99], %298 {strides = array<i32>} : memref<432x512xbf16, #tpu.memory_space<vmem>>, vector<16x512xbf16>,
    %c0_100 = arith.constant 0 : index
    %c0_101 = arith.constant 0 : index
    %300 = vector.load %arg6[%c0_100, %c0_101] : memref<432x512xbf16, #tpu.memory_space<vmem>>, vector<432x512xbf16>
    %cst_102 = arith.constant dense<0.000000e+00> : vector<8x512xf32>
    %301 = tpu.matmul %162, %300, %cst_102 {dimension_numbers = #tpu.dot_dimension_numbers<[1], [0], [0], [1], [0, 0, 1, 1], [], []>} : vector<8x432xbf16>, vector<432x512xbf16>, vector<8x512xf32> -> vector<8x512xf32>
    %cst_103 = arith.constant dense<0.000000e+00> : vector<8xf32>
    %302 = vector.multi_reduction <add>, %301, %cst_103 [1] : vector<8x512xf32> to vector<8xf32>
    %303 = vector.shape_cast %302 : vector<8xf32> to vector<8x1xf32>
    %cst_104 = arith.constant 5.120000e+02 : f32
    %304 = vector.broadcast %cst_104 : f32 to vector<8x1xf32>
    %305 = arith.divf %303, %304 : vector<8x1xf32>
    %306 = vector.broadcast %305 : vector<8x1xf32> to vector<8x512xf32>
    %307 = arith.subf %301, %306 : vector<8x512xf32>
    %308 = arith.mulf %307, %307 : vector<8x512xf32>
    %cst_105 = arith.constant dense<0.000000e+00> : vector<8xf32>
    %309 = vector.multi_reduction <add>, %308, %cst_105 [1] : vector<8x512xf32> to vector<8xf32>
    %310 = vector.shape_cast %309 : vector<8xf32> to vector<8x1xf32>
    %cst_106 = arith.constant 5.120000e+02 : f32
    %311 = vector.broadcast %cst_106 : f32 to vector<8x1xf32>
    %312 = arith.divf %310, %311 : vector<8x1xf32>
    %cst_107 = arith.constant 9.99999974E-6 : f32
    %313 = vector.broadcast %cst_107 : f32 to vector<8x1xf32>
    %314 = arith.addf %312, %313 : vector<8x1xf32>
    %315 = math.rsqrt %314 : vector<8x1xf32>
    %316 = vector.broadcast %315 : vector<8x1xf32> to vector<8x512xf32>
    %317 = arith.mulf %307, %316 : vector<8x512xf32>
    %cst_108 = arith.constant 0.000000e+00 : f32
    %318 = vector.broadcast %cst_108 : f32 to vector<8x512xf32>
    %319 = arith.maximumf %317, %318 : vector<8x512xf32>
    %c0_109 = arith.constant 0 : index
    %c0_110 = arith.constant 0 : index
    %c0_111 = arith.constant 0 : index
    %320 = vector.load %arg5[%c0_109, %c0_110, %c0_111] : memref<1x8x512xf32, #tpu.memory_space<vmem>>, vector<1x8x512xf32>
    %321 = vector.shape_cast %320 : vector<1x8x512xf32> to vector<8x512xf32>
    %322 = vector.shape_cast %319 : vector<8x512xf32> to vector<1x8x512xf32>
    tpu.vector_store %arg5[%c0_109, %c0_110, %c0_111], %322 {strides = array<i32>} : memref<1x8x512xf32, #tpu.memory_space<vmem>>, vector<1x8x512xf32>,
    return
  }
  func.func @transform_0(%arg0: i32) -> (i32, i32, i32) {
    %c0_i32 = arith.constant 0 : i32
    %c0_i32_0 = arith.constant 0 : i32
    %c0_i32_1 = arith.constant 0 : i32
    return %arg0, %c0_i32, %c0_i32_0 : i32, i32, i32
  }
  func.func @transform_1(%arg0: i32) -> (i32, i32) {
    %c0_i32 = arith.constant 0 : i32
    %c0_i32_0 = arith.constant 0 : i32
    %c0_i32_1 = arith.constant 0 : i32
    return %c0_i32, %c0_i32_0 : i32, i32
  }
  func.func @transform_2(%arg0: i32) -> (i32, i32) {
    %c0_i32 = arith.constant 0 : i32
    %c0_i32_0 = arith.constant 0 : i32
    %c0_i32_1 = arith.constant 0 : i32
    return %c0_i32, %c0_i32_0 : i32, i32
  }
  func.func @transform_3(%arg0: i32) -> (i32, i32) {
    %c0_i32 = arith.constant 0 : i32
    %c0_i32_0 = arith.constant 0 : i32
    %c0_i32_1 = arith.constant 0 : i32
    return %c0_i32, %c0_i32_0 : i32, i32
  }
  func.func @transform_4(%arg0: i32) -> (i32, i32, i32) {
    %c0_i32 = arith.constant 0 : i32
    %c0_i32_0 = arith.constant 0 : i32
    %c0_i32_1 = arith.constant 0 : i32
    return %arg0, %c0_i32, %c0_i32_0 : i32, i32, i32
  }
}

</mosaic_0001>

<bundles_post_ra>
// kernel: vgg_block_mc_forward.1
= control target key start
LH: loop header
LB: loop body
LE: loop exit
PB: predicated region body
PF: predicated region fallthrough
CT: control target
= control target key end

     0   :  { %s3841_s15 = smov 0   ;;  %s5911_s0 = inlined_call_operand.vmem [shape: bf16[2,16,512], index: 0, kind: input, shape index: {}]   ;;  %s5912_s1 = inlined_call_operand.vmem [shape: bf16[27,512], index: 1, kind: input, shape index: {}]   ;;  %s5913_s2 = inlined_call_operand.vmem [shape: bf16[16,432], index: 2, kind: input, shape index: {}]   ;;  %s5914_s3 = inlined_call_operand.vmem [shape: bf16[8,432], index: 3, kind: input, shape index: {}]   ;;  %s5915_s4 = inlined_call_operand.vmem [shape: f32[2,8,512], index: 4, kind: output, shape index: {}]  }
   0x1 LB: > { %s3663_s16 = sadd.s32 4294967295, %s3797_s15   ;;  %p3667_p0 = scmp.ge.s32.totalorder %s3797_s15, 1  ;;  %s3797_s15 = sphi %s3841_s15, %s14_s15  }
   0x2   : > { %p162_p1 = scmp.lt.s32.totalorder %s3797_s15, 3 }
   0x4   : > { %p163_p2 = pnand %p3667_p0, %p162_p1 }
   0x6   : > { %166 = sbr.rel (%p163_p2) target bundleno = 2008 (0x7d8), region = 36 }
   0xd   : > { %v200_v0 = vld [vmem:[%s5912_s1 + $0x8] sm:$0xff]  ;;  %v248_v1 = vlaneseq  ;;  %v199_v2 = vld [vmem:[%s5912_s1] sm:$0xff]  ;;  %p188_p3 = scmp.lt.s32.totalorder %s3663_s16, 1  ;;  %s3799_s21 = smov 55   ;;  %v201_v52 = vld [vmem:[%s5912_s1 + $0x10] sm:$0xff]  ;;  %vm285_vm0 = vcmask 449536  }
   0xe   : > { %v3678_v3 = vcombine.low %v200_v0, %v200_v0  ;;  %v3679_v4 = vcombine.high %v200_v0, %v200_v0  ;;  %v3676_v5 = vcombine.low %v199_v2, %v199_v2  ;;  %v3677_v6 = vcombine.high %v199_v2, %v199_v2  ;;  %s3800_s26 = smov 56   ;;  %s3801_s27 = smov 57   ;;  %v202_v57 = vld [vmem:[%s5912_s1 + $0x18] sm:$0xff] }
   0xf   : > { %v3855_v7 = vshrl.u32 %v248_v1, 7  ;;  %s6249_s16 = smov (!%p188_p3, %s3663_s16), 1  ;;  %s3802_s28 = smov 63   ;;  %v3680_v53 = vcombine.low %v201_v52, %v201_v52  ;;  %v3681_v56 = vcombine.high %v201_v52, %v201_v52  ;;  %v3682_v60 = vcombine.low %v202_v57, %v202_v57 }
  0x10   : > { %v3857_v8 = vpack.i.b16 %v3678_v3, %v3678_v3  ;;  %v3859_v9 = vpack.i.b16 %v3676_v5, %v3676_v5  ;;  %v3861_v10 = vpack.i.b16 %v3679_v4, %v3679_v4  ;;  %v3866_v12 = vpack.i.b16 %v3677_v6, %v3677_v6  ;;  %s3706_s22 = sshll.u32 %s6249_s16, 5  ;;  %s3803_s29 = smov 64  }
  0x11   : > { %v3864_v11 = vsub.s32 0, %v3855_v7  ;;  %v327_v13 = vshrl.u32 %v3676_v5, 16  ;;  %v334_v14 = vshrl.u32 %v3677_v6, 16  ;;  %v341_v18 = vshrl.u32 %v3678_v3, 16  ;;  %s3904_s25 = scalar_lea.vmem %s5911_s0, %s3706_s22  ;;  %s3804_s30 = smov 65  }
  0x12   : > { %v348_v22 = vshrl.u32 %v3679_v4, 16  ;;  %v3913_v29 = vsub.s32 1, %v3855_v7  ;;  %v3940_v38 = vsub.s32 2, %v3855_v7  ;;  %v3967_v47 = vsub.s32 3, %v3855_v7  ;;  %s3805_s5 = smov 71   ;;  %s3806_s10 = smov 72  }
  0x13   : > { %v265_v15 = vrot.slane %v3857_v8, %v3864_v11  ;;  %v251_v16 = vrot.slane %v3859_v9, %v3864_v11  ;;  %v272_v17 = vrot.slane %v3861_v10, %v3864_v11  ;;  %v258_v19 = vrot.slane %v3866_v12, %v3864_v11  ;;  %s3807_s11 = smov 73   ;;  %s3808_s12 = smov 119  }
  0x14   : > { %v3880_v20 = vpack.i.b16 %v327_v13, %v327_v13  ;;  %v3882_v21 = vpack.i.b16 %v334_v14, %v334_v14  ;;  %v3888_v23 = vpack.i.b16 %v341_v18, %v341_v18  ;;  %v3897_v26 = vpack.i.b16 %v348_v22, %v348_v22  ;;  %s3809_s13 = smov 120   ;;  %s3810_s14 = smov 121  }
  0x15   : > { %281 = vrot.lane.b32.xlu1 %v265_v15, %s3799_s21  ;;  %277 = vrot.lane.b32.xlu0 %v251_v16, %s3799_s21  ;;  %v412_v30 = vrot.slane %v3859_v9, %v3913_v29  ;;  %v416_v31 = vrot.slane %v3866_v12, %v3913_v29  ;;  %v420_v32 = vrot.slane %v3857_v8, %v3913_v29  ;;  %v912_v1 = vshrl.u32 %v3680_v53, 16  ;;  %s3811_s17 = smov 127   ;;  %s3812_s18 = smov 1  }
  0x16   : > { %v333_v24 = vrot.slane %v3880_v20, %v3864_v11  ;;  %v340_v25 = vrot.slane %v3882_v21, %v3864_v11  ;;  %v347_v27 = vrot.slane %v3888_v23, %v3864_v11  ;;  %v354_v28 = vrot.slane %v3897_v26, %v3864_v11  ;;  %s3813_s19 = smov 7   ;;  %s3814_s7 = smov 8  }
  0x17   : > { %v424_v33 = vrot.slane %v3861_v10, %v3913_v29  ;;  %v482_v34 = vrot.slane %v3880_v20, %v3913_v29  ;;  %v486_v35 = vrot.slane %v3882_v21, %v3913_v29  ;;  %v490_v36 = vrot.slane %v3888_v23, %v3913_v29  ;;  %s3815_s8 = smov 9  }
  0x18   : > { %v494_v37 = vrot.slane %v3897_v26, %v3913_v29  ;;  %v552_v39 = vrot.slane %v3859_v9, %v3940_v38  ;;  %v556_v40 = vrot.slane %v3866_v12, %v3940_v38  ;;  %v560_v41 = vrot.slane %v3857_v8, %v3940_v38 }
  0x19   : > { %283 = vrot.lane.b32.xlu1 %v272_v17, %s3799_s21  ;;  %279 = vrot.lane.b32.xlu0 %v258_v19, %s3799_s21  ;;  %v564_v42 = vrot.slane %v3861_v10, %v3940_v38  ;;  %v621_v43 = vrot.slane %v3880_v20, %v3940_v38  ;;  %v625_v44 = vrot.slane %v3882_v21, %v3940_v38  ;;  %v919_v5 = vshrl.u32 %v3681_v56, 16 }
  0x1a   : > { %v629_v45 = vrot.slane %v3888_v23, %v3940_v38  ;;  %v633_v46 = vrot.slane %v3897_v26, %v3940_v38  ;;  %v689_v48 = vrot.slane %v3859_v9, %v3967_v47  ;;  %v693_v49 = vrot.slane %v3866_v12, %v3967_v47 }
  0x1b   : > { %v697_v50 = vrot.slane %v3857_v8, %v3967_v47  ;;  %v701_v51 = vrot.slane %v3861_v10, %v3967_v47  ;;  %v757_v54 = vrot.slane %v3880_v20, %v3967_v47  ;;  %v761_v55 = vrot.slane %v3882_v21, %v3967_v47 }
  0x1c   : > { %v765_v58 = vrot.slane %v3888_v23, %v3967_v47  ;;  %v769_v59 = vrot.slane %v3897_v26, %v3967_v47  ;;  %v3999_v61 = vpack.i.b16 %v3680_v53, %v3680_v53  ;;  %v4001_v62 = vpack.i.b16 %v3681_v56, %v3681_v56  ;;  %v204_v53 = vld [vmem:[%s5912_s1 + $0x28] sm:$0xff] }
  0x1d   : > { %359 = vrot.lane.b32.xlu0 %v333_v24, %s3800_s26  ;;  %361 = vrot.lane.b32.xlu1 %v340_v25, %s3800_s26  ;;  %v3683_v63 = vcombine.high %v202_v57, %v202_v57  ;;  %v4003_v0 = vpack.i.b16 %v3682_v60, %v3682_v60  ;;  %v4011_v6 = vpack.i.b16 %v912_v1, %v912_v1  ;;  %v926_v7 = vshrl.u32 %v3682_v60, 16 }
  0x1e   : > { %v838_v2 = vrot.slane %v3999_v61, %v3864_v11  ;;  %v845_v3 = vrot.slane %v4001_v62, %v3864_v11  ;;  %v4018_v10 = vpack.i.b16 %v919_v5, %v919_v5  ;;  %v997_v19 = vrot.slane %v3999_v61, %v3913_v29 }
  0x1f   : > { %v854_v4 = vpack.i.b16 %v3683_v63, %v3683_v63  ;;  %v852_v8 = vrot.slane %v4003_v0, %v3864_v11  ;;  %v933_v12 = vshrl.u32 %v3683_v63, 16  ;;  %v918_v13 = vrot.slane %v4011_v6, %v3864_v11 }
  0x20   : > { %v925_v14 = vrot.slane %v4018_v10, %v3864_v11  ;;  %v4026_v15 = vpack.i.b16 %v926_v7, %v926_v7  ;;  %v1001_v20 = vrot.slane %v4001_v62, %v3913_v29  ;;  %v1005_v21 = vrot.slane %v4003_v0, %v3913_v29 }
  0x21   : > { %363 = vrot.lane.b32.xlu0 %v347_v27, %s3800_s26  ;;  %365 = vrot.lane.b32.xlu1 %v354_v28, %s3800_s26  ;;  %v859_v9 = vrot.slane %v854_v4, %v3864_v11  ;;  %v4028_v16 = vpack.i.b16 %v933_v12, %v933_v12  ;;  %v1009_v22 = vrot.slane %v854_v4, %v3913_v29  ;;  %vm367_vm1 = vcmask 457728  }
  0x22   : > { %v932_v17 = vrot.slane %v4026_v15, %v3864_v11  ;;  %v1067_v23 = vrot.slane %v4011_v6, %v3913_v29  ;;  %v1071_v24 = vrot.slane %v4018_v10, %v3913_v29  ;;  %v1075_v25 = vrot.slane %v4026_v15, %v3913_v29 }
  0x23   : > { %v939_v18 = vrot.slane %v4028_v16, %v3864_v11  ;;  %v1079_v26 = vrot.slane %v4028_v16, %v3913_v29  ;;  %v1137_v27 = vrot.slane %v3999_v61, %v3940_v38  ;;  %v1141_v28 = vrot.slane %v4001_v62, %v3940_v38 }
  0x24   : > { %v3686_v63 = vcombine.low %v204_v53, %v204_v53  ;;  %vm437_vm2 = vcmask 465920   ;;  %vm507_vm3 = vcmask 515072   ;;  %vm577_vm4 = vcmask 523264  }
  0x25   : > { %429 = vrot.lane.b32.xlu0 %v412_v30, %s3801_s27  ;;  %431 = vrot.lane.b32.xlu1 %v416_v31, %s3801_s27  ;;  %v1145_v30 = vrot.slane %v4003_v0, %v3940_v38  ;;  %v1149_v31 = vrot.slane %v854_v4, %v3940_v38  ;;  %vm536_vm5 = vcmask 531456   ;;  %vm466_vm6 = vcmask 580608  }
  0x26   : > { %v4145_v7 = vpack.i.b16 %v3686_v63, %v3686_v63  ;;  %vm396_vm7 = vcmask 588800   ;;  %vm314_vm8 = vcmask 596992   ;;  %vm5962_vm9 = vcmask 973824  }
  0x27   : > { %vm1022_vm10 = vcmask 982016   ;;  %vm5993_vm11 = vcmask 990208   ;;  %vm5992_vm12 = vcmask 1039360   ;;  %vm5994_vm13 = vcmask 7168  }
  0x28   : > { %vm5996_vm14 = vcmask 56320   ;;  %vm1051_vm15 = vcmask 64512  }
  0x29   : > { %433 = vrot.lane.b32.xlu0 %v420_v32, %s3801_s27  ;;  %435 = vrot.lane.b32.xlu1 %v424_v33, %s3801_s27  ;;  %v1231_v32 = vrot.slane %v3999_v61, %v3967_v47  ;;  %v1235_v33 = vrot.slane %v4001_v62, %v3967_v47  ;;  %v4129_v61 = vld [vmem:[%s3904_s25 + $0xc] ss:$16 sps:$4 sm:$0xff]  }
  0x2d   : > { %499 = vrot.lane.b32.xlu0 %v482_v34, %s3802_s28  ;;  %501 = vrot.lane.b32.xlu1 %v486_v35, %s3802_s28  ;;  %v1239_v34 = vrot.slane %v4003_v0, %v3967_v47  ;;  %v1243_v35 = vrot.slane %v854_v4, %v3967_v47 }
  0x31   : > { %503 = vrot.lane.b32.xlu0 %v490_v36, %s3802_s28  ;;  %505 = vrot.lane.b32.xlu1 %v494_v37, %s3802_s28  ;;  %v1299_v36 = vrot.slane %v4011_v6, %v3967_v47  ;;  %v1303_v37 = vrot.slane %v4018_v10, %v3967_v47 }
  0x35   : > { %569 = vrot.lane.b32.xlu0 %v552_v39, %s3803_s29  ;;  %571 = vrot.lane.b32.xlu1 %v556_v40, %s3803_s29  ;;  %v1307_v39 = vrot.slane %v4026_v15, %v3967_v47 }
  0x39   : > { %573 = vrot.lane.b32.xlu0 %v560_v41, %s3803_s29  ;;  %575 = vrot.lane.b32.xlu1 %v564_v42, %s3803_s29 }
  0x3d   : > { %638 = vrot.lane.b32.xlu0 %v621_v43, %s3804_s30  ;;  %640 = vrot.lane.b32.xlu1 %v625_v44, %s3804_s30  ;;  %v203_v43 = vld [vmem:[%s5912_s1 + $0x20] sm:$0xff]  ;;  %v1311_v44 = vrot.slane %v4028_v16, %v3967_v47 }
  0x3e   : > { %v3685_v56 = vcombine.high %v203_v43, %v203_v43 }
  0x40   : > { %v4136_v1 = vpack.i.b16 %v3685_v56, %v3685_v56 }
  0x41   : > { %642 = vrot.lane.b32.xlu0 %v629_v45, %s3804_s30  ;;  %644 = vrot.lane.b32.xlu1 %v633_v46, %s3804_s30  ;;  %v4098_v45 = vld [vmem:[%s3904_s25] ss:$16 sps:$4 sm:$0xff]  }
  0x45   : > { %706 = vrot.lane.b32.xlu0 %v689_v48, %s3805_s5  ;;  %708 = vrot.lane.b32.xlu1 %v693_v49, %s3805_s5  ;;  %v4104_v49 = vld [vmem:[%s3904_s25 + $0x4] ss:$16 sps:$4 sm:$0xff]  }
  0x49   : > { %710 = vrot.lane.b32.xlu0 %v697_v50, %s3805_s5  ;;  %712 = vrot.lane.b32.xlu1 %v701_v51, %s3805_s5  ;;  %v3684_v50 = vcombine.low %v203_v43, %v203_v43 }
  0x4b   : > { %v4131_v62 = vpack.i.b16 %v3684_v50, %v3684_v50 }
  0x4d   : > { %774 = vrot.lane.b32.xlu0 %v757_v54, %s3806_s10  ;;  %776 = vrot.lane.b32.xlu1 %v761_v55, %s3806_s10  ;;  %v4119_v55 = vld [vmem:[%s3904_s25 + $0x8] ss:$16 sps:$4 sm:$0xff]   ;;  %v1380_v5 = vrot.slane %v4131_v62, %v3864_v11 }
  0x51   : > { %778 = vrot.lane.b32.xlu0 %v765_v58, %s3806_s10  ;;  %780 = vrot.lane.b32.xlu1 %v769_v59, %s3806_s10 }
  0x55   : > { %864 = vrot.lane.b32.xlu0 %v838_v2, %s3807_s11  ;;  %866 = vrot.lane.b32.xlu1 %v845_v3, %s3807_s11 }
  0x59   : > { %868 = vrot.lane.b32.xlu0 %v852_v8, %s3807_s11  ;;  %870 = vrot.lane.b32.xlu1 %v859_v9, %s3807_s11  ;;  %v1387_v8 = vrot.slane %v4136_v1, %v3864_v11 }
  0x5d   : > { %944 = vrot.lane.b32.xlu0 %v918_v13, %s3808_s12  ;;  %946 = vrot.lane.b32.xlu1 %v925_v14, %s3808_s12  ;;  %v1394_v13 = vrot.slane %v4145_v7, %v3864_v11  ;;  %v3687_v14 = vcombine.high %v204_v53, %v204_v53 }
  0x61   : > { %948 = vrot.lane.b32.xlu0 %v932_v17, %s3808_s12  ;;  %950 = vrot.lane.b32.xlu1 %v939_v18, %s3808_s12 }
  0x65   : > { %1014 = vrot.lane.b32.xlu0 %v997_v19, %s3809_s13  ;;  %1016 = vrot.lane.b32.xlu1 %v1001_v20, %s3809_s13 }
  0x69   : > { %1018 = vrot.lane.b32.xlu0 %v1005_v21, %s3809_s13  ;;  %1020 = vrot.lane.b32.xlu1 %v1009_v22, %s3809_s13  ;;  %v4165_v22 = vpack.i.b16 %v3687_v14, %v3687_v14 }
  0x6d   : > { %1084 = vrot.lane.b32.xlu0 %v1067_v23, %s3810_s14  ;;  %1086 = vrot.lane.b32.xlu1 %v1071_v24, %s3810_s14  ;;  %v1454_v24 = vshrl.u32 %v3684_v50, 16  ;;  %v1475_v50 = vshrl.u32 %v3687_v14, 16 }
  0x71   : > { %1088 = vrot.lane.b32.xlu0 %v1075_v25, %s3810_s14  ;;  %1090 = vrot.lane.b32.xlu1 %v1079_v26, %s3810_s14 }
  0x75   : > { %1154 = vrot.lane.b32.xlu0 %v1137_v27, %s3811_s17  ;;  %1156 = vrot.lane.b32.xlu1 %v1141_v28, %s3811_s17  ;;  %v1401_v28 = vrot.slane %v4165_v22, %v3864_v11 }
  0x79   : > { %1158 = vrot.lane.b32.xlu0 %v1145_v30, %s3811_s17  ;;  %1160 = vrot.lane.b32.xlu1 %v1149_v31, %s3811_s17  ;;  %v1461_v30 = vshrl.u32 %v3685_v56, 16 }
  0x7d   : > { %1248 = vrot.lane.b32.xlu0 %v1231_v32, %s3812_s18  ;;  %1250 = vrot.lane.b32.xlu1 %v1235_v33, %s3812_s18  ;;  %v4180_v32 = vpack.i.b16 %v1454_v24, %v1454_v24  ;;  %v1468_v33 = vshrl.u32 %v3686_v63, 16  ;;  %v1541_v24 = vrot.slane %v4136_v1, %v3913_v29 }
  0x81   : > { %1252 = vrot.lane.b32.xlu0 %v1239_v34, %s3812_s18  ;;  %1254 = vrot.lane.b32.xlu1 %v1243_v35, %s3812_s18 }
  0x85   : > { %1316 = vrot.lane.b32.xlu0 %v1299_v36, %s3813_s19  ;;  %1318 = vrot.lane.b32.xlu1 %v1303_v37, %s3813_s19  ;;  %v4189_v37 = vpack.i.b16 %v1461_v30, %v1461_v30  ;;  %v1545_v30 = vrot.slane %v4145_v7, %v3913_v29 }
  0x87   : > { %v282_v40 = vpop.permute.xlu1 %281  ;;  %v278_v41 = vpop.permute.xlu0 %277 }
  0x88   : > { %v294_v42 = vmul.bf16 0, %v278_v41 }
  0x89   : > { %1320 = vrot.lane.b32.xlu0 %v1307_v39, %s3813_s19 }
  0x8a   : > { %304 = vrot.lane.b32.xlu1 %v294_v42, %s3807_s11 }
  0x8b   : > { %v4101_v46 = vpop.permute.xlu1 %283  ;;  %v280_v48 = vpop.permute.xlu0 %279 }
  0x8c   : > { %6022 = vst [vmem:[#allocation3_spill] sm:$0xff] %v4101_v46  ;;  %v4107_v51 = vsel %vm285_vm0, %v278_v41, %v280_v48  ;;  %v4110_v52 = vsel %vm285_vm0, %v280_v48, %v282_v40  ;;  %v4123_v57 = vsel %vm285_vm0, %v282_v40, %v4101_v46  ;;  %v298_v4 = vmul.bf16 %v4129_v61, %v4101_v46 }
  0x8d   : > { %6023 = vst [vmem:[#allocation4_spill] sm:$0xff] %v4107_v51  ;;  %1322 = vrot.lane.b32.xlu0 %v1311_v44, %s3813_s19  ;;  %v295_v54 = vmul.bf16 %v4098_v45, %v4107_v51  ;;  %6024 = vst [vmem:[#allocation5_spill] sm:$0xff] %v4123_v57  ;;  %v296_v60 = vmul.bf16 %v4104_v49, %v4110_v52  ;;  %v297_v0 = vmul.bf16 %v4119_v55, %v4123_v57 }
  0x8e   : > { %v1460_v40 = vrot.slane %v4180_v32, %v3864_v11  ;;  %v4196_v41 = vpack.i.b16 %v1468_v33, %v1468_v33  ;;  %v1467_v44 = vrot.slane %v4189_v37, %v3864_v11  ;;  %v1813_v57 = vrot.slane %v4136_v1, %v3967_v47 }
  0x8f   : > { %v360_v58 = vpop.permute.xlu0 %359  ;;  %306 = vrot.lane.b32.xlu1 %v295_v54, %s3807_s11  ;;  %v362_v59 = vpop.permute.xlu1 %361 }
  0x90   : > { %v4154_v17 = vsel %vm367_vm1, %v360_v58, %v362_v59  ;;  %v376_v25 = vmul.bf16 0, %v360_v58  ;;  %v1474_v48 = vrot.slane %v4196_v41, %v3864_v11 }
  0x91   : > { %308 = vrot.lane.b32.xlu0 %v296_v60, %s3807_s11  ;;  %6026 = vst [vmem:[#allocation7_spill] sm:$0xff] %v4154_v17  ;;  %v377_v21 = vmul.bf16 %v4098_v45, %v4154_v17  ;;  %v4222_v60 = vpack.i.b16 %v1475_v50, %v1475_v50 }
  0x93   : > { %v364_v2 = vpop.permute.xlu0 %363  ;;  %310 = vrot.lane.b32.xlu1 %v297_v0, %s3807_s11  ;;  %v4139_v3 = vpop.permute.xlu1 %365 }
  0x94   : > { %6025 = vst [vmem:[#allocation6_spill] sm:$0xff] %v4139_v3  ;;  %v4158_v18 = vsel %vm367_vm1, %v362_v59, %v364_v2  ;;  %v4177_v31 = vsel %vm367_vm1, %v364_v2, %v4139_v3  ;;  %v380_v39 = vmul.bf16 %v4129_v61, %v4139_v3 }
  0x95   : > { %312 = vrot.lane.b32.xlu0 %v298_v4, %s3807_s11  ;;  %6027 = vst [vmem:[#allocation8_spill] sm:$0xff] %v4158_v18  ;;  %v378_v23 = vmul.bf16 %v4104_v49, %v4158_v18  ;;  %6029 = vst [vmem:[#allocation10_spill] sm:$0xff] %v4177_v31  ;;  %v379_v36 = vmul.bf16 %v4119_v55, %v4177_v31 }
  0x97   : > { %v430_v9 = vpop.permute.xlu0 %429  ;;  %1406 = vrot.lane.b32.xlu1 %v1380_v5, %s3814_s7  ;;  %v432_v12 = vpop.permute.xlu1 %431  ;;  %v1481_v5 = vrot.slane %v4222_v60, %v3864_v11 }
  0x98   : > { %v4209_v53 = vsel %vm437_vm2, %v430_v9, %v432_v12  ;;  %v446_v4 = vmul.bf16 0, %v430_v9 }
  0x99   : > { %1408 = vrot.lane.b32.xlu0 %v1387_v8, %s3814_s7  ;;  %6031 = vst [vmem:[#allocation12_spill] sm:$0xff] %v4209_v53  ;;  %v447_v59 = vmul.bf16 %v4098_v45, %v4209_v53 }
  0x9b   : > { %v434_v19 = vpop.permute.xlu0 %433  ;;  %1410 = vrot.lane.b32.xlu1 %v1394_v13, %s3814_s7  ;;  %v4161_v20 = vpop.permute.xlu1 %435 }
  0x9c   : > { %6028 = vst [vmem:[#allocation9_spill] sm:$0xff] %v4161_v20  ;;  %v4217_v58 = vsel %vm437_vm2, %v432_v12, %v434_v19  ;;  %v4236_v8 = vsel %vm437_vm2, %v434_v19, %v4161_v20  ;;  %v450_v19 = vmul.bf16 %v4129_v61, %v4161_v20  ;;  %v1673_v20 = vrot.slane %v4131_v62, %v3940_v38 }
  0x9d   : > { %388 = vrot.lane.b32.xlu0 %v377_v21, %s3806_s10  ;;  %6033 = vst [vmem:[#allocation14_spill] sm:$0xff] %v4217_v58  ;;  %v448_v2 = vmul.bf16 %v4104_v49, %v4217_v58  ;;  %6034 = vst [vmem:[#allocation15_spill] sm:$0xff] %v4236_v8  ;;  %v449_v9 = vmul.bf16 %v4119_v55, %v4236_v8 }
  0x9f   : > { %v4170_v26 = vpop.permute.xlu0 %499  ;;  %390 = vrot.lane.b32.xlu1 %v378_v23, %s3806_s10  ;;  %v502_v27 = vpop.permute.xlu1 %501  ;;  %v1537_v23 = vrot.slane %v4131_v62, %v3913_v29 }
  0xa0   : > { %v4267_v33 = vsel %vm507_vm3, %v4170_v26, %v502_v27  ;;  %v516_v50 = vmul.bf16 0, %v4170_v26 }
  0xa1   : > { %386 = vrot.lane.b32.xlu0 %v376_v25, %s3806_s10  ;;  %6037 = vst [vmem:[#allocation18_spill] sm:$0xff] %v4267_v33 }
  0xa3   : > { %v4182_v34 = vpop.permute.xlu0 %503  ;;  %1412 = vrot.lane.b32.xlu1 %v1401_v28, %s3814_s7  ;;  %v4185_v35 = vpop.permute.xlu1 %505 }
  0xa4   : > { %6030 = vst [vmem:[#allocation11_spill] sm:$0xff] %v4185_v35 }
  0xa5   : > { %392 = vrot.lane.b32.xlu0 %v379_v36, %s3806_s10  ;;  %v4272_v36 = vsel %vm507_vm3, %v502_v27, %v4182_v34 }
  0xa6   : > { %6038 = vst [vmem:[#allocation19_spill] sm:$0xff] %v4272_v36 }
  0xa7   : > { %v4198_v42 = vpop.permute.xlu0 %569  ;;  %394 = vrot.lane.b32.xlu1 %v380_v39, %s3806_s10  ;;  %v4201_v43 = vpop.permute.xlu1 %571 }
  0xa9   : > { %1486 = vrot.lane.b32.xlu0 %v1460_v40, %s3815_s8 }
  0xab   : > { %v4211_v54 = vpop.permute.xlu0 %573  ;;  %1488 = vrot.lane.b32.xlu1 %v1467_v44, %s3815_s8  ;;  %v4214_v56 = vpop.permute.xlu1 %575  ;;  %v517_v44 = vmul.bf16 %v4098_v45, %v4267_v33 }
  0xac   : > { %6032 = vst [vmem:[#allocation13_spill] sm:$0xff] %v4214_v56 }
  0xad   : > { %1490 = vrot.lane.b32.xlu0 %v1474_v48, %s3815_s8  ;;  %v518_v48 = vmul.bf16 %v4104_v49, %v4272_v36  ;;  %v586_v36 = vmul.bf16 0, %v4198_v42 }
  0xaf   : > { %v4224_v63 = vpop.permute.xlu0 %638  ;;  %458 = vrot.lane.b32.xlu1 %v447_v59, %s3805_s5  ;;  %v4227_v0 = vpop.permute.xlu1 %640 }
  0xb1   : > { %460 = vrot.lane.b32.xlu0 %v448_v2, %s3805_s5  ;;  %v1549_v2 = vrot.slane %v4165_v22, %v3913_v29 }
  0xb3   : > { %v4238_v12 = vpop.permute.xlu0 %642  ;;  %456 = vrot.lane.b32.xlu1 %v446_v4, %s3805_s5  ;;  %v4241_v13 = vpop.permute.xlu1 %644  ;;  %v4295_v4 = vsel %vm507_vm3, %v4182_v34, %v4185_v35  ;;  %v1605_v34 = vrot.slane %v4180_v32, %v3913_v29 }
  0xb4   : > { %6035 = vst [vmem:[#allocation16_spill] sm:$0xff] %v4241_v13  ;;  %6040 = vst [vmem:[#allocation21_spill] sm:$0xff] %v4295_v4 }
  0xb5   : > { %1492 = vrot.lane.b32.xlu0 %v1481_v5, %s3815_s8 }
  0xb7   : > { %v4246_v14 = vpop.permute.xlu0 %706  ;;  %462 = vrot.lane.b32.xlu1 %v449_v9, %s3805_s5  ;;  %v4249_v21 = vpop.permute.xlu1 %708  ;;  %v519_v9 = vmul.bf16 %v4119_v55, %v4295_v4 }
  0xb8   : > { %v722_v31 = vmul.bf16 0, %v4246_v14 }
  0xb9   : > { %464 = vrot.lane.b32.xlu0 %v450_v19, %s3805_s5  ;;  %v520_v19 = vmul.bf16 %v4129_v61, %v4185_v35 }
  0xbb   : > { %v4258_v25 = vpop.permute.xlu0 %710  ;;  %1554 = vrot.lane.b32.xlu1 %v1537_v23, %s3799_s21  ;;  %v4261_v28 = vpop.permute.xlu1 %712 }
  0xbc   : > { %6036 = vst [vmem:[#allocation17_spill] sm:$0xff] %v4261_v28  ;;  %v4451_v18 = vsel %vm466_vm6, %v4249_v21, %v4258_v25 }
  0xbd   : > { %1556 = vrot.lane.b32.xlu0 %v1541_v24, %s3799_s21  ;;  %6050 = vst [vmem:[#allocation31_spill] sm:$0xff] %v4451_v18  ;;  %v724_v53 = vmul.bf16 %v4104_v49, %v4451_v18 }
  0xbf   : > { %v4274_v39 = vpop.permute.xlu0 %774  ;;  %1558 = vrot.lane.b32.xlu1 %v1545_v30, %s3799_s21  ;;  %v4277_v40 = vpop.permute.xlu1 %776  ;;  %v1609_v30 = vrot.slane %v4189_v37, %v3913_v29 }
  0xc1   : > { %528 = vrot.lane.b32.xlu0 %v517_v44, %s3804_s30  ;;  %v1613_v44 = vrot.slane %v4196_v41, %v3913_v29 }
  0xc3   : > { %v4285_v59 = vpop.permute.xlu0 %778  ;;  %530 = vrot.lane.b32.xlu1 %v518_v48, %s3804_s30  ;;  %v4288_v27 = vpop.permute.xlu1 %780  ;;  %v4323_v48 = vsel %vm577_vm4, %v4198_v42, %v4201_v43  ;;  %v590_v42 = vmul.bf16 %v4129_v61, %v4214_v56 }
  0xc4   : > { %6039 = vst [vmem:[#allocation20_spill] sm:$0xff] %v4288_v27  ;;  %6042 = vst [vmem:[#allocation23_spill] sm:$0xff] %v4323_v48 }
  0xc5   : > { %526 = vrot.lane.b32.xlu0 %v516_v50, %s3804_s30 }
  0xc7   : > { %v4298_v5 = vpop.permute.xlu0 %864  ;;  %1560 = vrot.lane.b32.xlu1 %v1549_v2, %s3799_s21  ;;  %v4301_v26 = vpop.permute.xlu1 %866 }
  0xc9   : > { %532 = vrot.lane.b32.xlu0 %v519_v9, %s3804_s30  ;;  %v4333_v9 = vsel %vm577_vm4, %v4201_v43, %v4211_v54  ;;  %v1617_v43 = vrot.slane %v4222_v60, %v3913_v29 }
  0xca   : > { %6043 = vst [vmem:[#allocation24_spill] sm:$0xff] %v4333_v9 }
  0xcb   : > { %v4310_v23 = vpop.permute.xlu0 %868  ;;  %534 = vrot.lane.b32.xlu1 %v520_v19, %s3804_s30  ;;  %v4313_v24 = vpop.permute.xlu1 %870  ;;  %v587_v19 = vmul.bf16 %v4098_v45, %v4323_v48 }
  0xcc   : > { %6041 = vst [vmem:[#allocation22_spill] sm:$0xff] %v4313_v24 }
  0xcd   : > { %1622 = vrot.lane.b32.xlu0 %v1605_v34, %s3800_s26 }
  0xcf   : > { %v4325_v50 = vpop.permute.xlu0 %944  ;;  %1624 = vrot.lane.b32.xlu1 %v1609_v30, %s3800_s26  ;;  %v4328_v2 = vpop.permute.xlu1 %946  ;;  %v588_v30 = vmul.bf16 %v4104_v49, %v4333_v9 }
  0xd1   : > { %1626 = vrot.lane.b32.xlu0 %v1613_v44, %s3800_s26  ;;  %v4352_v44 = vsel %vm577_vm4, %v4211_v54, %v4214_v56  ;;  %v4384_v56 = vsel %vm536_vm5, %v4224_v63, %v4227_v0 }
  0xd2   : > { %6044 = vst [vmem:[#allocation25_spill] sm:$0xff] %v4352_v44  ;;  %v589_v9 = vmul.bf16 %v4119_v55, %v4352_v44  ;;  %6045 = vst [vmem:[#allocation26_spill] sm:$0xff] %v4384_v56 }
  0xd3   : > { %v4338_v34 = vpop.permute.xlu0 %948  ;;  %598 = vrot.lane.b32.xlu1 %v587_v19, %s3803_s29  ;;  %v4341_v35 = vpop.permute.xlu1 %950 }
  0xd5   : > { %600 = vrot.lane.b32.xlu0 %v588_v30, %s3803_s29 }
  0xd7   : > { %v4354_v48 = vpop.permute.xlu0 %1014  ;;  %596 = vrot.lane.b32.xlu1 %v586_v36, %s3803_s29  ;;  %v4357_v19 = vpop.permute.xlu1 %1016  ;;  %v1677_v36 = vrot.slane %v4136_v1, %v3940_v38 }
  0xd9   : > { %1628 = vrot.lane.b32.xlu0 %v1617_v43, %s3800_s26 }
  0xdb   : > { %v4364_v30 = vpop.permute.xlu0 %1018  ;;  %602 = vrot.lane.b32.xlu1 %v589_v9, %s3803_s29  ;;  %v4367_v54 = vpop.permute.xlu1 %1020  ;;  %v1681_v9 = vrot.slane %v4145_v7, %v3940_v38 }
  0xdd   : > { %604 = vrot.lane.b32.xlu0 %v590_v42, %s3803_s29  ;;  %v4390_v42 = vsel %vm536_vm5, %v4227_v0, %v4238_v12 }
  0xde   : > { %6046 = vst [vmem:[#allocation27_spill] sm:$0xff] %v4390_v42  ;;  %v656_v33 = vmul.bf16 %v4104_v49, %v4390_v42  ;;  %v658_v42 = vmul.bf16 %v4129_v61, %v4241_v13 }
  0xdf   : > { %v4374_v44 = vpop.permute.xlu0 %1084  ;;  %1690 = vrot.lane.b32.xlu1 %v1673_v20, %s3801_s27  ;;  %v4377_v43 = vpop.permute.xlu1 %1086  ;;  %v655_v20 = vmul.bf16 %v4098_v45, %v4384_v56  ;;  %v1685_v56 = vrot.slane %v4165_v22, %v3940_v38 }
  0xe1   : > { %1692 = vrot.lane.b32.xlu0 %v1677_v36, %s3801_s27  ;;  %v654_v36 = vmul.bf16 0, %v4224_v63 }
  0xe3   : > { %v4394_v4 = vpop.permute.xlu0 %1088  ;;  %1694 = vrot.lane.b32.xlu1 %v1681_v9, %s3801_s27  ;;  %v4397_v58 = vpop.permute.xlu1 %1090  ;;  %v4413_v9 = vsel %vm536_vm5, %v4238_v12, %v4241_v13  ;;  %v1741_v12 = vrot.slane %v4180_v32, %v3940_v38  ;;  %v1749_v13 = vrot.slane %v4196_v41, %v3940_v38 }
  0xe4   : > { %6047 = vst [vmem:[#allocation28_spill] sm:$0xff] %v4413_v9 }
  0xe5   : > { %666 = vrot.lane.b32.xlu0 %v655_v20, %s3802_s28  ;;  %v657_v20 = vmul.bf16 %v4119_v55, %v4413_v9 }
  0xe7   : > { %v4403_v3 = vpop.permute.xlu0 %1154  ;;  %668 = vrot.lane.b32.xlu1 %v656_v33, %s3802_s28  ;;  %v4406_v0 = vpop.permute.xlu1 %1156 }
  0xe9   : > { %664 = vrot.lane.b32.xlu0 %v654_v36, %s3802_s28 }
  0xeb   : > { %v4418_v63 = vpop.permute.xlu0 %1158  ;;  %1696 = vrot.lane.b32.xlu1 %v1685_v56, %s3801_s27  ;;  %v4421_v33 = vpop.permute.xlu1 %1160  ;;  %v1745_v56 = vrot.slane %v4189_v37, %v3940_v38 }
  0xec   : > { %6048 = vst [vmem:[#allocation29_spill] sm:$0xff] %v4421_v33 }
  0xed   : > { %670 = vrot.lane.b32.xlu0 %v657_v20, %s3802_s28  ;;  %v4441_v20 = vsel %vm466_vm6, %v4246_v14, %v4249_v21  ;;  %v1753_v21 = vrot.slane %v4222_v60, %v3940_v38 }
  0xee   : > { %6049 = vst [vmem:[#allocation30_spill] sm:$0xff] %v4441_v20 }
  0xef   : > { %v4428_v8 = vpop.permute.xlu0 %1248  ;;  %672 = vrot.lane.b32.xlu1 %v658_v42, %s3802_s28  ;;  %v4431_v36 = vpop.permute.xlu1 %1250 }
  0xf1   : > { %1758 = vrot.lane.b32.xlu0 %v1741_v12, %s3802_s28  ;;  %v723_v12 = vmul.bf16 %v4098_v45, %v4441_v20 }
  0xf3   : > { %v4443_v9 = vpop.permute.xlu0 %1252  ;;  %1760 = vrot.lane.b32.xlu1 %v1745_v56, %s3802_s28  ;;  %v4446_v42 = vpop.permute.xlu1 %1254 }
  0xf5   : > { %1762 = vrot.lane.b32.xlu0 %v1749_v13, %s3802_s28  ;;  %v4470_v13 = vsel %vm466_vm6, %v4258_v25, %v4261_v28  ;;  %v1809_v25 = vrot.slane %v4131_v62, %v3967_v47 }
  0xf6   : > { %6051 = vst [vmem:[#allocation32_spill] sm:$0xff] %v4470_v13 }
  0xf7   : > { %v4458_v46 = vpop.permute.xlu0 %1316  ;;  %734 = vrot.lane.b32.xlu1 %v723_v12, %s3801_s27  ;;  %v4461_v56 = vpop.permute.xlu1 %1318  ;;  %v725_v12 = vmul.bf16 %v4119_v55, %v4470_v13 }
  0xf9   : > { %736 = vrot.lane.b32.xlu0 %v724_v53, %s3801_s27  ;;  %v726_v53 = vmul.bf16 %v4129_v61, %v4261_v28 }
  0xfb   : > { %v4472_v20 = vpop.permute.xlu0 %1320  ;;  %732 = vrot.lane.b32.xlu1 %v722_v31, %s3801_s27 }
  0xfc   : > { %v4475_v18 = vpop.permute.xlu1 %304 }
  0xfd   : > { %6052 = vst [vmem:[#allocation33_spill] sm:$0xff] %v4475_v18  ;;  %1764 = vrot.lane.b32.xlu0 %v1753_v21, %s3802_s28  ;;  %v1817_v21 = vrot.slane %v4145_v7, %v3967_v47 }
  0xff   : > { %v4482_v14 = vpop.permute.xlu0 %1322  ;;  %738 = vrot.lane.b32.xlu1 %v725_v12, %s3801_s27  ;;  %v4496_v12 = vsel %vm396_vm7, %v4274_v39, %v4277_v40 }
 0x100   : > { %6053 = vst [vmem:[#allocation34_spill] sm:$0xff] %v4496_v12  ;;  %v791_v7 = vmul.bf16 %v4098_v45, %v4496_v12 }
 0x101   : > { %740 = vrot.lane.b32.xlu0 %v726_v53, %s3801_s27  ;;  %v307_v31 = vpop.permute.xlu1 %306 }
 0x102   : > { %v315_v1 = vsel %vm314_vm8, %v4475_v18, %v307_v31  ;;  %v206_v18 = vld [vmem:[%s5912_s1 + $0x38] sm:$0x33] }
 0x103   : > { %v309_v13 = vpop.permute.xlu0 %308  ;;  %1826 = vrot.lane.b32.xlu1 %v1809_v25, %s3803_s29  ;;  %v4505_v25 = vsel %vm396_vm7, %v4277_v40, %v4285_v59 }
 0x104   : > { %v316_v62 = vsel %vm314_vm8, %v307_v31, %v309_v13  ;;  %6054 = vst [vmem:[#allocation35_spill] sm:$0xff] %v4505_v25 }
 0x105   : > { %1828 = vrot.lane.b32.xlu0 %v1813_v57, %s3803_s29  ;;  %2311 = vmatprep.subr.bf16.mxu0 %v316_v62  ;;  %v311_v53 = vpop.permute.xlu1 %310  ;;  %v792_v57 = vmul.bf16 %v4104_v49, %v4505_v25  ;;  %v790_v62 = vmul.bf16 0, %v4274_v39 }
 0x106   : > { %2312 = vmatpush1.bf16.msra.mxu0 %v315_v1  ;;  %v317_v40 = vsel %vm314_vm8, %v309_v13, %v311_v53 }
 0x107   : > { %v313_v28 = vpop.permute.xlu0 %312  ;;  %1830 = vrot.lane.b32.xlu1 %v1817_v21, %s3803_s29  ;;  %v4526_v21 = vsel %vm396_vm7, %v4285_v59, %v4288_v27  ;;  %v1877_v59 = vrot.slane %v4180_v32, %v3967_v47  ;;  %v1885_v32 = vrot.slane %v4196_v41, %v3967_v47 }
 0x108   : > { %v318_v17 = vsel %vm314_vm8, %v311_v53, %v313_v28  ;;  %v1821_v28 = vrot.slane %v4165_v22, %v3967_v47  ;;  %6056 = vst [vmem:[#allocation37_spill] sm:$0xff] %v4526_v21  ;;  %v793_v13 = vmul.bf16 %v4119_v55, %v4526_v21  ;;  %v794_v53 = vmul.bf16 %v4129_v61, %v4288_v27 }
 0x109   : > { %802 = vrot.lane.b32.xlu0 %v791_v7, %s3800_s26  ;;  %2397 = vmatprep.subr.bf16.mxu1 %v318_v17  ;;  %v4514_v31 = vpop.permute.xlu1 %1406 }
 0x10a   : > { %6055 = vst [vmem:[#allocation36_spill] sm:$0xff] %v4514_v31  ;;  %2398 = vmatpush1.bf16.msra.mxu1 %v317_v40  ;;  %v1881_v40 = vrot.slane %v4189_v37, %v3967_v47  ;;  %v4561_v37 = vsel %vm314_vm8, %v4301_v26, %v4310_v23 }
 0x10b   : > { %v4518_v1 = vpop.permute.xlu0 %1408  ;;  %804 = vrot.lane.b32.xlu1 %v792_v57, %s3800_s26  ;;  %6059 = vst [vmem:[#allocation40_spill] sm:$0xff] %v4561_v37 }
 0x10d   : > { %800 = vrot.lane.b32.xlu0 %v790_v62, %s3800_s26  ;;  %v4529_v17 = vpop.permute.xlu1 %1410 }
 0x10f   : > { %v389_v39 = vpop.permute.xlu0 %388  ;;  %1832 = vrot.lane.b32.xlu1 %v1821_v28, %s3803_s29 }
 0x111   : > { %806 = vrot.lane.b32.xlu0 %v793_v13, %s3800_s26  ;;  %v391_v22 = vpop.permute.xlu1 %390  ;;  %v4555_v13 = vsel %vm314_vm8, %v4298_v5, %v4301_v26 }
 0x112   : > { %v398_v7 = vsel %vm396_vm7, %v389_v39, %v391_v22  ;;  %6058 = vst [vmem:[#allocation39_spill] sm:$0xff] %v4555_v13  ;;  %v881_v41 = vmul.bf16 %v4098_v45, %v4555_v13  ;;  %v3691_v13 = vcombine.high %v206_v18, %v206_v18 }
 0x113   : > { %v4540_v57 = vpop.permute.xlu0 %386  ;;  %808 = vrot.lane.b32.xlu1 %v794_v53, %s3800_s26  ;;  %2313 = vmatprep.subr.bf16.mxu0 %v398_v7 }
 0x114   : > { %6057 = vst [vmem:[#allocation38_spill] sm:$0xff] %v4540_v57  ;;  %v397_v62 = vsel %vm396_vm7, %v4540_v57, %v389_v39  ;;  %v205_v39 = vld [vmem:[%s5912_s1 + $0x30] sm:$0x33] }
 0x115   : > { %1894 = vrot.lane.b32.xlu0 %v1877_v59, %s3804_s30  ;;  %2314 = vmatpush1.bf16.msra.mxu0 %v397_v62  ;;  %v4548_v28 = vpop.permute.xlu1 %1412  ;;  %v3688_v57 = vcombine.low %v205_v39, %v205_v39  ;;  %v3689_v27 = vcombine.high %v205_v39, %v205_v39 }
 0x117   : > { %v393_v53 = vpop.permute.xlu0 %392  ;;  %1896 = vrot.lane.b32.xlu1 %v1881_v40, %s3804_s30  ;;  %v882_v40 = vmul.bf16 %v4104_v49, %v4561_v37  ;;  %v1889_v37 = vrot.slane %v4222_v60, %v3967_v47  ;;  %v4598_v47 = vpack.i.b16 %v3689_v27, %v3689_v27  ;;  %v884_v60 = vmul.bf16 %v4129_v61, %v4313_v24 }
 0x118   : > { %v399_v26 = vsel %vm396_vm7, %v391_v22, %v393_v53  ;;  %v4588_v22 = vsel %vm314_vm8, %v4310_v23, %v4313_v24  ;;  %v2032_v12 = vshrl.u32 %v3688_v57, 16 }
 0x119   : > { %1898 = vrot.lane.b32.xlu0 %v1885_v32, %s3804_s30  ;;  %v395_v59 = vpop.permute.xlu1 %394  ;;  %v880_v32 = vmul.bf16 0, %v4298_v5  ;;  %6061 = vst [vmem:[#allocation42_spill] sm:$0xff] %v4588_v22  ;;  %v3690_v5 = vcombine.low %v206_v18, %v206_v18  ;;  %v4634_v18 = vpack.i.b16 %v3691_v13, %v3691_v13 }
 0x11a   : > { %v400_v7 = vsel %vm396_vm7, %v393_v53, %v395_v59 }
 0x11b   : > { %v4572_v62 = vpop.permute.xlu0 %1486  ;;  %892 = vrot.lane.b32.xlu1 %v881_v41, %s3799_s21  ;;  %2399 = vmatprep.subr.bf16.mxu1 %v400_v7  ;;  %v4593_v41 = vpack.i.b16 %v3688_v57, %v3688_v57  ;;  %v883_v7 = vmul.bf16 %v4119_v55, %v4588_v22  ;;  %v1965_v22 = vrot.slane %v4598_v47, %v3864_v11 }
 0x11c   : > { %6060 = vst [vmem:[#allocation41_spill] sm:$0xff] %v4572_v62  ;;  %2400 = vmatpush1.bf16.msra.mxu1 %v399_v26  ;;  %v4605_v26 = vpack.i.b16 %v3690_v5, %v3690_v5  ;;  %v2033_v57 = vpack.i.b16 %v2032_v12, %v2032_v12 }
 0x11d   : > { %894 = vrot.lane.b32.xlu0 %v882_v40, %s3799_s21  ;;  %v4581_v59 = vpop.permute.xlu1 %1488  ;;  %v1958_v39 = vrot.slane %v4593_v41, %v3864_v11 }
 0x11e   : > { %v1972_v25 = vrot.slane %v4605_v26, %v3864_v11 }
 0x11f   : > { %v4590_v53 = vpop.permute.xlu0 %1490  ;;  %890 = vrot.lane.b32.xlu1 %v880_v32, %s3799_s21 }
 0x121   : > { %1900 = vrot.lane.b32.xlu0 %v1889_v37, %s3804_s30  ;;  %v459_v40 = vpop.permute.xlu1 %458 }
 0x123   : > { %v461_v23 = vpop.permute.xlu0 %460  ;;  %896 = vrot.lane.b32.xlu1 %v883_v7, %s3799_s21 }
 0x124   : > { %v468_v32 = vsel %vm466_vm6, %v459_v40, %v461_v23 }
 0x125   : > { %898 = vrot.lane.b32.xlu0 %v884_v60, %s3799_s21  ;;  %2315 = vmatprep.subr.bf16.mxu0 %v468_v32  ;;  %v4609_v37 = vpop.permute.xlu1 %456  ;;  %v4623_v60 = vsel %vm5962_vm9, %v4325_v50, %v4328_v2 }
 0x126   : > { %6062 = vst [vmem:[#allocation43_spill] sm:$0xff] %v4609_v37  ;;  %v467_v24 = vsel %vm466_vm6, %v4609_v37, %v459_v40  ;;  %6063 = vst [vmem:[#allocation44_spill] sm:$0xff] %v4623_v60  ;;  %v4629_v40 = vsel %vm5962_vm9, %v4328_v2, %v4338_v34 }
 0x127   : > { %v4615_v7 = vpop.permute.xlu0 %1492  ;;  %1984 = vrot.lane.b32.xlu1 %v1958_v39, %s3805_s5  ;;  %2316 = vmatpush1.bf16.msra.mxu0 %v467_v24  ;;  %6064 = vst [vmem:[#allocation45_spill] sm:$0xff] %v4629_v40  ;;  %v962_v24 = vmul.bf16 %v4098_v45, %v4623_v60  ;;  %v963_v21 = vmul.bf16 %v4104_v49, %v4629_v40  ;;  %v961_v60 = vmul.bf16 0, %v4325_v50 }
 0x129   : > { %1986 = vrot.lane.b32.xlu0 %v1965_v22, %s3805_s5  ;;  %v463_v32 = vpop.permute.xlu1 %462 }
 0x12a   : > { %v469_v2 = vsel %vm466_vm6, %v461_v23, %v463_v32 }
 0x12b   : > { %v465_v39 = vpop.permute.xlu0 %464  ;;  %1988 = vrot.lane.b32.xlu1 %v1972_v25, %s3805_s5  ;;  %v1979_v25 = vrot.slane %v4634_v18, %v3864_v11 }
 0x12c   : > { %v470_v37 = vsel %vm466_vm6, %v463_v32, %v465_v39  ;;  %v2039_v39 = vshrl.u32 %v3689_v27, 16  ;;  %v2046_v32 = vshrl.u32 %v3690_v5, 16  ;;  %v965_v27 = vmul.bf16 %v4129_v61, %v4341_v35 }
 0x12d   : > { %973 = vrot.lane.b32.xlu0 %v962_v24, %s3815_s8  ;;  %2401 = vmatprep.subr.bf16.mxu1 %v470_v37  ;;  %v4640_v22 = vpop.permute.xlu1 %1554  ;;  %v4652_v37 = vsel %vm5962_vm9, %v4338_v34, %v4341_v35  ;;  %vm981_vm9 = vcmask 72704  }
 0x12e   : > { %2402 = vmatpush1.bf16.msra.mxu1 %v469_v2  ;;  %v964_v50 = vmul.bf16 %v4119_v55, %v4652_v37  ;;  %v2038_v2 = vrot.slane %v2033_v57, %v3864_v11 }
 0x12f   : > { %v4644_v51 = vpop.permute.xlu0 %1556  ;;  %975 = vrot.lane.b32.xlu1 %v963_v21, %s3815_s8  ;;  %v2040_v21 = vpack.i.b16 %v2039_v39, %v2039_v39 }
 0x131   : > { %971 = vrot.lane.b32.xlu0 %v961_v60, %s3815_s8  ;;  %v4655_v23 = vpop.permute.xlu1 %1558  ;;  %v2047_v60 = vpack.i.b16 %v2046_v32, %v2046_v32  ;;  %v2045_v5 = vrot.slane %v2040_v21, %v3864_v11  ;;  %v2053_v32 = vshrl.u32 %v3691_v13, 16 }
 0x133   : > { %v529_v24 = vpop.permute.xlu0 %528  ;;  %1990 = vrot.lane.b32.xlu1 %v1979_v25, %s3805_s5  ;;  %v2052_v57 = vrot.slane %v2047_v60, %v3864_v11  ;;  %v2054_v13 = vpack.i.b16 %v2053_v32, %v2053_v32 }
 0x135   : > { %977 = vrot.lane.b32.xlu0 %v964_v50, %s3815_s8  ;;  %v531_v34 = vpop.permute.xlu1 %530  ;;  %v4678_v50 = vsel %vm1022_vm10, %v4354_v48, %v4357_v19  ;;  %v2059_v32 = vrot.slane %v2054_v13, %v3864_v11  ;;  %v2115_v11 = vrot.slane %v4593_v41, %v3913_v29  ;;  %v2123_v41 = vrot.slane %v4605_v26, %v3913_v29 }
 0x136   : > { %v538_v40 = vsel %vm536_vm5, %v529_v24, %v531_v34 }
 0x137   : > { %v4665_v12 = vpop.permute.xlu0 %526  ;;  %979 = vrot.lane.b32.xlu1 %v965_v27, %s3815_s8  ;;  %2317 = vmatprep.subr.bf16.mxu0 %v538_v40  ;;  %v4684_v40 = vsel %vm1022_vm10, %v4357_v19, %v4364_v30 }
 0x138   : > { %6065 = vst [vmem:[#allocation46_spill] sm:$0xff] %v4665_v12  ;;  %v537_v25 = vsel %vm536_vm5, %v4665_v12, %v529_v24  ;;  %v1032_v24 = vmul.bf16 %v4098_v45, %v4678_v50  ;;  %v1033_v60 = vmul.bf16 %v4104_v49, %v4684_v40 }
 0x139   : > { %2064 = vrot.lane.b32.xlu0 %v2038_v2, %s3806_s10  ;;  %2318 = vmatpush1.bf16.msra.mxu0 %v537_v25  ;;  %v4672_v39 = vpop.permute.xlu1 %1560 }
 0x13b   : > { %v533_v27 = vpop.permute.xlu0 %532  ;;  %2066 = vrot.lane.b32.xlu1 %v2045_v5, %s3806_s10  ;;  %v1031_v5 = vmul.bf16 0, %v4354_v48 }
 0x13c   : > { %v539_v19 = vsel %vm536_vm5, %v531_v34, %v533_v27 }
 0x13d   : > { %2068 = vrot.lane.b32.xlu0 %v2052_v57, %s3806_s10  ;;  %v535_v21 = vpop.permute.xlu1 %534 }
 0x13e   : > { %v540_v2 = vsel %vm536_vm5, %v533_v27, %v535_v21  ;;  %v4704_v21 = vsel %vm1022_vm10, %v4364_v30, %v4367_v54  ;;  %v1035_v27 = vmul.bf16 %v4129_v61, %v4367_v54 }
 0x13f   : > { %v4692_v25 = vpop.permute.xlu0 %1622  ;;  %1043 = vrot.lane.b32.xlu1 %v1032_v24, %s3814_s7  ;;  %2403 = vmatprep.subr.bf16.mxu1 %v540_v2  ;;  %v1034_v34 = vmul.bf16 %v4119_v55, %v4704_v21  ;;  %v2119_v2 = vrot.slane %v4598_v47, %v3913_v29  ;;  %v4739_v47 = vsel %vm5993_vm11, %v4377_v43, %v4394_v4 }
 0x140   : > { %2404 = vmatpush1.bf16.msra.mxu1 %v539_v19 }
 0x141   : > { %1045 = vrot.lane.b32.xlu0 %v1033_v60, %s3814_s7  ;;  %v4698_v57 = vpop.permute.xlu1 %1624 }
 0x143   : > { %v4706_v12 = vpop.permute.xlu0 %1626  ;;  %1041 = vrot.lane.b32.xlu1 %v1031_v5, %s3814_s7  ;;  %v4733_v5 = vsel %vm5993_vm11, %v4374_v44, %v4377_v43  ;;  %v1101_v43 = vmul.bf16 0, %v4374_v44 }
 0x145   : > { %2070 = vrot.lane.b32.xlu0 %v2059_v32, %s3806_s10  ;;  %v599_v48 = vpop.permute.xlu1 %598 }
 0x147   : > { %v601_v24 = vpop.permute.xlu0 %600  ;;  %1047 = vrot.lane.b32.xlu1 %v1034_v34, %s3814_s7  ;;  %v1102_v34 = vmul.bf16 %v4098_v45, %v4733_v5 }
 0x148   : > { %v607_v30 = vsel %vm577_vm4, %v599_v48, %v601_v24 }
 0x149   : > { %1049 = vrot.lane.b32.xlu0 %v1035_v27, %s3814_s7  ;;  %2319 = vmatprep.subr.bf16.mxu0 %v607_v30  ;;  %v4719_v13 = vpop.permute.xlu1 %596  ;;  %v1103_v27 = vmul.bf16 %v4104_v49, %v4739_v47 }
 0x14a   : > { %6066 = vst [vmem:[#allocation47_spill] sm:$0xff] %v4719_v13  ;;  %v606_v60 = vsel %vm577_vm4, %v4719_v13, %v599_v48 }
 0x14b   : > { %v4725_v19 = vpop.permute.xlu0 %1628  ;;  %2132 = vrot.lane.b32.xlu1 %v2115_v11, %s3807_s11  ;;  %2320 = vmatpush1.bf16.msra.mxu0 %v606_v60  ;;  %v2127_v60 = vrot.slane %v4634_v18, %v3913_v29  ;;  %v4771_v29 = vsel %vm5992_vm12, %v4403_v3, %v4406_v0 }
 0x14d   : > { %2134 = vrot.lane.b32.xlu0 %v2119_v2, %s3807_s11  ;;  %v603_v32 = vpop.permute.xlu1 %602 }
 0x14e   : > { %v608_v30 = vsel %vm577_vm4, %v601_v24, %v603_v32 }
 0x14f   : > { %v605_v48 = vpop.permute.xlu0 %604  ;;  %2136 = vrot.lane.b32.xlu1 %v2123_v41, %s3807_s11  ;;  %v4760_v41 = vsel %vm5993_vm11, %v4394_v4, %v4397_v58  ;;  %v1105_v4 = vmul.bf16 %v4129_v61, %v4397_v58 }
 0x150   : > { %v609_v26 = vsel %vm577_vm4, %v603_v32, %v605_v48  ;;  %v1104_v44 = vmul.bf16 %v4119_v55, %v4760_v41  ;;  %v4779_v32 = vsel %vm5992_vm12, %v4406_v0, %v4418_v63 }
 0x151   : > { %1113 = vrot.lane.b32.xlu0 %v1102_v34, %s3813_s19  ;;  %2405 = vmatprep.subr.bf16.mxu1 %v609_v26  ;;  %v4748_v11 = vpop.permute.xlu1 %1690  ;;  %v1172_v26 = vmul.bf16 %v4098_v45, %v4771_v29 }
 0x152   : > { %2406 = vmatpush1.bf16.msra.mxu1 %v608_v30 }
 0x153   : > { %v4752_v2 = vpop.permute.xlu0 %1692  ;;  %1115 = vrot.lane.b32.xlu1 %v1103_v27, %s3813_s19 }
 0x155   : > { %1111 = vrot.lane.b32.xlu0 %v1101_v43, %s3813_s19  ;;  %v4763_v34 = vpop.permute.xlu1 %1694  ;;  %v1173_v43 = vmul.bf16 %v4104_v49, %v4779_v32 }
 0x157   : > { %v667_v24 = vpop.permute.xlu0 %666  ;;  %2138 = vrot.lane.b32.xlu1 %v2127_v60, %s3807_s11  ;;  %v4797_v60 = vsel %vm5992_vm12, %v4418_v63, %v4421_v33 }
 0x159   : > { %1117 = vrot.lane.b32.xlu0 %v1104_v44, %s3813_s19  ;;  %v669_v18 = vpop.permute.xlu1 %668  ;;  %v1171_v44 = vmul.bf16 0, %v4403_v3  ;;  %v1175_v3 = vmul.bf16 %v4129_v61, %v4421_v33 }
 0x15a   : > { %v675_v48 = vsel %vm507_vm3, %v667_v24, %v669_v18 }
 0x15b   : > { %v4784_v27 = vpop.permute.xlu0 %664  ;;  %1119 = vrot.lane.b32.xlu1 %v1105_v4, %s3813_s19  ;;  %2321 = vmatprep.subr.bf16.mxu0 %v675_v48 }
 0x15c   : > { %6067 = vst [vmem:[#allocation48_spill] sm:$0xff] %v4784_v27  ;;  %v674_v30 = vsel %vm507_vm3, %v4784_v27, %v667_v24  ;;  %v1174_v24 = vmul.bf16 %v4119_v55, %v4797_v60 }
 0x15d   : > { %1183 = vrot.lane.b32.xlu0 %v1172_v26, %s3812_s18  ;;  %2322 = vmatpush1.bf16.msra.mxu0 %v674_v30  ;;  %v4792_v0 = vpop.permute.xlu1 %1696  ;;  %v4807_v26 = vsel %vm5994_vm13, %v4428_v8, %v4431_v36 }
 0x15e   : > { %v1265_v27 = vmul.bf16 %v4104_v49, %v4807_v26 }
 0x15f   : > { %v671_v4 = vpop.permute.xlu0 %670  ;;  %1185 = vrot.lane.b32.xlu1 %v1173_v43, %s3812_s18 }
 0x160   : > { %v676_v43 = vsel %vm507_vm3, %v669_v18, %v671_v4  ;;  %v1264_v18 = vmul.bf16 %v4098_v45, %v4428_v8 }
 0x161   : > { %1181 = vrot.lane.b32.xlu0 %v1171_v44, %s3812_s18  ;;  %v673_v48 = vpop.permute.xlu1 %672  ;;  %v4819_v44 = vsel %vm5994_vm13, %v4431_v36, %v4443_v9  ;;  %v4834_v36 = vsel %vm5994_vm13, %v4443_v9, %v4446_v42 }
 0x162   : > { %v677_v63 = vsel %vm507_vm3, %v671_v4, %v673_v48  ;;  %6068 = vst [vmem:[#allocation49_spill] sm:$0xff] %v4819_v44  ;;  %v1266_v13 = vmul.bf16 %v4119_v55, %v4819_v44  ;;  %6069 = vst [vmem:[#allocation50_spill] sm:$0xff] %v4834_v36 }
 0x163   : > { %v4812_v30 = vpop.permute.xlu0 %1758  ;;  %1187 = vrot.lane.b32.xlu1 %v1174_v24, %s3812_s18  ;;  %2407 = vmatprep.subr.bf16.mxu1 %v677_v63  ;;  %v1267_v63 = vmul.bf16 %v4129_v61, %v4834_v36  ;;  %v4855_v36 = vsel %vm5996_vm14, %v4461_v56, %v4472_v20 }
 0x164   : > { %2408 = vmatpush1.bf16.msra.mxu1 %v676_v43  ;;  %v1268_v43 = vmul.bf16 0, %v4446_v42  ;;  %v3773_v42 = vld [vmem:[%s5913_s2 + $0x4] ss:$16 sps:$4 sm:$0xff]  }
 0x165   : > { %1189 = vrot.lane.b32.xlu0 %v1175_v3, %s3812_s18  ;;  %v4824_v48 = vpop.permute.xlu1 %1760  ;;  %2343 = vmatprep.mubr.bf16.mxu0 %v3773_v42 }
 0x166   : > { %2429 = vmatprep.mubr.bf16.mxu1 %v3773_v42  ;;  %v1336_v42 = vmul.bf16 0, %v4482_v14 }
 0x167   : > { %v4828_v24 = vpop.permute.xlu0 %1762  ;;  %1276 = vrot.lane.b32.xlu1 %v1265_v27, %s3811_s17  ;;  %v4845_v27 = vsel %vm5996_vm14, %v4458_v46, %v4461_v56 }
 0x168   : > { %v1333_v44 = vmul.bf16 %v4104_v49, %v4845_v27  ;;  %v1332_v49 = vmul.bf16 %v4098_v45, %v4458_v46  ;;  %v4888_v45 = vsel %vm1051_vm15, %v4514_v31, %v4518_v1 }
 0x169   : > { %1278 = vrot.lane.b32.xlu0 %v1266_v13, %s3811_s17  ;;  %v735_v4 = vpop.permute.xlu1 %734 }
 0x16b   : > { %v737_v3 = vpop.permute.xlu0 %736  ;;  %1274 = vrot.lane.b32.xlu1 %v1264_v18, %s3811_s17 }
 0x16c   : > { %v743_v9 = vsel %vm437_vm2, %v735_v4, %v737_v3 }
 0x16d   : > { %1280 = vrot.lane.b32.xlu0 %v1267_v63, %s3811_s17  ;;  %2323 = vmatprep.subr.bf16.mxu0 %v743_v9  ;;  %v4850_v13 = vpop.permute.xlu1 %732  ;;  %v1334_v63 = vmul.bf16 %v4119_v55, %v4855_v36 }
 0x16e   : > { %6070 = vst [vmem:[#allocation51_spill] sm:$0xff] %v4850_v13  ;;  %v742_v18 = vsel %vm437_vm2, %v4850_v13, %v735_v4  ;;  %v4873_v4 = vsel %vm5996_vm14, %v4472_v20, %v4482_v14 }
 0x16f   : > { %v4861_v33 = vpop.permute.xlu0 %1764  ;;  %1282 = vrot.lane.b32.xlu1 %v1268_v43, %s3811_s17  ;;  %2324 = vmatpush1.bf16.msra.mxu0 %v742_v18  ;;  %6071 = vst [vmem:[#allocation52_spill] sm:$0xff] %v4873_v4 }
 0x171   : > { %1344 = vrot.lane.b32.xlu0 %v1333_v44, %s3810_s14  ;;  %v739_v56 = vpop.permute.xlu1 %738  ;;  %v1335_v44 = vmul.bf16 %v4129_v61, %v4873_v4  ;;  %v4897_v61 = vsel %vm1051_vm15, %v4518_v1, %v4529_v17  ;;  %v4913_v1 = vsel %vm1051_vm15, %v4529_v17, %v4548_v28  ;;  %v4933_v17 = vsel %vm981_vm9, %v4572_v62, %v4581_v59 }
 0x172   : > { %v744_v18 = vsel %vm437_vm2, %v737_v3, %v739_v56  ;;  %6073 = vst [vmem:[#allocation54_spill] sm:$0xff] %v4897_v61  ;;  %v1424_v14 = vmul.bf16 %v4119_v55, %v4897_v61  ;;  %6074 = vst [vmem:[#allocation55_spill] sm:$0xff] %v4913_v1  ;;  %v4923_v55 = vld [vmem:[%s3904_s25 + $0xc] ss:$16 sps:$4 sm:$0xff]   ;;  %v1426_v61 = vmul.bf16 0, %v4548_v28 }
 0x173   : > { %v741_v9 = vpop.permute.xlu0 %740  ;;  %1346 = vrot.lane.b32.xlu1 %v1334_v63, %s3810_s14 }
 0x174   : > { %v745_v43 = vsel %vm437_vm2, %v739_v56, %v741_v9 }
 0x175   : > { %1342 = vrot.lane.b32.xlu0 %v1332_v49, %s3810_s14  ;;  %2409 = vmatprep.subr.bf16.mxu1 %v745_v43  ;;  %v4882_v20 = vpop.permute.xlu1 %1826  ;;  %v4900_v49 = vld [vmem:[%s3904_s25 + $0x4] ss:$16 sps:$4 sm:$0xff]   ;;  %v4916_v43 = vld [vmem:[%s3904_s25] ss:$16 sps:$4 sm:$0xff]  }
 0x176   : > { %6072 = vst [vmem:[#allocation53_spill] sm:$0xff] %v4882_v20  ;;  %2410 = vmatpush1.bf16.msra.mxu1 %v744_v18  ;;  %v1423_v3 = vmul.bf16 %v4900_v49, %v4888_v45 }
 0x177   : > { %v4891_v63 = vpop.permute.xlu0 %1828  ;;  %1348 = vrot.lane.b32.xlu1 %v1335_v44, %s3810_s14  ;;  %v1422_v44 = vmul.bf16 %v4916_v43, %v4514_v31  ;;  %v4950_v31 = vld [vmem:[%s3904_s25 + $0x8] ss:$16 sps:$4 sm:$0xff]  }
 0x179   : > { %1350 = vrot.lane.b32.xlu0 %v1336_v42, %s3810_s14  ;;  %v4905_v56 = vpop.permute.xlu1 %1830 }
 0x17b   : > { %v803_v9 = vpop.permute.xlu0 %802  ;;  %1434 = vrot.lane.b32.xlu1 %v1423_v3, %s3809_s13  ;;  %v1425_v3 = vmul.bf16 %v4923_v55, %v4913_v1 }
 0x17d   : > { %1436 = vrot.lane.b32.xlu0 %v1424_v14, %s3809_s13  ;;  %v805_v18 = vpop.permute.xlu1 %804 }
 0x17e   : > { %v811_v42 = vsel %vm367_vm1, %v803_v9, %v805_v18 }
 0x17f   : > { %v4927_v13 = vpop.permute.xlu0 %800  ;;  %1432 = vrot.lane.b32.xlu1 %v1422_v44, %s3809_s13  ;;  %2325 = vmatprep.subr.bf16.mxu0 %v811_v42  ;;  %v4944_v44 = vsel %vm981_vm9, %v4581_v59, %v4590_v53  ;;  %v1503_v42 = vmul.bf16 %v4900_v49, %v4933_v17 }
 0x180   : > { %6075 = vst [vmem:[#allocation56_spill] sm:$0xff] %v4927_v13  ;;  %v810_v14 = vsel %vm367_vm1, %v4927_v13, %v803_v9  ;;  %6076 = vst [vmem:[#allocation57_spill] sm:$0xff] %v4944_v44  ;;  %v1504_v28 = vmul.bf16 %v4950_v31, %v4944_v44  ;;  %v1506_v44 = vmul.bf16 0, %v4615_v7 }
 0x181   : > { %1438 = vrot.lane.b32.xlu0 %v1425_v3, %s3809_s13  ;;  %2326 = vmatpush1.bf16.msra.mxu0 %v810_v14  ;;  %v4939_v4 = vpop.permute.xlu1 %1832  ;;  %v4958_v3 = vsel %vm981_vm9, %v4590_v53, %v4615_v7  ;;  %v1502_v14 = vmul.bf16 %v4916_v43, %v4572_v62  ;;  %v4995_v7 = vsel %vm285_vm0, %v4655_v23, %v4672_v39 }
 0x182   : > { %6078 = vst [vmem:[#allocation59_spill] sm:$0xff] %v4995_v7 }
 0x183   : > { %v807_v1 = vpop.permute.xlu0 %806  ;;  %1440 = vrot.lane.b32.xlu1 %v1426_v61, %s3809_s13 }
 0x184   : > { %v812_v61 = vsel %vm367_vm1, %v805_v18, %v807_v1 }
 0x185   : > { %1514 = vrot.lane.b32.xlu0 %v1503_v42, %s3808_s12  ;;  %v809_v9 = vpop.permute.xlu1 %808  ;;  %v1505_v42 = vmul.bf16 %v4923_v55, %v4958_v3 }
 0x186   : > { %v813_v59 = vsel %vm367_vm1, %v807_v1, %v809_v9  ;;  %v4975_v9 = vsel %vm285_vm0, %v4640_v22, %v4644_v51  ;;  %v4984_v1 = vsel %vm285_vm0, %v4644_v51, %v4655_v23  ;;  %v5013_v23 = vsel %vm367_vm1, %v4692_v25, %v4698_v57 }
 0x187   : > { %v4963_v13 = vpop.permute.xlu0 %1894  ;;  %1516 = vrot.lane.b32.xlu1 %v1504_v28, %s3808_s12  ;;  %2411 = vmatprep.subr.bf16.mxu1 %v813_v59  ;;  %6077 = vst [vmem:[#allocation58_spill] sm:$0xff] %v4984_v1  ;;  %v1571_v18 = vmul.bf16 %v4900_v49, %v4975_v9  ;;  %v1572_v59 = vmul.bf16 %v4950_v31, %v4984_v1 }
 0x188   : > { %2412 = vmatpush1.bf16.msra.mxu1 %v812_v61  ;;  %v1570_v61 = vmul.bf16 %v4916_v43, %v4640_v22 }
 0x189   : > { %1512 = vrot.lane.b32.xlu0 %v1502_v14, %s3808_s12  ;;  %v4970_v53 = vpop.permute.xlu1 %1896 }
 0x18b   : > { %v4978_v62 = vpop.permute.xlu0 %1898  ;;  %1518 = vrot.lane.b32.xlu1 %v1505_v42, %s3808_s12 }
 0x18d   : > { %1520 = vrot.lane.b32.xlu0 %v1506_v44, %s3808_s12  ;;  %v893_v28 = vpop.permute.xlu1 %892 }
 0x18f   : > { %v895_v14 = vpop.permute.xlu0 %894  ;;  %1582 = vrot.lane.b32.xlu1 %v1571_v18, %s3807_s11  ;;  %v1573_v18 = vmul.bf16 %v4923_v55, %v4995_v7 }
 0x190   : > { %v901_v51 = vsel %vm285_vm0, %v893_v28, %v895_v14 }
 0x191   : > { %1584 = vrot.lane.b32.xlu0 %v1572_v59, %s3807_s11  ;;  %2327 = vmatprep.subr.bf16.mxu0 %v901_v51  ;;  %v5001_v44 = vpop.permute.xlu1 %890  ;;  %v1574_v59 = vmul.bf16 0, %v4672_v39 }
 0x192   : > { %6079 = vst [vmem:[#allocation60_spill] sm:$0xff] %v5001_v44  ;;  %v900_v42 = vsel %vm285_vm0, %v5001_v44, %v893_v28  ;;  %v5020_v28 = vsel %vm367_vm1, %v4698_v57, %v4706_v12  ;;  %v1639_v44 = vmul.bf16 %v4900_v49, %v5013_v23  ;;  %v5035_v57 = vsel %vm367_vm1, %v4706_v12, %v4725_v19 }
 0x193   : > { %v5007_v1 = vpop.permute.xlu0 %1900  ;;  %1580 = vrot.lane.b32.xlu1 %v1570_v61, %s3807_s11  ;;  %2328 = vmatpush1.bf16.msra.mxu0 %v900_v42  ;;  %6080 = vst [vmem:[#allocation61_spill] sm:$0xff] %v5020_v28  ;;  %v1640_v7 = vmul.bf16 %v4950_v31, %v5020_v28  ;;  %6082 = vst [vmem:[#allocation63_spill] sm:$0xff] %v5035_v57  ;;  %v5050_v12 = vsel %vm437_vm2, %v4748_v11, %v4752_v2 }
 0x195   : > { %1586 = vrot.lane.b32.xlu0 %v1573_v18, %s3807_s11  ;;  %v897_v51 = vpop.permute.xlu1 %896 }
 0x196   : > { %v902_v18 = vsel %vm285_vm0, %v895_v14, %v897_v51  ;;  %v1642_v14 = vmul.bf16 0, %v4725_v19 }
 0x197   : > { %v899_v61 = vpop.permute.xlu0 %898  ;;  %1588 = vrot.lane.b32.xlu1 %v1574_v59, %s3807_s11  ;;  %v1638_v59 = vmul.bf16 %v4916_v43, %v4692_v25 }
 0x198   : > { %v903_v42 = vsel %vm285_vm0, %v897_v51, %v899_v61 }
 0x199   : > { %1650 = vrot.lane.b32.xlu0 %v1639_v44, %s3806_s10  ;;  %2413 = vmatprep.subr.bf16.mxu1 %v903_v42  ;;  %v5029_v39 = vpop.permute.xlu1 %1984  ;;  %v1641_v44 = vmul.bf16 %v4923_v55, %v5035_v57 }
 0x19a   : > { %6081 = vst [vmem:[#allocation62_spill] sm:$0xff] %v5029_v39  ;;  %2414 = vmatpush1.bf16.msra.mxu1 %v902_v18  ;;  %v1707_v18 = vmul.bf16 %v4900_v49, %v5050_v12 }
 0x19b   : > { %v5039_v61 = vpop.permute.xlu0 %1986  ;;  %1652 = vrot.lane.b32.xlu1 %v1640_v7, %s3806_s10  ;;  %v5057_v7 = vsel %vm437_vm2, %v4752_v2, %v4763_v34  ;;  %v5071_v2 = vsel %vm437_vm2, %v4763_v34, %v4792_v0  ;;  %v5086_v34 = vsel %vm507_vm3, %v4812_v30, %v4824_v48 }
 0x19c   : > { %6083 = vst [vmem:[#allocation64_spill] sm:$0xff] %v5057_v7  ;;  %v1708_v28 = vmul.bf16 %v4950_v31, %v5057_v7  ;;  %6085 = vst [vmem:[#allocation66_spill] sm:$0xff] %v5071_v2 }
 0x19d   : > { %1648 = vrot.lane.b32.xlu0 %v1638_v59, %s3806_s10  ;;  %v5045_v42 = vpop.permute.xlu1 %1988  ;;  %6086 = vst [vmem:[#allocation67_spill] sm:$0xff] %v5086_v34 }
 0x19f   : > { %v974_v51 = vpop.permute.xlu0 %973  ;;  %1654 = vrot.lane.b32.xlu1 %v1641_v44, %s3806_s10 }
 0x1a1   : > { %1656 = vrot.lane.b32.xlu0 %v1642_v14, %s3806_s10  ;;  %v976_v59 = vpop.permute.xlu1 %975  ;;  %v1706_v14 = vmul.bf16 %v4916_v43, %v4748_v11 }
 0x1a2   : > { %v983_v57 = vsel %vm981_vm9, %v974_v51, %v976_v59 }
 0x1a3   : > { %v5065_v19 = vpop.permute.xlu0 %971  ;;  %1718 = vrot.lane.b32.xlu1 %v1707_v18, %s3805_s5  ;;  %2329 = vmatprep.subr.bf16.mxu0 %v983_v57  ;;  %v1709_v18 = vmul.bf16 %v4923_v55, %v5071_v2 }
 0x1a4   : > { %6084 = vst [vmem:[#allocation65_spill] sm:$0xff] %v5065_v19  ;;  %v982_v44 = vsel %vm981_vm9, %v5065_v19, %v974_v51  ;;  %v1710_v51 = vmul.bf16 0, %v4792_v0 }
 0x1a5   : > { %1720 = vrot.lane.b32.xlu0 %v1708_v28, %s3805_s5  ;;  %2330 = vmatpush1.bf16.msra.mxu0 %v982_v44  ;;  %v5078_v7 = vpop.permute.xlu1 %1990  ;;  %v5093_v28 = vsel %vm507_vm3, %v4824_v48, %v4828_v24 }
 0x1a6   : > { %6087 = vst [vmem:[#allocation68_spill] sm:$0xff] %v5093_v28 }
 0x1a7   : > { %v978_v57 = vpop.permute.xlu0 %977  ;;  %1716 = vrot.lane.b32.xlu1 %v1706_v14, %s3805_s5  ;;  %v1775_v14 = vmul.bf16 %v4900_v49, %v5086_v34  ;;  %v1774_v34 = vmul.bf16 %v4916_v43, %v4812_v30 }
 0x1a8   : > { %v984_v0 = vsel %vm981_vm9, %v976_v59, %v978_v57 }
 0x1a9   : > { %1722 = vrot.lane.b32.xlu0 %v1709_v18, %s3805_s5  ;;  %v980_v19 = vpop.permute.xlu1 %979  ;;  %v1776_v18 = vmul.bf16 %v4950_v31, %v5093_v28 }
 0x1aa   : > { %v985_v44 = vsel %vm981_vm9, %v978_v57, %v980_v19  ;;  %v5110_v19 = vsel %vm507_vm3, %v4828_v24, %v4861_v33  ;;  %v1778_v24 = vmul.bf16 0, %v4861_v33 }
 0x1ab   : > { %v5098_v2 = vpop.permute.xlu0 %2064  ;;  %1724 = vrot.lane.b32.xlu1 %v1710_v51, %s3805_s5  ;;  %2415 = vmatprep.subr.bf16.mxu1 %v985_v44  ;;  %6089 = vst [vmem:[#allocation70_spill] sm:$0xff] %v5110_v19  ;;  %v1777_v59 = vmul.bf16 %v4923_v55, %v5110_v19  ;;  %v5123_v44 = vsel %vm577_vm4, %v4882_v20, %v4891_v63 }
 0x1ac   : > { %6088 = vst [vmem:[#allocation69_spill] sm:$0xff] %v5098_v2  ;;  %2416 = vmatpush1.bf16.msra.mxu1 %v984_v0  ;;  %v5130_v0 = vsel %vm577_vm4, %v4891_v63, %v4905_v56  ;;  %v5148_v63 = vsel %vm577_vm4, %v4905_v56, %v4939_v4 }
 0x1ad   : > { %1786 = vrot.lane.b32.xlu0 %v1775_v14, %s3804_s30  ;;  %v5105_v48 = vpop.permute.xlu1 %2066  ;;  %6090 = vst [vmem:[#allocation71_spill] sm:$0xff] %v5130_v0  ;;  %6092 = vst [vmem:[#allocation73_spill] sm:$0xff] %v5148_v63 }
 0x1af   : > { %v5114_v51 = vpop.permute.xlu0 %2068  ;;  %1788 = vrot.lane.b32.xlu1 %v1776_v18, %s3804_s30 }
 0x1b1   : > { %1784 = vrot.lane.b32.xlu0 %v1774_v34, %s3804_s30  ;;  %v1044_v57 = vpop.permute.xlu1 %1043  ;;  %v1843_v34 = vmul.bf16 %v4900_v49, %v5123_v44 }
 0x1b3   : > { %v1046_v14 = vpop.permute.xlu0 %1045  ;;  %1790 = vrot.lane.b32.xlu1 %v1777_v59, %s3804_s30  ;;  %v1844_v59 = vmul.bf16 %v4950_v31, %v5130_v0 }
 0x1b4   : > { %v1053_v18 = vsel %vm1051_vm15, %v1044_v57, %v1046_v14 }
 0x1b5   : > { %1792 = vrot.lane.b32.xlu0 %v1778_v24, %s3804_s30  ;;  %2331 = vmatprep.subr.bf16.mxu0 %v1053_v18  ;;  %v5136_v19 = vpop.permute.xlu1 %1041  ;;  %v1842_v24 = vmul.bf16 %v4916_v43, %v4882_v20 }
 0x1b6   : > { %6091 = vst [vmem:[#allocation72_spill] sm:$0xff] %v5136_v19  ;;  %v1052_v33 = vsel %vm1051_vm15, %v5136_v19, %v1044_v57  ;;  %v1845_v57 = vmul.bf16 %v4923_v55, %v5148_v63 }
 0x1b7   : > { %v5142_v28 = vpop.permute.xlu0 %2070  ;;  %1854 = vrot.lane.b32.xlu1 %v1843_v34, %s3803_s29  ;;  %2332 = vmatpush1.bf16.msra.mxu0 %v1052_v33  ;;  %v5159_v34 = vsel %vm536_vm5, %v4963_v13, %v4970_v53  ;;  %v1846_v33 = vmul.bf16 0, %v4939_v4 }
 0x1b8   : > { %v1911_v63 = vmul.bf16 %v4900_v49, %v5159_v34 }
 0x1b9   : > { %1856 = vrot.lane.b32.xlu0 %v1844_v59, %s3803_s29  ;;  %v1048_v18 = vpop.permute.xlu1 %1047 }
 0x1ba   : > { %v1054_v0 = vsel %vm1051_vm15, %v1046_v14, %v1048_v18  ;;  %v1910_v14 = vmul.bf16 %v4916_v43, %v4963_v13 }
 0x1bb   : > { %v1050_v19 = vpop.permute.xlu0 %1049  ;;  %1852 = vrot.lane.b32.xlu1 %v1842_v24, %s3803_s29  ;;  %v5170_v24 = vsel %vm536_vm5, %v4970_v53, %v4978_v62  ;;  %v5185_v53 = vsel %vm536_vm5, %v4978_v62, %v5007_v1 }
 0x1bc   : > { %v1055_v56 = vsel %vm1051_vm15, %v1048_v18, %v1050_v19  ;;  %v1912_v4 = vmul.bf16 %v4950_v31, %v5170_v24  ;;  %6094 = vst [vmem:[#allocation75_spill] sm:$0xff] %v5185_v53  ;;  %v1913_v18 = vmul.bf16 %v4923_v55, %v5185_v53 }
 0x1bd   : > { %1858 = vrot.lane.b32.xlu0 %v1845_v57, %s3803_s29  ;;  %2417 = vmatprep.subr.bf16.mxu1 %v1055_v56  ;;  %v5164_v59 = vpop.permute.xlu1 %2132  ;;  %v1914_v56 = vmul.bf16 0, %v5007_v1 }
 0x1be   : > { %6093 = vst [vmem:[#allocation74_spill] sm:$0xff] %v5164_v59  ;;  %2418 = vmatpush1.bf16.msra.mxu1 %v1054_v0 }
 0x1bf   : > { %v5174_v20 = vpop.permute.xlu0 %2134  ;;  %1860 = vrot.lane.b32.xlu1 %v1846_v33, %s3803_s29 }
 0x1c1   : > { %1922 = vrot.lane.b32.xlu0 %v1911_v63, %s3802_s28  ;;  %v5180_v19 = vpop.permute.xlu1 %2136  ;;  %v5196_v63 = vsel %vm466_vm6, %v5029_v39, %v5039_v61 }
 0x1c2   : > { %v2001_v53 = vmul.bf16 %v4900_v49, %v5196_v63 }
 0x1c3   : > { %v1114_v0 = vpop.permute.xlu0 %1113  ;;  %1924 = vrot.lane.b32.xlu1 %v1912_v4, %s3802_s28  ;;  %v5206_v4 = vsel %vm466_vm6, %v5039_v61, %v5045_v42  ;;  %v5221_v61 = vsel %vm466_vm6, %v5045_v42, %v5078_v7 }
 0x1c4   : > { %6096 = vst [vmem:[#allocation77_spill] sm:$0xff] %v5206_v4  ;;  %6097 = vst [vmem:[#allocation78_spill] sm:$0xff] %v5221_v61 }
 0x1c5   : > { %1920 = vrot.lane.b32.xlu0 %v1910_v14, %s3802_s28  ;;  %v1116_v57 = vpop.permute.xlu1 %1115 }
 0x1c6   : > { %v1123_v62 = vsel %vm5996_vm14, %v1114_v0, %v1116_v57 }
 0x1c7   : > { %v5200_v33 = vpop.permute.xlu0 %1111  ;;  %1926 = vrot.lane.b32.xlu1 %v1913_v18, %s3802_s28  ;;  %2333 = vmatprep.subr.bf16.mxu0 %v1123_v62  ;;  %v2002_v18 = vmul.bf16 %v4950_v31, %v5206_v4 }
 0x1c8   : > { %6095 = vst [vmem:[#allocation76_spill] sm:$0xff] %v5200_v33  ;;  %v1122_v14 = vsel %vm5996_vm14, %v5200_v33, %v1114_v0  ;;  %v2000_v0 = vmul.bf16 %v4916_v43, %v5029_v39  ;;  %v5229_v33 = vrot.slane %v4018_v10, %v3940_v38 }
 0x1c9   : > { %1928 = vrot.lane.b32.xlu0 %v1914_v56, %s3802_s28  ;;  %2334 = vmatpush1.bf16.msra.mxu0 %v1122_v14  ;;  %v5213_v1 = vpop.permute.xlu1 %2138 }
 0x1ca   : > { %6098 = vst [vmem:[#allocation79_spill] sm:$0xff] %v5229_v33 }
 0x1cb   : > { %v1118_v62 = vpop.permute.xlu0 %1117  ;;  %2012 = vrot.lane.b32.xlu1 %v2001_v53, %s3801_s27  ;;  %v2003_v53 = vmul.bf16 %v4923_v55, %v5221_v61  ;;  %v5245_v61 = vsel %vm396_vm7, %v5105_v48, %v5114_v51 }
 0x1cc   : > { %v1124_v42 = vsel %vm5996_vm14, %v1116_v57, %v1118_v62  ;;  %6100 = vst [vmem:[#allocation81_spill] sm:$0xff] %v5245_v61  ;;  %v1221_v57 = vmul.bf16 %v4900_v49, %v5229_v33  ;;  %v5271_v33 = vsel %vm396_vm7, %v5114_v51, %v5142_v28 }
 0x1cd   : > { %2014 = vrot.lane.b32.xlu0 %v2002_v18, %s3801_s27  ;;  %v1120_v56 = vpop.permute.xlu1 %1119  ;;  %v5238_v18 = vsel %vm396_vm7, %v5098_v2, %v5105_v48  ;;  %v5261_v48 = vrot.slane %v4028_v16, %v3940_v38  ;;  %6104 = vst [vmem:[#allocation85_spill] sm:$0xff] %v5271_v33 }
 0x1ce   : > { %v1125_v14 = vsel %vm5996_vm14, %v1118_v62, %v1120_v56  ;;  %6099 = vst [vmem:[#allocation80_spill] sm:$0xff] %v5238_v18  ;;  %v2004_v56 = vmul.bf16 0, %v5078_v7  ;;  %v5252_v62 = vrot.slane %v4011_v6, %v3940_v38  ;;  %v2081_v7 = vmul.bf16 %v4900_v49, %v5238_v18 }
 0x1cf   : > { %v1184_v4 = vpop.permute.xlu0 %1183  ;;  %2010 = vrot.lane.b32.xlu1 %v2000_v0, %s3801_s27  ;;  %2419 = vmatprep.subr.bf16.mxu1 %v1125_v14  ;;  %6103 = vst [vmem:[#allocation84_spill] sm:$0xff] %v5261_v48 }
 0x1d0   : > { %2420 = vmatpush1.bf16.msra.mxu1 %v1124_v42  ;;  %6101 = vst [vmem:[#allocation82_spill] sm:$0xff] %v5252_v62  ;;  %v2082_v42 = vmul.bf16 %v4950_v31, %v5245_v61  ;;  %v1220_v16 = vmul.bf16 %v4916_v43, %v5252_v62 }
 0x1d1   : > { %2016 = vrot.lane.b32.xlu0 %v2003_v53, %s3801_s27  ;;  %v1186_v10 = vpop.permute.xlu1 %1185 }
 0x1d2   : > { %v1193_v0 = vsel %vm5994_vm13, %v1184_v4, %v1186_v10 }
 0x1d3   : > { %v5256_v14 = vpop.permute.xlu0 %1181  ;;  %2018 = vrot.lane.b32.xlu1 %v2004_v56, %s3801_s27  ;;  %2335 = vmatprep.subr.bf16.mxu0 %v1193_v0  ;;  %v5277_v56 = vrot.slane %v4026_v15, %v3940_v38  ;;  %v5292_v15 = vsel %vm314_vm8, %v5164_v59, %v5174_v20 }
 0x1d4   : > { %6102 = vst [vmem:[#allocation83_spill] sm:$0xff] %v5256_v14  ;;  %v1192_v53 = vsel %vm5994_vm13, %v5256_v14, %v1184_v4  ;;  %v2080_v4 = vmul.bf16 %v4916_v43, %v5098_v2  ;;  %6106 = vst [vmem:[#allocation87_spill] sm:$0xff] %v5292_v15 }
 0x1d5   : > { %2092 = vrot.lane.b32.xlu0 %v2081_v7, %s3800_s26  ;;  %2336 = vmatpush1.bf16.msra.mxu0 %v1192_v53  ;;  %v1188_v6 = vpop.permute.xlu1 %1187  ;;  %6105 = vst [vmem:[#allocation86_spill] sm:$0xff] %v5277_v56  ;;  %v1223_v7 = vmul.bf16 %v4923_v55, %v5261_v48 }
 0x1d6   : > { %2337 = vmatprep.subr.bf16.mxu0 %v1221_v57  ;;  %v2083_v57 = vmul.bf16 %v4923_v55, %v5271_v33  ;;  %v1194_v38 = vsel %vm5994_vm13, %v1186_v10, %v1188_v6  ;;  %v5301_v10 = vsel %vm314_vm8, %v5174_v20, %v5180_v19  ;;  %v5314_v20 = vsel %vm314_vm8, %v5180_v19, %v5213_v1 }
 0x1d7   : > { %v1190_v0 = vpop.permute.xlu0 %1189  ;;  %2094 = vrot.lane.b32.xlu1 %v2082_v42, %s3800_s26  ;;  %v1222_v42 = vmul.bf16 %v4950_v31, %v5277_v56  ;;  %6107 = vst [vmem:[#allocation88_spill] sm:$0xff] %v5301_v10  ;;  %6108 = vst [vmem:[#allocation89_spill] sm:$0xff] %v5314_v20 }
 0x1d8   : > { %v1195_v51 = vsel %vm5994_vm13, %v1188_v6, %v1190_v0  ;;  %v2084_v0 = vmul.bf16 0, %v5142_v28 }
 0x1d9   : > { %2090 = vrot.lane.b32.xlu0 %v2080_v4, %s3800_s26  ;;  %2421 = vmatprep.subr.bf16.mxu1 %v1195_v51  ;;  %v1277_v53 = vpop.permute.xlu1 %1276  ;;  %v2149_v4 = vmul.bf16 %v4900_v49, %v5292_v15  ;;  %v2148_v49 = vmul.bf16 %v4916_v43, %v5164_v59 }
 0x1da   : > { %2422 = vmatpush1.bf16.msra.mxu1 %v1194_v38  ;;  %2338 = vmatpush1.bf16.msra.mxu0 %v1220_v16 }
 0x1db   : > { %v1279_v48 = vpop.permute.xlu0 %1278  ;;  %2096 = vrot.lane.b32.xlu1 %v2083_v57, %s3800_s26  ;;  %2423 = vmatprep.subr.bf16.mxu1 %v1223_v7  ;;  %v2150_v7 = vmul.bf16 %v4950_v31, %v5301_v10  ;;  %v2151_v31 = vmul.bf16 %v4923_v55, %v5314_v20 }
 0x1dc   : > { %v1285_v6 = vsel %vm5992_vm12, %v1277_v53, %v1279_v48 }
 0x1dd   : > { %2098 = vrot.lane.b32.xlu0 %v2084_v0, %s3800_s26  ;;  %2339 = vmatprep.subr.bf16.mxu0 %v1285_v6  ;;  %v1275_v16 = vpop.permute.xlu1 %1274 }
 0x1de   : > { %v1284_v28 = vsel %vm5992_vm12, %v1275_v16, %v1277_v53  ;;  %2424 = vmatpush1.bf16.msra.mxu1 %v1222_v42  ;;  %v2152_v42 = vmul.bf16 0, %v5213_v1  ;;  %v3774_v1 = vld [vmem:[%s5913_s2 + $0xc] ss:$16 sps:$4 sm:$0xff]  }
 0x1df   : > { %v1281_v51 = vpop.permute.xlu0 %1280  ;;  %2160 = vrot.lane.b32.xlu1 %v2149_v4, %s3799_s21  ;;  %2340 = vmatpush1.bf16.msra.mxu0 %v1284_v28  ;;  %v3771_v4 = vld [vmem:[%s5913_s2] ss:$16 sps:$4 sm:$0xff]  }
 0x1e0   : > { %v1286_v19 = vsel %vm5992_vm12, %v1279_v48, %v1281_v51 }
 0x1e1   : > { %2162 = vrot.lane.b32.xlu0 %v2150_v7, %s3799_s21  ;;  %v5319_v57 = vpop.permute.xlu1 %1282 }
 0x1e2   : > { %6109 = vst [vmem:[#allocation90_spill] sm:$0xff] %v5319_v57  ;;  %v1287_v53 = vsel %vm5992_vm12, %v1281_v51, %v5319_v57  ;;  %vm5995_vm12 = vcmask 392192  }
 0x1e3   : > { %v1345_v38 = vpop.permute.xlu0 %1344  ;;  %2158 = vrot.lane.b32.xlu1 %v2148_v49, %s3799_s21  ;;  %2425 = vmatprep.subr.bf16.mxu1 %v1287_v53 }
 0x1e4   : > { %2426 = vmatpush1.bf16.msra.mxu1 %v1286_v19 }
 0x1e5   : > { %2164 = vrot.lane.b32.xlu0 %v2151_v31, %s3799_s21  ;;  %v1347_v43 = vpop.permute.xlu1 %1346 }
 0x1e6   : > { %v1353_v0 = vsel %vm5993_vm11, %v1345_v38, %v1347_v43 }
 0x1e7   : > { %v1343_v6 = vpop.permute.xlu0 %1342  ;;  %2166 = vrot.lane.b32.xlu1 %v2152_v42, %s3799_s21  ;;  %2341 = vmatprep.subr.bf16.mxu0 %v1353_v0 }
 0x1e8   : > { %v1352_v55 = vsel %vm5993_vm11, %v1343_v6, %v1345_v38 }
 0x1e9   : > { %2342 = vmatpush1.bf16.msra.mxu0 %v1352_v55  ;;  %v1349_v48 = vpop.permute.xlu1 %1348 }
 0x1ea   : > { %v1354_v51 = vsel %vm5993_vm11, %v1347_v43, %v1349_v48 }
 0x1eb   : > { %v5338_v16 = vpop.permute.xlu0 %1350 }
 0x1ec   : > { %6110 = vst [vmem:[#allocation91_spill] sm:$0xff] %v5338_v16  ;;  %v1355_v28 = vsel %vm5993_vm11, %v1349_v48, %v5338_v16  ;;  %2344 = vmatmul.mubr.bf16.vlgmr.msra.gmra.mrb[0].mxu0 %v3771_v4  ;;  %vm6112_vm11 = vcmask 973824  }
 0x1ed   : > { %2427 = vmatprep.subr.bf16.mxu1 %v1355_v28  ;;  %v1435_v7 = vpop.permute.xlu1 %1434  ;;  %3696 = vmatprep.mubr.msk.bf16.mxu0 %vm5995_vm12, %v3774_v1  ;;  %vm6113_vm13 = vmmov %vm6112_vm11 }
 0x1ee   : > { %2428 = vmatpush1.bf16.msra.mxu1 %v1354_v51  ;;  %vm6116_vm14 = vmmov %vm6112_vm11 }
 0x1ef   : > { %v1437_v49 = vpop.permute.xlu0 %1436 }
 0x1f0   : > { %v1443_v53 = vsel %vm1022_vm10, %v1435_v7, %v1437_v49 }
 0x1f1   : > { %2354 = vmatprep.subr.bf16.mxu0 %v1443_v53  ;;  %v1433_v31 = vpop.permute.xlu1 %1432  ;;  %2430 = vmatmul.mubr.bf16.vlgmr.msra.gmra.mrb[0].mxu1 %v3771_v4 }
 0x1f2   : > { %v1442_v38 = vsel %vm1022_vm10, %v1433_v31, %v1435_v7  ;;  %3697 = vmatprep.mubr.msk.bf16.mxu1 %vm5995_vm12, %v3774_v1  ;;  %vm6115_vm12 = vmmov %vm6112_vm11 }
 0x1f3   : > { %v1439_v19 = vpop.permute.xlu0 %1438  ;;  %2355 = vmatpush1.bf16.msra.mxu0 %v1442_v38 }
 0x1f4   : > { %v1444_v6 = vsel %vm1022_vm10, %v1437_v49, %v1439_v19 }
 0x1f5   : > { %v5347_v42 = vpop.permute.xlu1 %1440 }
 0x1f6   : > { %6111 = vst [vmem:[#allocation92_spill] sm:$0xff] %v5347_v42  ;;  %v1445_v43 = vsel %vm1022_vm10, %v1439_v19, %v5347_v42 }
 0x1f7   : > { %v1515_v0 = vpop.permute.xlu0 %1514  ;;  %2440 = vmatprep.subr.bf16.mxu1 %v1445_v43 }
 0x1f8   : > { %2441 = vmatpush1.bf16.msra.mxu1 %v1444_v6 }
 0x1f9   : > { %v1517_v55 = vpop.permute.xlu1 %1516 }
 0x1fa   : > { %v1523_v48 = vsel %vm6112_vm11, %v1515_v0, %v1517_v55 }
 0x1fb   : > { %v1513_v4 = vpop.permute.xlu0 %1512  ;;  %2356 = vmatprep.subr.bf16.mxu0 %v1523_v48 }
 0x1fc   : > { %v1522_v28 = vsel %vm6113_vm13, %v1513_v4, %v1515_v0 }
 0x1fd   : > { %2357 = vmatpush1.bf16.msra.mxu0 %v1522_v28  ;;  %v1519_v1 = vpop.permute.xlu1 %1518 }
 0x1fe   : > { %v1524_v31 = vsel %vm6116_vm14, %v1517_v55, %v1519_v1  ;;  %vm6212_vm14 = vcmask 7168  }
 0x1ff   : > { %v5354_v7 = vpop.permute.xlu0 %1520 }
 0x200   : > { %6114 = vst [vmem:[#allocation93_spill] sm:$0xff] %v5354_v7  ;;  %v1525_v51 = vsel %vm6115_vm12, %v1519_v1, %v5354_v7 }
 0x201   : > { %2442 = vmatprep.subr.bf16.mxu1 %v1525_v51  ;;  %v1583_v53 = vpop.permute.xlu1 %1582 }
 0x202   : > { %2443 = vmatpush1.bf16.msra.mxu1 %v1524_v31 }
 0x203   : > { %v1585_v49 = vpop.permute.xlu0 %1584 }
 0x204   : > { %v1591_v38 = vsel %vm314_vm8, %v1583_v53, %v1585_v49 }
 0x205   : > { %2358 = vmatprep.subr.bf16.mxu0 %v1591_v38  ;;  %v1581_v19 = vpop.permute.xlu1 %1580 }
 0x206   : > { %v1590_v43 = vsel %vm314_vm8, %v1581_v19, %v1583_v53 }
 0x207   : > { %v1587_v0 = vpop.permute.xlu0 %1586  ;;  %2359 = vmatpush1.bf16.msra.mxu0 %v1590_v43 }
 0x208   : > { %v1592_v28 = vsel %vm314_vm8, %v1585_v49, %v1587_v0 }
 0x209   : > { %v5361_v6 = vpop.permute.xlu1 %1588 }
 0x20a   : > { %6117 = vst [vmem:[#allocation94_spill] sm:$0xff] %v5361_v6  ;;  %v1593_v48 = vsel %vm314_vm8, %v1587_v0, %v5361_v6 }
 0x20b   : > { %v1651_v4 = vpop.permute.xlu0 %1650  ;;  %2444 = vmatprep.subr.bf16.mxu1 %v1593_v48 }
 0x20c   : > { %2445 = vmatpush1.bf16.msra.mxu1 %v1592_v28 }
 0x20d   : > { %v1653_v55 = vpop.permute.xlu1 %1652 }
 0x20e   : > { %v1659_v1 = vsel %vm396_vm7, %v1651_v4, %v1653_v55 }
 0x20f   : > { %v1649_v51 = vpop.permute.xlu0 %1648  ;;  %2360 = vmatprep.subr.bf16.mxu0 %v1659_v1 }
 0x210   : > { %v1658_v31 = vsel %vm396_vm7, %v1649_v51, %v1651_v4 }
 0x211   : > { %2361 = vmatpush1.bf16.msra.mxu0 %v1658_v31  ;;  %v1655_v53 = vpop.permute.xlu1 %1654 }
 0x212   : > { %v1660_v48 = vsel %vm396_vm7, %v1653_v55, %v1655_v53 }
 0x213   : > { %v5368_v38 = vpop.permute.xlu0 %1656 }
 0x214   : > { %6118 = vst [vmem:[#allocation95_spill] sm:$0xff] %v5368_v38  ;;  %v1661_v19 = vsel %vm396_vm7, %v1655_v53, %v5368_v38 }
 0x215   : > { %2446 = vmatprep.subr.bf16.mxu1 %v1661_v19  ;;  %v1719_v43 = vpop.permute.xlu1 %1718 }
 0x216   : > { %2447 = vmatpush1.bf16.msra.mxu1 %v1660_v48 }
 0x217   : > { %v1721_v49 = vpop.permute.xlu0 %1720 }
 0x218   : > { %v1727_v0 = vsel %vm466_vm6, %v1719_v43, %v1721_v49 }
 0x219   : > { %2362 = vmatprep.subr.bf16.mxu0 %v1727_v0  ;;  %v1717_v28 = vpop.permute.xlu1 %1716 }
 0x21a   : > { %v1726_v1 = vsel %vm466_vm6, %v1717_v28, %v1719_v43 }
 0x21b   : > { %v1723_v4 = vpop.permute.xlu0 %1722  ;;  %2363 = vmatpush1.bf16.msra.mxu0 %v1726_v1 }
 0x21c   : > { %v1728_v19 = vsel %vm466_vm6, %v1721_v49, %v1723_v4 }
 0x21d   : > { %v5375_v51 = vpop.permute.xlu1 %1724 }
 0x21e   : > { %6119 = vst [vmem:[#allocation96_spill] sm:$0xff] %v5375_v51  ;;  %v1729_v31 = vsel %vm466_vm6, %v1723_v4, %v5375_v51 }
 0x21f   : > { %v1787_v38 = vpop.permute.xlu0 %1786  ;;  %2448 = vmatprep.subr.bf16.mxu1 %v1729_v31 }
 0x220   : > { %2449 = vmatpush1.bf16.msra.mxu1 %v1728_v19 }
 0x221   : > { %v1789_v55 = vpop.permute.xlu1 %1788 }
 0x222   : > { %v1795_v53 = vsel %vm536_vm5, %v1787_v38, %v1789_v55 }
 0x223   : > { %v1785_v48 = vpop.permute.xlu0 %1784  ;;  %2364 = vmatprep.subr.bf16.mxu0 %v1795_v53 }
 0x224   : > { %v1794_v0 = vsel %vm536_vm5, %v1785_v48, %v1787_v38 }
 0x225   : > { %2365 = vmatpush1.bf16.msra.mxu0 %v1794_v0  ;;  %v1791_v43 = vpop.permute.xlu1 %1790 }
 0x226   : > { %v1796_v31 = vsel %vm536_vm5, %v1789_v55, %v1791_v43 }
 0x227   : > { %v5382_v28 = vpop.permute.xlu0 %1792 }
 0x228   : > { %6120 = vst [vmem:[#allocation97_spill] sm:$0xff] %v5382_v28  ;;  %v1797_v1 = vsel %vm536_vm5, %v1791_v43, %v5382_v28 }
 0x229   : > { %2450 = vmatprep.subr.bf16.mxu1 %v1797_v1  ;;  %v1855_v51 = vpop.permute.xlu1 %1854 }
 0x22a   : > { %2451 = vmatpush1.bf16.msra.mxu1 %v1796_v31 }
 0x22b   : > { %v1857_v49 = vpop.permute.xlu0 %1856 }
 0x22c   : > { %v1863_v4 = vsel %vm577_vm4, %v1855_v51, %v1857_v49 }
 0x22d   : > { %2366 = vmatprep.subr.bf16.mxu0 %v1863_v4  ;;  %v1853_v19 = vpop.permute.xlu1 %1852 }
 0x22e   : > { %v1862_v53 = vsel %vm577_vm4, %v1853_v19, %v1855_v51 }
 0x22f   : > { %v1859_v38 = vpop.permute.xlu0 %1858  ;;  %2367 = vmatpush1.bf16.msra.mxu0 %v1862_v53 }
 0x230   : > { %v1864_v1 = vsel %vm577_vm4, %v1857_v49, %v1859_v38 }
 0x231   : > { %v5389_v48 = vpop.permute.xlu1 %1860 }
 0x232   : > { %6121 = vst [vmem:[#allocation98_spill] sm:$0xff] %v5389_v48  ;;  %v1865_v0 = vsel %vm577_vm4, %v1859_v38, %v5389_v48 }
 0x233   : > { %v1923_v28 = vpop.permute.xlu0 %1922  ;;  %2452 = vmatprep.subr.bf16.mxu1 %v1865_v0 }
 0x234   : > { %2453 = vmatpush1.bf16.msra.mxu1 %v1864_v1 }
 0x235   : > { %v1925_v55 = vpop.permute.xlu1 %1924 }
 0x236   : > { %v1931_v43 = vsel %vm507_vm3, %v1923_v28, %v1925_v55 }
 0x237   : > { %v1921_v31 = vpop.permute.xlu0 %1920  ;;  %2368 = vmatprep.subr.bf16.mxu0 %v1931_v43 }
 0x238   : > { %v1930_v4 = vsel %vm507_vm3, %v1921_v31, %v1923_v28 }
 0x239   : > { %2369 = vmatpush1.bf16.msra.mxu0 %v1930_v4  ;;  %v1927_v51 = vpop.permute.xlu1 %1926 }
 0x23a   : > { %v1932_v0 = vsel %vm507_vm3, %v1925_v55, %v1927_v51 }
 0x23b   : > { %v5396_v19 = vpop.permute.xlu0 %1928 }
 0x23c   : > { %6122 = vst [vmem:[#allocation99_spill] sm:$0xff] %v5396_v19  ;;  %v1933_v53 = vsel %vm507_vm3, %v1927_v51, %v5396_v19 }
 0x23d   : > { %2454 = vmatprep.subr.bf16.mxu1 %v1933_v53  ;;  %v2013_v48 = vpop.permute.xlu1 %2012 }
 0x23e   : > { %2455 = vmatpush1.bf16.msra.mxu1 %v1932_v0 }
 0x23f   : > { %v2015_v49 = vpop.permute.xlu0 %2014 }
 0x240   : > { %v2021_v38 = vsel %vm437_vm2, %v2013_v48, %v2015_v49 }
 0x241   : > { %2370 = vmatprep.subr.bf16.mxu0 %v2021_v38  ;;  %v2011_v1 = vpop.permute.xlu1 %2010 }
 0x242   : > { %v2020_v43 = vsel %vm437_vm2, %v2011_v1, %v2013_v48 }
 0x243   : > { %v2017_v28 = vpop.permute.xlu0 %2016  ;;  %2371 = vmatpush1.bf16.msra.mxu0 %v2020_v43 }
 0x244   : > { %v2022_v53 = vsel %vm437_vm2, %v2015_v49, %v2017_v28 }
 0x245   : > { %v5403_v31 = vpop.permute.xlu1 %2018 }
 0x246   : > { %6123 = vst [vmem:[#allocation100_spill] sm:$0xff] %v5403_v31  ;;  %v2023_v4 = vsel %vm437_vm2, %v2017_v28, %v5403_v31 }
 0x247   : > { %v2093_v19 = vpop.permute.xlu0 %2092  ;;  %2456 = vmatprep.subr.bf16.mxu1 %v2023_v4 }
 0x248   : > { %2457 = vmatpush1.bf16.msra.mxu1 %v2022_v53 }
 0x249   : > { %v2095_v55 = vpop.permute.xlu1 %2094 }
 0x24a   : > { %v2101_v51 = vsel %vm367_vm1, %v2093_v19, %v2095_v55 }
 0x24b   : > { %v2091_v0 = vpop.permute.xlu0 %2090  ;;  %2372 = vmatprep.subr.bf16.mxu0 %v2101_v51 }
 0x24c   : > { %v2100_v38 = vsel %vm367_vm1, %v2091_v0, %v2093_v19  ;;  %v3776_v19 = vld [vmem:[%s5913_s2 + $0x8] ss:$16 sps:$4 sm:$0xff]  }
 0x24d   : > { %2373 = vmatpush1.bf16.msra.mxu0 %v2100_v38  ;;  %v2097_v48 = vpop.permute.xlu1 %2096 }
 0x24e   : > { %v2102_v4 = vsel %vm367_vm1, %v2095_v55, %v2097_v48 }
 0x24f   : > { %v5410_v1 = vpop.permute.xlu0 %2098 }
 0x250   : > { %6124 = vst [vmem:[#allocation101_spill] sm:$0xff] %v5410_v1  ;;  %v2103_v43 = vsel %vm367_vm1, %v2097_v48, %v5410_v1 }
 0x251   : > { %2458 = vmatprep.subr.bf16.mxu1 %v2103_v43  ;;  %v2161_v31 = vpop.permute.xlu1 %2160 }
 0x252   : > { %2459 = vmatpush1.bf16.msra.mxu1 %v2102_v4 }
 0x253   : > { %v2163_v49 = vpop.permute.xlu0 %2162 }
 0x254   : > { %v2169_v28 = vsel %vm285_vm0, %v2161_v31, %v2163_v49 }
 0x255   : > { %2374 = vmatprep.subr.bf16.mxu0 %v2169_v28  ;;  %v2159_v53 = vpop.permute.xlu1 %2158 }
 0x256   : > { %v2168_v51 = vsel %vm285_vm0, %v2159_v53, %v2161_v31 }
 0x257   : > { %2375 = vmatpush1.bf16.msra.mxu0 %v2168_v51  ;;  %v2165_v0 = vpop.permute.xlu0 %2164 }
 0x258   : > { %v2170_v48 = vsel %vm285_vm0, %v2163_v49, %v2165_v0 }
 0x259   : > { %v5420_v38 = vpop.permute.xlu1 %2166 }
 0x25a   : > { %6125 = vst [vmem:[#allocation102_spill] sm:$0xff] %v5420_v38  ;;  %2387 = vmatmul.mubr.bf16.vlgmr.msra.gmra.mrb[0].mxu0 %v3776_v19  ;;  %v2171_v55 = vsel %vm285_vm0, %v2165_v0, %v5420_v38 }
 0x25b   : > { %2460 = vmatprep.subr.bf16.mxu1 %v2171_v55 }
 0x25c   : > { %2461 = vmatpush1.bf16.msra.mxu1 %v2170_v48 }
 0x25f   : > { %2473 = vmatmul.mubr.bf16.vlgmr.msra.gmra.mrb[0].mxu1 %v3776_v19 }
 0x32d   : > { %v2388_v43 = vpop.f32.mrb[0].mxu0 }
 0x32e   : > { %v2390_v4 = vpop.f32.mrb[1].mxu0 }
 0x32f   : > { %v2483_v31 = vadd.f32 %v2390_v4, %v2388_v43  ;;  %v2392_v28 = vpop.f32.mrb[2].mxu0 }
 0x330   : > { %v2394_v53 = vpop.f32.mrb[3].mxu0 }
 0x331   : > { %v2488_v1 = vadd.f32 %v2394_v53, %v2392_v28 }
 0x332   : > { %v2474_v6 = vpop.f32.mrb[0].mxu1 }
 0x333   : > { %v2484_v51 = vadd.f32 %v2483_v31, %v2474_v6  ;;  %v2476_v7 = vpop.f32.mrb[1].mxu1 }
 0x334   : > { %v2478_v42 = vpop.f32.mrb[2].mxu1 }
 0x335   : > { %v2485_v16 = vadd.f32 %v2484_v51, %v2476_v7  ;;  %v2489_v57 = vadd.f32 %v2488_v1, %v2478_v42  ;;  %v2480_v56 = vpop.f32.mrb[3].mxu1 }
 0x337   : > { %v2490_v62 = vadd.f32 %v2489_v57, %v2480_v56  ;;  %2486 = vadd.xlane.f32.xlu0 %v2485_v16 }
 0x339   : > { %2491 = vadd.xlane.f32.xlu1 %v2490_v62 }
 0x3c4   : > { %v2487_v55 = vpop.xlane.xlu0 %2486 }
 0x3c5   : > { %v2494_v49 = vmul.f32 0.001953125, %v2487_v55 }
 0x3c6   : > { %v2492_v0 = vpop.xlane.xlu1 %2491 }
 0x3c7   : > { %v2496_v19 = vsub.f32 %v2388_v43, %v2494_v49  ;;  %v2497_v48 = vsub.f32 %v2390_v4, %v2494_v49  ;;  %v2495_v38 = vmul.f32 0.001953125, %v2492_v0  ;;  %v2498_v14 = vsub.f32 %v2474_v6, %v2494_v49 }
 0x3c8   : > { %v2499_v31 = vsub.f32 %v2476_v7, %v2494_v49 }
 0x3c9   : > { %v2500_v20 = vsub.f32 %v2392_v28, %v2495_v38  ;;  %v2501_v10 = vsub.f32 %v2394_v53, %v2495_v38  ;;  %v2504_v33 = vmul.f32 %v2496_v19, %v2496_v19  ;;  %v2502_v59 = vsub.f32 %v2478_v42, %v2495_v38 }
 0x3ca   : > { %v2505_v61 = vmul.f32 %v2497_v48, %v2497_v48  ;;  %v2506_v1 = vmul.f32 %v2498_v14, %v2498_v14  ;;  %v2507_v16 = vmul.f32 %v2499_v31, %v2499_v31  ;;  %v2503_v18 = vsub.f32 %v2480_v56, %v2495_v38 }
 0x3cb   : > { %v2508_v15 = vmul.f32 %v2500_v20, %v2500_v20  ;;  %v2509_v51 = vmul.f32 %v2501_v10, %v2501_v10  ;;  %v2510_v55 = vmul.f32 %v2502_v59, %v2502_v59 }
 0x3cc   : > { %v2512_v2 = vadd.f32 %v2505_v61, %v2504_v33  ;;  %v2511_v4 = vmul.f32 %v2503_v18, %v2503_v18 }
 0x3cd   : > { %v2517_v57 = vadd.f32 %v2509_v51, %v2508_v15 }
 0x3ce   : > { %v2513_v62 = vadd.f32 %v2512_v2, %v2506_v1 }
 0x3cf   : > { %v2518_v43 = vadd.f32 %v2517_v57, %v2510_v55 }
 0x3d0   : > { %v2514_v39 = vadd.f32 %v2513_v62, %v2507_v16 }
 0x3d1   : > { %v2519_v6 = vadd.f32 %v2518_v43, %v2511_v4 }
 0x3d2   : > { %2515 = vadd.xlane.f32.xlu0 %v2514_v39 }
 0x3d6   : > { %2520 = vadd.xlane.f32.xlu0 %v2519_v6 }
 0x45f   : > { %v2516_v28 = vpop.xlane.xlu0 %2515 }
 0x460   : > { %v2522_v53 = vmul.f32 0.001953125, %v2516_v28 }
 0x462   : > { %v2524_v42 = vadd.f32 1e-05, %v2522_v53 }
 0x463   : > { %v2521_v7 = vpop.xlane.xlu0 %2520 }
 0x464   : > { %3781 = vrsqrt.f32 %v2524_v42  ;;  %v2523_v49 = vmul.f32 0.001953125, %v2521_v7  ;;  %v6128_v7 = vld [vmem:[#allocation5_spill] sm:$0xff] }
 0x466   : > { %v2525_v0 = vadd.f32 1e-05, %v2523_v49 }
 0x468   : > { %3783 = vrsqrt.f32 %v2525_v0 }
 0x46e   : > { %v3782_v33 = vpop.eup %3781 }
 0x46f   : > { %v2528_v61 = vmul.f32 %v3782_v33, %v2496_v19  ;;  %v2529_v15 = vmul.f32 %v3782_v33, %v2497_v48  ;;  %v2530_v56 = vmul.f32 %v3782_v33, %v2498_v14  ;;  %v2531_v4 = vmul.f32 %v3782_v33, %v2499_v31  ;;  %v6127_v48 = vld [vmem:[#allocation7_spill] sm:$0xff] }
 0x470   : > { %v6130_v33 = vld [vmem:[#allocation3_spill] sm:$0xff] }
 0x471   : > { %v2536_v39 = vmax.f32 %v2528_v61, 0.0  ;;  %v2537_v57 = vmax.f32 %v2529_v15, 0.0  ;;  %v2538_v6 = vmax.f32 %v2530_v56, 0.0  ;;  %v6131_v15 = vld [vmem:[#allocation12_spill] sm:$0xff] }
 0x472   : > { %v3784_v2 = vpop.eup %3783  ;;  %v6132_v56 = vld [vmem:[#allocation8_spill] sm:$0xff] }
 0x473   : > { %v2532_v38 = vmul.f32 %v3784_v2, %v2500_v20  ;;  %v2533_v51 = vmul.f32 %v3784_v2, %v2501_v10  ;;  %v2534_v1 = vmul.f32 %v3784_v2, %v2502_v59  ;;  %v2535_v16 = vmul.f32 %v3784_v2, %v2503_v18  ;;  %v6126_v10 = vld [vmem:[#allocation4_spill] sm:$0xff] }
 0x474   : > { %v2539_v20 = vmax.f32 %v2531_v4, 0.0  ;;  %v6137_v4 = vld [vmem:[#allocation21_spill] sm:$0xff] }
 0x475   : > { %v2540_v62 = vmax.f32 %v2532_v38, 0.0  ;;  %v2541_v55 = vmax.f32 %v2533_v51, 0.0  ;;  %v2542_v43 = vmax.f32 %v2534_v1, 0.0  ;;  %v2543_v42 = vmax.f32 %v2535_v16, 0.0  ;;  %v6133_v51 = vld [vmem:[#allocation15_spill] sm:$0xff]  ;;  %v6135_v16 = vld [vmem:[#allocation18_spill] sm:$0xff] }
 0x477   : > { %v5425_v28 = vpack.c.bf16 %v2540_v62, %v2536_v39  ;;  %v5427_v53 = vpack.c.bf16 %v2541_v55, %v2537_v57  ;;  %v5429_v19 = vpack.c.bf16 %v2542_v43, %v2538_v6  ;;  %v5437_v18 = vpack.c.bf16 %v2543_v42, %v2539_v20  ;;  %v6134_v39 = vld [vmem:[#allocation6_spill] sm:$0xff]  ;;  %v6138_v42 = vld [vmem:[#allocation9_spill] sm:$0xff]  ;;  %v6140_v20 = vld [vmem:[#allocation19_spill] sm:$0xff] }
 0x478   : > { %v6136_v55 = vld [vmem:[#allocation14_spill] sm:$0xff] }
 0x479   : > { %v2551_v14 = vmul.bf16 %v5427_v53, %v4110_v52  ;;  %v2550_v59 = vmul.bf16 %v5425_v28, %v6126_v10  ;;  %v2578_v31 = vmul.bf16 %v5425_v28, %v6127_v48  ;;  %v2552_v49 = vmul.bf16 %v5429_v19, %v6128_v7  ;;  %v6129_v52 = vld [vmem:[#allocation10_spill] sm:$0xff]  ;;  %v6139_v10 = vld [vmem:[#allocation23_spill] sm:$0xff] }
 0x47a   : > { %v2580_v0 = vmul.bf16 %v5429_v19, %v6129_v52  ;;  %v2553_v61 = vmul.bf16 %v5437_v18, %v6130_v33  ;;  %v2606_v2 = vmul.bf16 %v5425_v28, %v6131_v15  ;;  %v2579_v38 = vmul.bf16 %v5427_v53, %v6132_v56 }
 0x47b   : > { %2560 = vrot.lane.b32.xlu0 %v2551_v14, %s3807_s11  ;;  %2558 = vrot.lane.b32.xlu1 %v2550_v59, %s3807_s11  ;;  %v2608_v1 = vmul.bf16 %v5429_v19, %v6133_v51  ;;  %v2581_v57 = vmul.bf16 %v5437_v18, %v6134_v39  ;;  %v2634_v62 = vmul.bf16 %v5425_v28, %v6135_v16 }
 0x47c   : > { %v2607_v43 = vmul.bf16 %v5427_v53, %v6136_v55  ;;  %v2636_v6 = vmul.bf16 %v5429_v19, %v6137_v4  ;;  %v2609_v14 = vmul.bf16 %v5437_v18, %v6138_v42  ;;  %v2662_v59 = vmul.bf16 %v5425_v28, %v6139_v10 }
 0x47d   : > { %v2635_v48 = vmul.bf16 %v5427_v53, %v6140_v20 }
 0x47f   : > { %2586 = vrot.lane.b32.xlu0 %v2578_v31, %s3806_s10  ;;  %2562 = vrot.lane.b32.xlu1 %v2552_v49, %s3807_s11  ;;  %v6141_v31 = vld [vmem:[#allocation25_spill] sm:$0xff]  ;;  %v6142_v49 = vld [vmem:[#allocation11_spill] sm:$0xff] }
 0x480   : > { %v2664_v7 = vmul.bf16 %v5429_v19, %v6141_v31  ;;  %v2637_v52 = vmul.bf16 %v5437_v18, %v6142_v49 }
 0x483   : > { %2590 = vrot.lane.b32.xlu0 %v2580_v0, %s3806_s10  ;;  %2564 = vrot.lane.b32.xlu1 %v2553_v61, %s3807_s11  ;;  %v6143_v0 = vld [vmem:[#allocation26_spill] sm:$0xff]  ;;  %v6144_v61 = vld [vmem:[#allocation24_spill] sm:$0xff] }
 0x484   : > { %v2690_v33 = vmul.bf16 %v5425_v28, %v6143_v0  ;;  %v2663_v15 = vmul.bf16 %v5427_v53, %v6144_v61 }
 0x487   : > { %2614 = vrot.lane.b32.xlu0 %v2606_v2, %s3805_s5  ;;  %2588 = vrot.lane.b32.xlu1 %v2579_v38, %s3806_s10  ;;  %v6145_v2 = vld [vmem:[#allocation28_spill] sm:$0xff]  ;;  %v6146_v38 = vld [vmem:[#allocation13_spill] sm:$0xff] }
 0x488   : > { %v2692_v56 = vmul.bf16 %v5429_v19, %v6145_v2  ;;  %v2665_v51 = vmul.bf16 %v5437_v18, %v6146_v38 }
 0x48b   : > { %2618 = vrot.lane.b32.xlu0 %v2608_v1, %s3805_s5  ;;  %2592 = vrot.lane.b32.xlu1 %v2581_v57, %s3806_s10  ;;  %v6147_v1 = vld [vmem:[#allocation30_spill] sm:$0xff]  ;;  %v6148_v57 = vld [vmem:[#allocation27_spill] sm:$0xff] }
 0x48c   : > { %v2718_v39 = vmul.bf16 %v5425_v28, %v6147_v1  ;;  %v2691_v16 = vmul.bf16 %v5427_v53, %v6148_v57  ;;  %v6161_v57 = vld [vmem:[#allocation22_spill] sm:$0xff] }
 0x48f   : > { %2642 = vrot.lane.b32.xlu0 %v2634_v62, %s3804_s30  ;;  %2616 = vrot.lane.b32.xlu1 %v2607_v43, %s3805_s5  ;;  %v6149_v62 = vld [vmem:[#allocation32_spill] sm:$0xff] }
 0x490   : > { %v2720_v55 = vmul.bf16 %v5429_v19, %v6149_v62  ;;  %v6150_v43 = vld [vmem:[#allocation16_spill] sm:$0xff]  ;;  %v2830_v62 = vmul.bf16 %v5425_v28, %v4678_v50  ;;  %v2858_v50 = vmul.bf16 %v5425_v28, %v4733_v5  ;;  %v2886_v5 = vmul.bf16 %v5425_v28, %v4771_v29 }
 0x491   : > { %v2693_v4 = vmul.bf16 %v5437_v18, %v6150_v43  ;;  %v2923_v29 = vmul.bf16 %v5427_v53, %v4807_v26  ;;  %v2951_v26 = vmul.bf16 %v5427_v53, %v4845_v27 }
 0x493   : > { %2646 = vrot.lane.b32.xlu0 %v2636_v6, %s3804_s30  ;;  %2620 = vrot.lane.b32.xlu1 %v2609_v14, %s3805_s5  ;;  %v6151_v6 = vld [vmem:[#allocation34_spill] sm:$0xff]  ;;  %v6152_v14 = vld [vmem:[#allocation31_spill] sm:$0xff] }
 0x494   : > { %v2746_v42 = vmul.bf16 %v5425_v28, %v6151_v6  ;;  %v2719_v10 = vmul.bf16 %v5427_v53, %v6152_v14  ;;  %v2831_v6 = vmul.bf16 %v5427_v53, %v4684_v40  ;;  %v2859_v40 = vmul.bf16 %v5427_v53, %v4739_v47  ;;  %v6164_v14 = vld [vmem:[#allocation49_spill] sm:$0xff] }
 0x495   : > { %v2887_v47 = vmul.bf16 %v5427_v53, %v4779_v32  ;;  %v2924_v32 = vmul.bf16 %v5429_v19, %v6164_v14  ;;  %v6174_v14 = vld [vmem:[#allocation43_spill] sm:$0xff] }
 0x497   : > { %2670 = vrot.lane.b32.xlu0 %v2662_v59, %s3803_s29  ;;  %2644 = vrot.lane.b32.xlu1 %v2635_v48, %s3804_s30  ;;  %v6153_v59 = vld [vmem:[#allocation37_spill] sm:$0xff] }
 0x498   : > { %v2748_v20 = vmul.bf16 %v5429_v19, %v6153_v59  ;;  %v6154_v48 = vld [vmem:[#allocation17_spill] sm:$0xff] }
 0x499   : > { %v2721_v31 = vmul.bf16 %v5437_v18, %v6154_v48 }
 0x49b   : > { %2674 = vrot.lane.b32.xlu0 %v2664_v7, %s3803_s29  ;;  %2648 = vrot.lane.b32.xlu1 %v2637_v52, %s3804_s30  ;;  %v6155_v7 = vld [vmem:[#allocation39_spill] sm:$0xff] }
 0x49c   : > { %v2774_v49 = vmul.bf16 %v5425_v28, %v6155_v7  ;;  %v6156_v52 = vld [vmem:[#allocation35_spill] sm:$0xff]  ;;  %v2952_v7 = vmul.bf16 %v5429_v19, %v4855_v36 }
 0x49d   : > { %v2747_v0 = vmul.bf16 %v5427_v53, %v6156_v52  ;;  %v6166_v52 = vld [vmem:[#allocation33_spill] sm:$0xff] }
 0x49f   : > { %2698 = vrot.lane.b32.xlu0 %v2690_v33, %s3802_s28  ;;  %2672 = vrot.lane.b32.xlu1 %v2663_v15, %s3803_s29  ;;  %v6157_v33 = vld [vmem:[#allocation42_spill] sm:$0xff]  ;;  %v6158_v15 = vld [vmem:[#allocation20_spill] sm:$0xff] }
 0x4a0   : > { %v2776_v61 = vmul.bf16 %v5429_v19, %v6157_v33  ;;  %v2749_v2 = vmul.bf16 %v5437_v18, %v6158_v15  ;;  %v6167_v15 = vld [vmem:[#allocation36_spill] sm:$0xff] }
 0x4a3   : > { %2702 = vrot.lane.b32.xlu0 %v2692_v56, %s3802_s28  ;;  %2676 = vrot.lane.b32.xlu1 %v2665_v51, %s3803_s29  ;;  %v6159_v56 = vld [vmem:[#allocation44_spill] sm:$0xff] }
 0x4a4   : > { %v2802_v38 = vmul.bf16 %v5425_v28, %v6159_v56  ;;  %v6160_v51 = vld [vmem:[#allocation40_spill] sm:$0xff] }
 0x4a5   : > { %v2775_v1 = vmul.bf16 %v5427_v53, %v6160_v51  ;;  %v3007_v51 = vmul.bf16 %v5427_v53, %v4933_v17 }
 0x4a7   : > { %2726 = vrot.lane.b32.xlu0 %v2718_v39, %s3801_s27  ;;  %2700 = vrot.lane.b32.xlu1 %v2691_v16, %s3802_s28  ;;  %v2804_v39 = vmul.bf16 %v5429_v19, %v4652_v37  ;;  %v2777_v16 = vmul.bf16 %v5437_v18, %v6161_v57  ;;  %v2832_v37 = vmul.bf16 %v5429_v19, %v4704_v21 }
 0x4a8   : > { %v2860_v21 = vmul.bf16 %v5429_v19, %v4760_v41  ;;  %v2888_v41 = vmul.bf16 %v5429_v19, %v4797_v60  ;;  %v2922_v60 = vmul.bf16 %v5425_v28, %v4428_v8  ;;  %v2950_v8 = vmul.bf16 %v5425_v28, %v4458_v46 }
 0x4a9   : > { %v2979_v46 = vmul.bf16 %v5427_v53, %v4888_v45  ;;  %v6168_v45 = vld [vmem:[#allocation52_spill] sm:$0xff] }
 0x4aa   : > { %v2953_v56 = vmul.bf16 %v5437_v18, %v6168_v45 }
 0x4ab   : > { %2730 = vrot.lane.b32.xlu0 %v2720_v55, %s3801_s27  ;;  %2704 = vrot.lane.b32.xlu1 %v2693_v4, %s3802_s28  ;;  %v6162_v55 = vld [vmem:[#allocation45_spill] sm:$0xff]  ;;  %v2805_v4 = vmul.bf16 %v5437_v18, %v4341_v35  ;;  %v2833_v35 = vmul.bf16 %v5437_v18, %v4367_v54  ;;  %v2861_v54 = vmul.bf16 %v5437_v18, %v4397_v58 }
 0x4ac   : > { %v2803_v43 = vmul.bf16 %v5427_v53, %v6162_v55 }
 0x4af   : > { %2754 = vrot.lane.b32.xlu0 %v2746_v42, %s3800_s26  ;;  %2728 = vrot.lane.b32.xlu1 %v2719_v10, %s3801_s27  ;;  %v6163_v42 = vld [vmem:[#allocation29_spill] sm:$0xff]  ;;  %v6165_v10 = vld [vmem:[#allocation50_spill] sm:$0xff] }
 0x4b0   : > { %v2889_v58 = vmul.bf16 %v5437_v18, %v6163_v42  ;;  %v2925_v59 = vmul.bf16 %v5437_v18, %v6165_v10 }
 0x4b3   : > { %2758 = vrot.lane.b32.xlu0 %v2748_v20, %s3800_s26  ;;  %2732 = vrot.lane.b32.xlu1 %v2721_v31, %s3801_s27  ;;  %v5608_v20 = vld [vmem:[%s5914_s3] sm:$0xff] }
 0x4b4   : > { %v3699_v27 = vcombine.high %v5608_v20, %v5608_v20 }
 0x4b6   : > { %3442 = vmatprep.mubr.bf16.mxu0 %v3699_v27  ;;  %3524 = vmatprep.mubr.bf16.mxu1 %v3699_v27 }
 0x4b7   : > { %2782 = vrot.lane.b32.xlu0 %v2774_v49, %s3799_s21  ;;  %2756 = vrot.lane.b32.xlu1 %v2747_v0, %s3800_s26 }
 0x4bb   : > { %2786 = vrot.lane.b32.xlu0 %v2776_v61, %s3799_s21  ;;  %2760 = vrot.lane.b32.xlu1 %v2749_v2, %s3800_s26  ;;  %v2978_v2 = vmul.bf16 %v5425_v28, %v6167_v15 }
 0x4bf   : > { %2810 = vrot.lane.b32.xlu0 %v2802_v38, %s3815_s8  ;;  %2784 = vrot.lane.b32.xlu1 %v2775_v1, %s3799_s21  ;;  %v6169_v1 = vld [vmem:[#allocation54_spill] sm:$0xff] }
 0x4c3   : > { %2814 = vrot.lane.b32.xlu0 %v2804_v39, %s3815_s8  ;;  %2788 = vrot.lane.b32.xlu1 %v2777_v16, %s3799_s21  ;;  %v2980_v39 = vmul.bf16 %v5429_v19, %v6169_v1  ;;  %v3090_v1 = vmul.bf16 %v5425_v28, %v4748_v11  ;;  %v6182_v11 = vld [vmem:[#allocation64_spill] sm:$0xff] }
 0x4c7   : > { %2838 = vrot.lane.b32.xlu0 %v2830_v62, %s3814_s7  ;;  %2812 = vrot.lane.b32.xlu1 %v2803_v43, %s3815_s8  ;;  %v6170_v43 = vld [vmem:[#allocation41_spill] sm:$0xff] }
 0x4cb   : > { %2842 = vrot.lane.b32.xlu0 %v2832_v37, %s3814_s7  ;;  %2816 = vrot.lane.b32.xlu1 %v2805_v4, %s3815_s8  ;;  %v3006_v37 = vmul.bf16 %v5425_v28, %v6170_v43  ;;  %v6171_v4 = vld [vmem:[#allocation55_spill] sm:$0xff] }
 0x4cc   : > { %v2981_v17 = vmul.bf16 %v5437_v18, %v6171_v4 }
 0x4cf   : > { %2866 = vrot.lane.b32.xlu0 %v2858_v50, %s3813_s19  ;;  %2840 = vrot.lane.b32.xlu1 %v2831_v6, %s3814_s7  ;;  %v6172_v6 = vld [vmem:[#allocation38_spill] sm:$0xff] }
 0x4d3   : > { %2870 = vrot.lane.b32.xlu0 %v2860_v21, %s3813_s19  ;;  %2844 = vrot.lane.b32.xlu1 %v2833_v35, %s3814_s7 }
 0x4d7   : > { %2894 = vrot.lane.b32.xlu0 %v2886_v5, %s3812_s18  ;;  %2868 = vrot.lane.b32.xlu1 %v2859_v40, %s3813_s19  ;;  %v3035_v40 = vmul.bf16 %v5427_v53, %v4975_v9  ;;  %v3009_v9 = vmul.bf16 %v5437_v18, %v4958_v3 }
 0x4db   : > { %2898 = vrot.lane.b32.xlu0 %v2888_v41, %s3812_s18  ;;  %2872 = vrot.lane.b32.xlu1 %v2861_v54, %s3813_s19  ;;  %v6173_v41 = vld [vmem:[#allocation57_spill] sm:$0xff] }
 0x4dc   : > { %v3008_v54 = vmul.bf16 %v5429_v19, %v6173_v41 }
 0x4df   : > { %2932 = vrot.lane.b32.xlu0 %v2923_v29, %s3811_s17  ;;  %2896 = vrot.lane.b32.xlu1 %v2887_v47, %s3812_s18 }
 0x4e3   : > { %2930 = vrot.lane.b32.xlu0 %v2922_v60, %s3811_s17  ;;  %2900 = vrot.lane.b32.xlu1 %v2889_v58, %s3812_s18  ;;  %v3034_v58 = vmul.bf16 %v5425_v28, %v4640_v22  ;;  %v6175_v22 = vld [vmem:[#allocation58_spill] sm:$0xff] }
 0x4e4   : > { %v3036_v27 = vmul.bf16 %v5429_v19, %v6175_v22  ;;  %v6187_v22 = vld [vmem:[#allocation70_spill] sm:$0xff] }
 0x4e7   : > { %2960 = vrot.lane.b32.xlu0 %v2951_v26, %s3810_s14  ;;  %2934 = vrot.lane.b32.xlu1 %v2924_v32, %s3811_s17 }
 0x4eb   : > { %2958 = vrot.lane.b32.xlu0 %v2950_v8, %s3810_s14  ;;  %2936 = vrot.lane.b32.xlu1 %v2925_v59, %s3811_s17  ;;  %v3063_v59 = vmul.bf16 %v5427_v53, %v5013_v23 }
 0x4ed   : > { %v2561_v48 = vpop.permute.xlu0 %2560  ;;  %v2559_v31 = vpop.permute.xlu1 %2558 }
 0x4ee   : > { %v2567_v49 = vsel %vm314_vm8, %v2559_v31, %v2561_v48  ;;  %v2566_v0 = vsel %vm314_vm8, %v6166_v52, %v2559_v31 }
 0x4ef   : > { %2988 = vrot.lane.b32.xlu0 %v2979_v46, %s3809_s13  ;;  %2962 = vrot.lane.b32.xlu1 %v2952_v7, %s3810_s14  ;;  %v3062_v7 = vmul.bf16 %v5425_v28, %v4692_v25  ;;  %v6178_v25 = vld [vmem:[#allocation61_spill] sm:$0xff] }
 0x4f0   : > { %3410 = vmatprep.subr.bf16.mxu0 %v2567_v49  ;;  %v6176_v49 = vld [vmem:[#allocation59_spill] sm:$0xff]  ;;  %v3064_v45 = vmul.bf16 %v5429_v19, %v6178_v25 }
 0x4f1   : > { %3411 = vmatpush1.bf16.msra.mxu0 %v2566_v0  ;;  %v2587_v33 = vpop.permute.xlu0 %2586  ;;  %v2563_v61 = vpop.permute.xlu1 %2562  ;;  %v3037_v23 = vmul.bf16 %v5437_v18, %v6176_v49  ;;  %v6177_v0 = vld [vmem:[#allocation46_spill] sm:$0xff]  ;;  %v6189_v49 = vld [vmem:[#allocation71_spill] sm:$0xff] }
 0x4f2   : > { %v2568_v16 = vsel %vm314_vm8, %v2561_v48, %v2563_v61  ;;  %v2594_v21 = vsel %vm396_vm7, %v6172_v6, %v2587_v33 }
 0x4f3   : > { %2986 = vrot.lane.b32.xlu0 %v2978_v2, %s3809_s13  ;;  %2964 = vrot.lane.b32.xlu1 %v2953_v56, %s3810_s14  ;;  %v3091_v2 = vmul.bf16 %v5427_v53, %v5050_v12 }
 0x4f5   : > { %v2591_v36 = vpop.permute.xlu0 %2590  ;;  %v2565_v38 = vpop.permute.xlu1 %2564 }
 0x4f6   : > { %v2569_v57 = vsel %vm314_vm8, %v2563_v61, %v2565_v38 }
 0x4f7   : > { %3016 = vrot.lane.b32.xlu0 %v3007_v51, %s3808_s12  ;;  %2990 = vrot.lane.b32.xlu1 %v2980_v39, %s3809_s13  ;;  %v6179_v39 = vld [vmem:[#allocation63_spill] sm:$0xff] }
 0x4f8   : > { %3492 = vmatprep.subr.bf16.mxu1 %v2569_v57  ;;  %v3065_v12 = vmul.bf16 %v5437_v18, %v6179_v39 }
 0x4f9   : > { %3493 = vmatpush1.bf16.msra.mxu1 %v2568_v16  ;;  %v2615_v62 = vpop.permute.xlu0 %2614  ;;  %v2589_v55 = vpop.permute.xlu1 %2588  ;;  %v6180_v16 = vld [vmem:[#allocation47_spill] sm:$0xff] }
 0x4fa   : > { %v2595_v50 = vsel %vm396_vm7, %v2587_v33, %v2589_v55  ;;  %v2596_v47 = vsel %vm396_vm7, %v2589_v55, %v2591_v36  ;;  %v2622_v32 = vsel %vm466_vm6, %v6174_v14, %v2615_v62 }
 0x4fb   : > { %3014 = vrot.lane.b32.xlu0 %v3006_v37, %s3808_s12  ;;  %2992 = vrot.lane.b32.xlu1 %v2981_v17, %s3809_s13  ;;  %v6181_v37 = vld [vmem:[#allocation67_spill] sm:$0xff]  ;;  %v3092_v17 = vmul.bf16 %v5429_v19, %v6182_v11 }
 0x4fc   : > { %3412 = vmatprep.subr.bf16.mxu0 %v2595_v50  ;;  %v3119_v4 = vmul.bf16 %v5427_v53, %v6181_v37 }
 0x4fd   : > { %3413 = vmatpush1.bf16.msra.mxu0 %v2594_v21  ;;  %v2619_v35 = vpop.permute.xlu0 %2618  ;;  %v2593_v5 = vpop.permute.xlu1 %2592 }
 0x4fe   : > { %v2597_v29 = vsel %vm396_vm7, %v2591_v36, %v2593_v5  ;;  %v3118_v5 = vmul.bf16 %v5425_v28, %v4812_v30  ;;  %v6185_v30 = vld [vmem:[#allocation68_spill] sm:$0xff] }
 0x4ff   : > { %3044 = vrot.lane.b32.xlu0 %v3035_v40, %s3807_s11  ;;  %3018 = vrot.lane.b32.xlu1 %v3008_v54, %s3808_s12  ;;  %v6183_v40 = vld [vmem:[#allocation66_spill] sm:$0xff] }
 0x500   : > { %3494 = vmatprep.subr.bf16.mxu1 %v2597_v29  ;;  %v3093_v41 = vmul.bf16 %v5437_v18, %v6183_v40  ;;  %v6184_v29 = vld [vmem:[#allocation48_spill] sm:$0xff] }
 0x501   : > { %3495 = vmatpush1.bf16.msra.mxu1 %v2596_v47  ;;  %v2643_v60 = vpop.permute.xlu0 %2642  ;;  %v2617_v42 = vpop.permute.xlu1 %2616 }
 0x502   : > { %v2623_v26 = vsel %vm466_vm6, %v2615_v62, %v2617_v42  ;;  %v2624_v48 = vsel %vm466_vm6, %v2617_v42, %v2619_v35  ;;  %v2650_v33 = vsel %vm536_vm5, %v6177_v0, %v2643_v60 }
 0x503   : > { %3042 = vrot.lane.b32.xlu0 %v3034_v58, %s3807_s11  ;;  %3020 = vrot.lane.b32.xlu1 %v3009_v9, %s3808_s12  ;;  %v3147_v58 = vmul.bf16 %v5427_v53, %v5123_v44  ;;  %v3120_v9 = vmul.bf16 %v5429_v19, %v6185_v30  ;;  %v3121_v44 = vmul.bf16 %v5437_v18, %v6187_v22 }
 0x504   : > { %3414 = vmatprep.subr.bf16.mxu0 %v2623_v26 }
 0x505   : > { %3415 = vmatpush1.bf16.msra.mxu0 %v2622_v32  ;;  %v2647_v8 = vpop.permute.xlu0 %2646  ;;  %v2621_v10 = vpop.permute.xlu1 %2620 }
 0x506   : > { %v2625_v3 = vsel %vm466_vm6, %v2619_v35, %v2621_v10  ;;  %v6186_v10 = vld [vmem:[#allocation53_spill] sm:$0xff] }
 0x507   : > { %3072 = vrot.lane.b32.xlu0 %v3063_v59, %s3806_s10  ;;  %3046 = vrot.lane.b32.xlu1 %v3036_v27, %s3807_s11  ;;  %v3146_v59 = vmul.bf16 %v5425_v28, %v6186_v10 }
 0x508   : > { %3496 = vmatprep.subr.bf16.mxu1 %v2625_v3  ;;  %v6188_v3 = vld [vmem:[#allocation51_spill] sm:$0xff] }
 0x509   : > { %3497 = vmatpush1.bf16.msra.mxu1 %v2624_v48  ;;  %v2671_v31 = vpop.permute.xlu0 %2670  ;;  %v2645_v46 = vpop.permute.xlu1 %2644 }
 0x50a   : > { %v2651_v52 = vsel %vm536_vm5, %v2643_v60, %v2645_v46  ;;  %v2652_v36 = vsel %vm536_vm5, %v2645_v46, %v2647_v8  ;;  %v2678_v62 = vsel %vm577_vm4, %v6180_v16, %v2671_v31  ;;  %v6192_v16 = vld [vmem:[#allocation62_spill] sm:$0xff] }
 0x50b   : > { %3070 = vrot.lane.b32.xlu0 %v3062_v7, %s3806_s10  ;;  %3048 = vrot.lane.b32.xlu1 %v3037_v23, %s3807_s11  ;;  %v3175_v7 = vmul.bf16 %v5427_v53, %v5159_v34  ;;  %v3148_v23 = vmul.bf16 %v5429_v19, %v6189_v49  ;;  %v6204_v49 = vld [vmem:[#allocation72_spill] sm:$0xff] }
 0x50c   : > { %3416 = vmatprep.subr.bf16.mxu0 %v2651_v52 }
 0x50d   : > { %3417 = vmatpush1.bf16.msra.mxu0 %v2650_v33  ;;  %v2675_v61 = vpop.permute.xlu0 %2674  ;;  %v2649_v15 = vpop.permute.xlu1 %2648 }
 0x50e   : > { %v2653_v56 = vsel %vm536_vm5, %v2647_v8, %v2649_v15  ;;  %v3174_v15 = vmul.bf16 %v5425_v28, %v4963_v13  ;;  %v3176_v13 = vmul.bf16 %v5429_v19, %v5170_v24 }
 0x50f   : > { %3100 = vrot.lane.b32.xlu0 %v3091_v2, %s3805_s5  ;;  %3074 = vrot.lane.b32.xlu1 %v3064_v45, %s3806_s10  ;;  %v6190_v2 = vld [vmem:[#allocation73_spill] sm:$0xff]  ;;  %v6191_v45 = vld [vmem:[#allocation56_spill] sm:$0xff] }
 0x510   : > { %3498 = vmatprep.subr.bf16.mxu1 %v2653_v56  ;;  %v3149_v34 = vmul.bf16 %v5437_v18, %v6190_v2 }
 0x511   : > { %3499 = vmatpush1.bf16.msra.mxu1 %v2652_v36  ;;  %v2699_v38 = vpop.permute.xlu0 %2698  ;;  %v2673_v51 = vpop.permute.xlu1 %2672 }
 0x512   : > { %v2679_v57 = vsel %vm577_vm4, %v2671_v31, %v2673_v51  ;;  %v2680_v6 = vsel %vm577_vm4, %v2673_v51, %v2675_v61  ;;  %v2706_v47 = vsel %vm507_vm3, %v6184_v29, %v2699_v38  ;;  %v3203_v51 = vmul.bf16 %v5427_v53, %v5196_v63 }
 0x513   : > { %3098 = vrot.lane.b32.xlu0 %v3090_v1, %s3805_s5  ;;  %3076 = vrot.lane.b32.xlu1 %v3065_v12, %s3806_s10 }
 0x514   : > { %3418 = vmatprep.subr.bf16.mxu0 %v2679_v57 }
 0x515   : > { %3419 = vmatpush1.bf16.msra.mxu0 %v2678_v62  ;;  %v2703_v55 = vpop.permute.xlu0 %2702  ;;  %v2677_v43 = vpop.permute.xlu1 %2676  ;;  %v3202_v62 = vmul.bf16 %v5425_v28, %v6192_v16 }
 0x516   : > { %v2681_v50 = vsel %vm577_vm4, %v2675_v61, %v2677_v43  ;;  %v6194_v43 = vld [vmem:[#allocation60_spill] sm:$0xff] }
 0x517   : > { %3128 = vrot.lane.b32.xlu0 %v3119_v4, %s3804_s30  ;;  %3102 = vrot.lane.b32.xlu1 %v3092_v17, %s3805_s5  ;;  %v6195_v17 = vld [vmem:[#allocation80_spill] sm:$0xff] }
 0x518   : > { %3500 = vmatprep.subr.bf16.mxu1 %v2681_v50  ;;  %v3231_v50 = vmul.bf16 %v5427_v53, %v6195_v17  ;;  %v6217_v17 = vld [vmem:[#allocation82_spill] sm:$0xff] }
 0x519   : > { %3501 = vmatpush1.bf16.msra.mxu1 %v2680_v6  ;;  %v2727_v21 = vpop.permute.xlu0 %2726  ;;  %v2701_v35 = vpop.permute.xlu1 %2700  ;;  %v6196_v6 = vld [vmem:[#allocation77_spill] sm:$0xff] }
 0x51a   : > { %v2707_v54 = vsel %vm507_vm3, %v2699_v38, %v2701_v35  ;;  %v2708_v14 = vsel %vm507_vm3, %v2701_v35, %v2703_v55  ;;  %v2734_v48 = vsel %vm437_vm2, %v6188_v3, %v2727_v21  ;;  %v6202_v3 = vld [vmem:[#allocation74_spill] sm:$0xff] }
 0x51b   : > { %3126 = vrot.lane.b32.xlu0 %v3118_v5, %s3804_s30  ;;  %3104 = vrot.lane.b32.xlu1 %v3093_v41, %s3805_s5 }
 0x51c   : > { %3420 = vmatprep.subr.bf16.mxu0 %v2707_v54  ;;  %v6197_v54 = vld [vmem:[#allocation69_spill] sm:$0xff] }
 0x51d   : > { %3421 = vmatpush1.bf16.msra.mxu0 %v2706_v47  ;;  %v2731_v60 = vpop.permute.xlu0 %2730  ;;  %v2705_v42 = vpop.permute.xlu1 %2704  ;;  %v3230_v29 = vmul.bf16 %v5425_v28, %v6197_v54  ;;  %v6198_v47 = vld [vmem:[#allocation78_spill] sm:$0xff] }
 0x51e   : > { %v2709_v26 = vsel %vm507_vm3, %v2703_v55, %v2705_v42  ;;  %v6193_v55 = vld [vmem:[#allocation75_spill] sm:$0xff] }
 0x51f   : > { %3156 = vrot.lane.b32.xlu0 %v3147_v58, %s3803_s29  ;;  %3130 = vrot.lane.b32.xlu1 %v3120_v9, %s3804_s30  ;;  %v3177_v63 = vmul.bf16 %v5437_v18, %v6193_v55  ;;  %v6199_v58 = vld [vmem:[#allocation65_spill] sm:$0xff]  ;;  %v6213_v55 = vld [vmem:[#allocation83_spill] sm:$0xff] }
 0x520   : > { %3502 = vmatprep.subr.bf16.mxu1 %v2709_v26 }
 0x521   : > { %3503 = vmatpush1.bf16.msra.mxu1 %v2708_v14  ;;  %v2755_v32 = vpop.permute.xlu0 %2754  ;;  %v2729_v8 = vpop.permute.xlu1 %2728  ;;  %v6200_v14 = vld [vmem:[#allocation87_spill] sm:$0xff] }
 0x522   : > { %v2735_v27 = vsel %vm437_vm2, %v2727_v21, %v2729_v8  ;;  %v2736_v0 = vsel %vm437_vm2, %v2729_v8, %v2731_v60  ;;  %v2762_v56 = vsel %vm367_vm1, %v6191_v45, %v2755_v32  ;;  %v3204_v21 = vmul.bf16 %v5429_v19, %v6196_v6  ;;  %v6201_v8 = vld [vmem:[#allocation81_spill] sm:$0xff] }
 0x523   : > { %3154 = vrot.lane.b32.xlu0 %v3146_v59, %s3803_s29  ;;  %3132 = vrot.lane.b32.xlu1 %v3121_v44, %s3804_s30  ;;  %v3232_v10 = vmul.bf16 %v5429_v19, %v6201_v8  ;;  %v6206_v45 = vld [vmem:[#allocation89_spill] sm:$0xff] }
 0x524   : > { %3422 = vmatprep.subr.bf16.mxu0 %v2735_v27 }
 0x525   : > { %3423 = vmatpush1.bf16.msra.mxu0 %v2734_v48  ;;  %v2759_v31 = vpop.permute.xlu0 %2758  ;;  %v2733_v46 = vpop.permute.xlu1 %2732  ;;  %v3258_v48 = vmul.bf16 %v5425_v28, %v6202_v3 }
 0x526   : > { %v2737_v52 = vsel %vm437_vm2, %v2731_v60, %v2733_v46  ;;  %v3205_v60 = vmul.bf16 %v5437_v18, %v6198_v47 }
 0x527   : > { %3184 = vrot.lane.b32.xlu0 %v3175_v7, %s3802_s28  ;;  %3158 = vrot.lane.b32.xlu1 %v3148_v23, %s3803_s29 }
 0x528   : > { %3504 = vmatprep.subr.bf16.mxu1 %v2737_v52 }
 0x529   : > { %3505 = vmatpush1.bf16.msra.mxu1 %v2736_v0  ;;  %v2783_v33 = vpop.permute.xlu0 %2782  ;;  %v2757_v61 = vpop.permute.xlu1 %2756 }
 0x52a   : > { %v2763_v25 = vsel %vm367_vm1, %v2755_v32, %v2757_v61  ;;  %v2764_v39 = vsel %vm367_vm1, %v2757_v61, %v2759_v31  ;;  %v2790_v37 = vsel %vm285_vm0, %v6194_v43, %v2783_v33  ;;  %v3259_v32 = vmul.bf16 %v5427_v53, %v6200_v14 }
 0x52b   : > { %3182 = vrot.lane.b32.xlu0 %v3174_v15, %s3802_s28  ;;  %3160 = vrot.lane.b32.xlu1 %v3149_v34, %s3803_s29  ;;  %v3698_v14 = vcombine.low %v5608_v20, %v5608_v20  ;;  %s197_s29 = scalar_lea.vmem %s5915_s4, %s3706_s22 }
 0x52c   : > { %3424 = vmatprep.subr.bf16.mxu0 %v2763_v25 }
 0x52d   : > { %3425 = vmatpush1.bf16.msra.mxu0 %v2762_v56  ;;  %v2787_v36 = vpop.permute.xlu0 %2786  ;;  %v2761_v38 = vpop.permute.xlu1 %2760  ;;  %v3261_v56 = vmul.bf16 %v5437_v18, %v6206_v45 }
 0x52e   : > { %v2765_v1 = vsel %vm367_vm1, %v2759_v31, %v2761_v38  ;;  %v6203_v31 = vld [vmem:[#allocation85_spill] sm:$0xff]  ;;  %v6208_v38 = vld [vmem:[#allocation76_spill] sm:$0xff] }
 0x52f   : > { %3212 = vrot.lane.b32.xlu0 %v3203_v51, %s3801_s27  ;;  %3186 = vrot.lane.b32.xlu1 %v3176_v13, %s3802_s28  ;;  %v3233_v46 = vmul.bf16 %v5437_v18, %v6203_v31 }
 0x530   : > { %3506 = vmatprep.subr.bf16.mxu1 %v2765_v1 }
 0x531   : > { %3507 = vmatpush1.bf16.msra.mxu1 %v2764_v39  ;;  %v2811_v12 = vpop.permute.xlu0 %2810  ;;  %v2785_v57 = vpop.permute.xlu1 %2784 }
 0x532   : > { %v2791_v24 = vsel %vm285_vm0, %v2783_v33, %v2785_v57  ;;  %v2792_v5 = vsel %vm285_vm0, %v2785_v57, %v2787_v36  ;;  %v2818_v30 = vsel %vm981_vm9, %v6199_v58, %v2811_v12  ;;  %v6205_v33 = vld [vmem:[#allocation88_spill] sm:$0xff] }
 0x533   : > { %3210 = vrot.lane.b32.xlu0 %v3202_v62, %s3801_s27  ;;  %3188 = vrot.lane.b32.xlu1 %v3177_v63, %s3802_s28  ;;  %v3260_v61 = vmul.bf16 %v5429_v19, %v6205_v33 }
 0x534   : > { %3426 = vmatprep.subr.bf16.mxu0 %v2791_v24  ;;  %v6215_v24 = vld [vmem:[#allocation79_spill] sm:$0xff] }
 0x535   : > { %3427 = vmatpush1.bf16.msra.mxu0 %v2790_v37  ;;  %v2815_v4 = vpop.permute.xlu0 %2814  ;;  %v2789_v11 = vpop.permute.xlu1 %2788  ;;  %v2915_v43 = vmul.bf16 %v5427_v53, %v6215_v24 }
 0x536   : > { %v2793_v35 = vsel %vm285_vm0, %v2787_v36, %v2789_v11 }
 0x537   : > { %3240 = vrot.lane.b32.xlu0 %v3231_v50, %s3800_s26  ;;  %3214 = vrot.lane.b32.xlu1 %v3204_v21, %s3801_s27  ;;  %v2914_v50 = vmul.bf16 %v5425_v28, %v6217_v17  ;;  %v6219_v21 = vld [vmem:[#allocation84_spill] sm:$0xff] }
 0x538   : > { %3508 = vmatprep.subr.bf16.mxu1 %v2793_v35  ;;  %v2917_v35 = vmul.bf16 %v5437_v18, %v6219_v21  ;;  %v6224_v18 = vld [vmem:[#allocation90_spill] sm:$0xff] }
 0x539   : > { %3509 = vmatpush1.bf16.msra.mxu1 %v2792_v5  ;;  %v2839_v40 = vpop.permute.xlu0 %2838  ;;  %v2813_v41 = vpop.permute.xlu1 %2812 }
 0x53a   : > { %v2819_v42 = vsel %vm981_vm9, %v2811_v12, %v2813_v41  ;;  %v2820_v22 = vsel %vm981_vm9, %v2813_v41, %v2815_v4  ;;  %v2846_v23 = vsel %vm1051_vm15, %v6204_v49, %v2839_v40  ;;  %v6221_v41 = vld [vmem:[#allocation86_spill] sm:$0xff]  ;;  %v6233_v49 = vld [vmem:[#allocation92_spill] sm:$0xff] }
 0x53b   : > { %3238 = vrot.lane.b32.xlu0 %v3230_v29, %s3800_s26  ;;  %3216 = vrot.lane.b32.xlu1 %v3205_v60, %s3801_s27  ;;  %v2916_v54 = vmul.bf16 %v5429_v19, %v6221_v41  ;;  %v5833_v19 = vld [vmem:[%s5914_s3 + $0x8] sm:$0xff] }
 0x53c   : > { %3428 = vmatprep.subr.bf16.mxu0 %v2819_v42 }
 0x53d   : > { %3429 = vmatpush1.bf16.msra.mxu0 %v2818_v30  ;;  %v2843_v9 = vpop.permute.xlu0 %2842  ;;  %v2817_v26 = vpop.permute.xlu1 %2816 }
 0x53e   : > { %v2821_v59 = vsel %vm981_vm9, %v2815_v4, %v2817_v26  ;;  %vm6207_vm9 = vcmask 56320  }
 0x53f   : > { %3268 = vrot.lane.b32.xlu0 %v3259_v32, %s3799_s21  ;;  %3242 = vrot.lane.b32.xlu1 %v3232_v10, %s3800_s26  ;;  %vm6209_vm11 = vmmov %vm6207_vm9  ;;  %v3701_v32 = vcombine.high %v5833_v19, %v5833_v19 }
 0x540   : > { %3510 = vmatprep.subr.bf16.mxu1 %v2821_v59  ;;  %vm6210_vm12 = vmmov %vm6207_vm9 }
 0x541   : > { %3511 = vmatpush1.bf16.msra.mxu1 %v2820_v22  ;;  %v2867_v44 = vpop.permute.xlu0 %2866  ;;  %v2841_v27 = vpop.permute.xlu1 %2840  ;;  %vm6211_vm13 = vmmov %vm6207_vm9  ;;  %v6229_v22 = vld [vmem:[#allocation91_spill] sm:$0xff] }
 0x542   : > { %v2847_v7 = vsel %vm1051_vm15, %v2839_v40, %v2841_v27  ;;  %v2848_v2 = vsel %vm1051_vm15, %v2841_v27, %v2843_v9  ;;  %v2874_v51 = vsel %vm6209_vm11, %v6208_v38, %v2867_v44 }
 0x543   : > { %3266 = vrot.lane.b32.xlu0 %v3258_v48, %s3799_s21  ;;  %3244 = vrot.lane.b32.xlu1 %v3233_v46, %s3800_s26 }
 0x544   : > { %3430 = vmatprep.subr.bf16.mxu0 %v2847_v7 }
 0x545   : > { %3431 = vmatpush1.bf16.msra.mxu0 %v2846_v23  ;;  %v2871_v52 = vpop.permute.xlu0 %2870  ;;  %v2845_v0 = vpop.permute.xlu1 %2844 }
 0x546   : > { %v2849_v15 = vsel %vm1051_vm15, %v2843_v9, %v2845_v0  ;;  %vm6214_vm15 = vmmov %vm6212_vm14 }
 0x547   : > { %3270 = vrot.lane.b32.xlu1 %v3260_v61, %s3799_s21  ;;  %3512 = vmatprep.subr.bf16.mxu1 %v2849_v15 }
 0x548   : > { %3513 = vmatpush1.bf16.msra.mxu1 %v2848_v2 }
 0x549   : > { %v2895_v34 = vpop.permute.xlu0 %2894  ;;  %v2869_v25 = vpop.permute.xlu1 %2868 }
 0x54a   : > { %v2875_v36 = vsel %vm6207_vm9, %v2867_v44, %v2869_v25  ;;  %v2876_v12 = vsel %vm6211_vm13, %v2869_v25, %v2871_v52  ;;  %v2902_v63 = vsel %vm6214_vm15, %v6213_v55, %v2895_v34  ;;  %vm6216_vm9 = vmmov %vm6212_vm14  ;;  %v6237_v25 = vld [vmem:[#allocation93_spill] sm:$0xff] }
 0x54b   : > { %3272 = vrot.lane.b32.xlu1 %v3261_v56, %s3799_s21  ;;  %3432 = vmatprep.subr.bf16.mxu0 %v2875_v36  ;;  %vm6218_vm11 = vmmov %vm6216_vm9 }
 0x54c   : > { %3433 = vmatpush1.bf16.msra.mxu0 %v2874_v51 }
 0x54d   : > { %v2899_v13 = vpop.permute.xlu0 %2898  ;;  %v2873_v1 = vpop.permute.xlu1 %2872 }
 0x54e   : > { %v2877_v39 = vsel %vm6210_vm12, %v2871_v52, %v2873_v1  ;;  %vm6220_vm12 = vcmask 1039360  }
 0x54f   : > { %3514 = vmatprep.subr.bf16.mxu1 %v2877_v39  ;;  %vm6222_vm13 = vmmov %vm6220_vm12 }
 0x550   : > { %3515 = vmatpush1.bf16.msra.mxu1 %v2876_v12  ;;  %vm6225_vm15 = vmmov %vm6220_vm12  ;;  %v6239_v12 = vld [vmem:[#allocation94_spill] sm:$0xff] }
 0x551   : > { %v2933_v57 = vpop.permute.xlu0 %2932  ;;  %v2897_v16 = vpop.permute.xlu1 %2896 }
 0x552   : > { %v2903_v62 = vsel %vm6212_vm14, %v2895_v34, %v2897_v16  ;;  %v2904_v6 = vsel %vm6218_vm11, %v2897_v16, %v2899_v13  ;;  %vm6223_vm14 = vmmov %vm6220_vm12 }
 0x553   : > { %3434 = vmatprep.subr.bf16.mxu0 %v2903_v62 }
 0x554   : > { %3435 = vmatpush1.bf16.msra.mxu0 %v2902_v63 }
 0x555   : > { %v2931_v37 = vpop.permute.xlu0 %2930  ;;  %3436 = vmatprep.subr.bf16.mxu0 %v2915_v43  ;;  %v2901_v4 = vpop.permute.xlu1 %2900 }
 0x556   : > { %v2905_v11 = vsel %vm6216_vm9, %v2899_v13, %v2901_v4  ;;  %v2938_v29 = vsel %vm6222_vm13, %v2931_v37, %v2933_v57  ;;  %vm6226_vm9 = vcmask 990208   ;;  %v6240_v4 = vld [vmem:[#allocation95_spill] sm:$0xff] }
 0x557   : > { %3516 = vmatprep.subr.bf16.mxu1 %v2905_v11  ;;  %vm6227_vm11 = vmmov %vm6226_vm9 }
 0x558   : > { %3437 = vmatpush1.bf16.msra.mxu0 %v2914_v50  ;;  %3517 = vmatpush1.bf16.msra.mxu1 %v2904_v6  ;;  %vm6230_vm13 = vmmov %vm6226_vm9 }
 0x559   : > { %v2961_v5 = vpop.permute.xlu0 %2960  ;;  %3518 = vmatprep.subr.bf16.mxu1 %v2917_v35  ;;  %v2935_v53 = vpop.permute.xlu1 %2934 }
 0x55a   : > { %v2939_v40 = vsel %vm6220_vm12, %v2933_v57, %v2935_v53  ;;  %vm6228_vm12 = vmmov %vm6226_vm9 }
 0x55b   : > { %3438 = vmatprep.subr.bf16.mxu0 %v2939_v40  ;;  %v6241_v40 = vld [vmem:[#allocation96_spill] sm:$0xff] }
 0x55c   : > { %3439 = vmatpush1.bf16.msra.mxu0 %v2938_v29  ;;  %3519 = vmatpush1.bf16.msra.mxu1 %v2916_v54 }
 0x55d   : > { %v2959_v28 = vpop.permute.xlu0 %2958  ;;  %v2937_v47 = vpop.permute.xlu1 %2936 }
 0x55e   : > { %v2940_v60 = vsel %vm6223_vm14, %v2935_v53, %v2937_v47  ;;  %v2941_v42 = vsel %vm6225_vm15, %v2937_v47, %v6224_v18  ;;  %v2966_v26 = vsel %vm6227_vm11, %v2959_v28, %v2961_v5  ;;  %vm6231_vm14 = vcmask 392192  }
 0x55f   : > { %3520 = vmatprep.subr.bf16.mxu1 %v2941_v42  ;;  %vm6232_vm15 = vmmov %vm6231_vm14 }
 0x560   : > { %3521 = vmatpush1.bf16.msra.mxu1 %v2940_v60 }
 0x561   : > { %v2989_v58 = vpop.permute.xlu0 %2988  ;;  %v2963_v30 = vpop.permute.xlu1 %2962 }
 0x562   : > { %v2967_v9 = vsel %vm6226_vm9, %v2961_v5, %v2963_v30  ;;  %vm6234_vm9 = vcmask 973824  }
 0x563   : > { %3440 = vmatprep.subr.bf16.mxu0 %v2967_v9  ;;  %vm6235_vm11 = vmmov %vm6234_vm9 }
 0x564   : > { %3441 = vmatpush1.bf16.msra.mxu0 %v2966_v26 }
 0x565   : > { %v2987_v8 = vpop.permute.xlu0 %2986  ;;  %v2965_v10 = vpop.permute.xlu1 %2964 }
 0x566   : > { %v2968_v59 = vsel %vm6228_vm12, %v2963_v30, %v2965_v10  ;;  %v2969_v44 = vsel %vm6230_vm13, %v2965_v10, %v6229_v22  ;;  %v2994_v48 = vsel %vm1022_vm10, %v2987_v8, %v2989_v58  ;;  %vm6236_vm12 = vmmov %vm6234_vm9  ;;  %v6243_v22 = vld [vmem:[#allocation98_spill] sm:$0xff] }
 0x567   : > { %3522 = vmatprep.subr.bf16.mxu1 %v2969_v44  ;;  %3443 = vmatmul.mubr.bf16.vlgmr.msra.gmra.mrb[4].mxu0 %v3698_v14  ;;  %vm6238_vm13 = vmmov %vm6234_vm9 }
 0x568   : > { %3523 = vmatpush1.bf16.msra.mxu1 %v2968_v59  ;;  %3702 = vmatprep.mubr.msk.bf16.mxu0 %vm6231_vm14, %v3701_v32 }
 0x569   : > { %v3017_v27 = vpop.permute.xlu0 %3016  ;;  %v2991_v3 = vpop.permute.xlu1 %2990 }
 0x56a   : > { %v2995_v20 = vsel %vm1022_vm10, %v2989_v58, %v2991_v3  ;;  %v6242_v58 = vld [vmem:[#allocation97_spill] sm:$0xff] }
 0x56b   : > { %3451 = vmatprep.subr.bf16.mxu0 %v2995_v20  ;;  %3525 = vmatmul.mubr.bf16.vlgmr.msra.gmra.mrb[4].mxu1 %v3698_v14 }
 0x56c   : > { %3452 = vmatpush1.bf16.msra.mxu0 %v2994_v48  ;;  %3703 = vmatprep.mubr.msk.bf16.mxu1 %vm6232_vm15, %v3701_v32 }
 0x56d   : > { %v3015_v31 = vpop.permute.xlu0 %3014  ;;  %v2993_v46 = vpop.permute.xlu1 %2992 }
 0x56e   : > { %v2996_v7 = vsel %vm1022_vm10, %v2991_v3, %v2993_v46  ;;  %v2997_v23 = vsel %vm1022_vm10, %v2993_v46, %v6233_v49  ;;  %v3022_v61 = vsel %vm6235_vm11, %v3015_v31, %v3017_v27  ;;  %v6244_v49 = vld [vmem:[#allocation99_spill] sm:$0xff] }
 0x56f   : > { %3533 = vmatprep.subr.bf16.mxu1 %v2997_v23 }
 0x570   : > { %3534 = vmatpush1.bf16.msra.mxu1 %v2996_v7 }
 0x571   : > { %v3045_v52 = vpop.permute.xlu0 %3044  ;;  %v3019_v0 = vpop.permute.xlu1 %3018 }
 0x572   : > { %v3023_v33 = vsel %vm6234_vm9, %v3017_v27, %v3019_v0 }
 0x573   : > { %3453 = vmatprep.subr.bf16.mxu0 %v3023_v33 }
 0x574   : > { %3454 = vmatpush1.bf16.msra.mxu0 %v3022_v61 }
 0x575   : > { %v3043_v15 = vpop.permute.xlu0 %3042  ;;  %v3021_v2 = vpop.permute.xlu1 %3020 }
 0x576   : > { %v3024_v34 = vsel %vm6236_vm12, %v3019_v0, %v3021_v2  ;;  %v3025_v45 = vsel %vm6238_vm13, %v3021_v2, %v6237_v25  ;;  %v3050_v51 = vsel %vm314_vm8, %v3043_v15, %v3045_v52  ;;  %v6245_v25 = vld [vmem:[#allocation100_spill] sm:$0xff] }
 0x577   : > { %3535 = vmatprep.subr.bf16.mxu1 %v3025_v45 }
 0x578   : > { %3536 = vmatpush1.bf16.msra.mxu1 %v3024_v34 }
 0x579   : > { %v3073_v56 = vpop.permute.xlu0 %3072  ;;  %v3047_v36 = vpop.permute.xlu1 %3046 }
 0x57a   : > { %v3051_v38 = vsel %vm314_vm8, %v3045_v52, %v3047_v36 }
 0x57b   : > { %3455 = vmatprep.subr.bf16.mxu0 %v3051_v38 }
 0x57c   : > { %3456 = vmatpush1.bf16.msra.mxu0 %v3050_v51 }
 0x57d   : > { %v3071_v13 = vpop.permute.xlu0 %3070  ;;  %v3049_v1 = vpop.permute.xlu1 %3048 }
 0x57e   : > { %v3052_v39 = vsel %vm314_vm8, %v3047_v36, %v3049_v1  ;;  %v3053_v57 = vsel %vm314_vm8, %v3049_v1, %v6239_v12  ;;  %v3078_v63 = vsel %vm396_vm7, %v3071_v13, %v3073_v56 }
 0x57f   : > { %3537 = vmatprep.subr.bf16.mxu1 %v3053_v57 }
 0x580   : > { %3538 = vmatpush1.bf16.msra.mxu1 %v3052_v39  ;;  %v6246_v39 = vld [vmem:[#allocation101_spill] sm:$0xff] }
 0x581   : > { %v3101_v16 = vpop.permute.xlu0 %3100  ;;  %v3075_v62 = vpop.permute.xlu1 %3074 }
 0x582   : > { %v3079_v55 = vsel %vm396_vm7, %v3073_v56, %v3075_v62 }
 0x583   : > { %3457 = vmatprep.subr.bf16.mxu0 %v3079_v55 }
 0x584   : > { %3458 = vmatpush1.bf16.msra.mxu0 %v3078_v63  ;;  %v3700_v63 = vcombine.low %v5833_v19, %v5833_v19 }
 0x585   : > { %v3099_v24 = vpop.permute.xlu0 %3098  ;;  %v3077_v43 = vpop.permute.xlu1 %3076 }
 0x586   : > { %v3080_v37 = vsel %vm396_vm7, %v3075_v62, %v3077_v43  ;;  %v3081_v11 = vsel %vm396_vm7, %v3077_v43, %v6240_v4  ;;  %v3106_v21 = vsel %vm466_vm6, %v3099_v24, %v3101_v16 }
 0x587   : > { %3539 = vmatprep.subr.bf16.mxu1 %v3081_v11 }
 0x588   : > { %3540 = vmatpush1.bf16.msra.mxu1 %v3080_v37  ;;  %v6247_v37 = vld [vmem:[#allocation102_spill] sm:$0xff] }
 0x589   : > { %v3129_v17 = vpop.permute.xlu0 %3128  ;;  %v3103_v50 = vpop.permute.xlu1 %3102 }
 0x58a   : > { %v3107_v6 = vsel %vm466_vm6, %v3101_v16, %v3103_v50 }
 0x58b   : > { %3459 = vmatprep.subr.bf16.mxu0 %v3107_v6 }
 0x58c   : > { %3460 = vmatpush1.bf16.msra.mxu0 %v3106_v21 }
 0x58d   : > { %v3127_v35 = vpop.permute.xlu0 %3126  ;;  %v3105_v5 = vpop.permute.xlu1 %3104 }
 0x58e   : > { %v3108_v53 = vsel %vm466_vm6, %v3103_v50, %v3105_v5  ;;  %v3109_v41 = vsel %vm466_vm6, %v3105_v5, %v6241_v40  ;;  %v3134_v47 = vsel %vm536_vm5, %v3127_v35, %v3129_v17 }
 0x58f   : > { %3541 = vmatprep.subr.bf16.mxu1 %v3109_v41 }
 0x590   : > { %3542 = vmatpush1.bf16.msra.mxu1 %v3108_v53 }
 0x591   : > { %v3157_v54 = vpop.permute.xlu0 %3156  ;;  %v3131_v29 = vpop.permute.xlu1 %3130 }
 0x592   : > { %v3135_v28 = vsel %vm536_vm5, %v3129_v17, %v3131_v29 }
 0x593   : > { %3461 = vmatprep.subr.bf16.mxu0 %v3135_v28 }
 0x594   : > { %3462 = vmatpush1.bf16.msra.mxu0 %v3134_v47 }
 0x595   : > { %v3155_v60 = vpop.permute.xlu0 %3154  ;;  %v3133_v18 = vpop.permute.xlu1 %3132 }
 0x596   : > { %v3136_v42 = vsel %vm536_vm5, %v3131_v29, %v3133_v18  ;;  %v3137_v30 = vsel %vm536_vm5, %v3133_v18, %v6242_v58  ;;  %v3162_v32 = vsel %vm577_vm4, %v3155_v60, %v3157_v54 }
 0x597   : > { %3543 = vmatprep.subr.bf16.mxu1 %v3137_v30 }
 0x598   : > { %3544 = vmatpush1.bf16.msra.mxu1 %v3136_v42 }
 0x599   : > { %v3185_v9 = vpop.permute.xlu0 %3184  ;;  %v3159_v26 = vpop.permute.xlu1 %3158 }
 0x59a   : > { %v3163_v14 = vsel %vm577_vm4, %v3157_v54, %v3159_v26 }
 0x59b   : > { %3463 = vmatprep.subr.bf16.mxu0 %v3163_v14 }
 0x59c   : > { %3464 = vmatpush1.bf16.msra.mxu0 %v3162_v32 }
 0x59d   : > { %v3183_v8 = vpop.permute.xlu0 %3182  ;;  %v3161_v10 = vpop.permute.xlu1 %3160 }
 0x59e   : > { %v3164_v59 = vsel %vm577_vm4, %v3159_v26, %v3161_v10  ;;  %v3165_v44 = vsel %vm577_vm4, %v3161_v10, %v6243_v22  ;;  %v3190_v48 = vsel %vm507_vm3, %v3183_v8, %v3185_v9 }
 0x59f   : > { %3545 = vmatprep.subr.bf16.mxu1 %v3165_v44 }
 0x5a0   : > { %3546 = vmatpush1.bf16.msra.mxu1 %v3164_v59 }
 0x5a1   : > { %v3213_v27 = vpop.permute.xlu0 %3212  ;;  %v3187_v3 = vpop.permute.xlu1 %3186 }
 0x5a2   : > { %v3191_v20 = vsel %vm507_vm3, %v3185_v9, %v3187_v3 }
 0x5a3   : > { %3465 = vmatprep.subr.bf16.mxu0 %v3191_v20 }
 0x5a4   : > { %3466 = vmatpush1.bf16.msra.mxu0 %v3190_v48 }
 0x5a5   : > { %v3211_v31 = vpop.permute.xlu0 %3210  ;;  %v3189_v46 = vpop.permute.xlu1 %3188 }
 0x5a6   : > { %v3192_v7 = vsel %vm507_vm3, %v3187_v3, %v3189_v46  ;;  %v3193_v23 = vsel %vm507_vm3, %v3189_v46, %v6244_v49  ;;  %v3218_v61 = vsel %vm437_vm2, %v3211_v31, %v3213_v27 }
 0x5a7   : > { %3547 = vmatprep.subr.bf16.mxu1 %v3193_v23 }
 0x5a8   : > { %3548 = vmatpush1.bf16.msra.mxu1 %v3192_v7 }
 0x5a9   : > { %v3241_v52 = vpop.permute.xlu0 %3240  ;;  %v3215_v0 = vpop.permute.xlu1 %3214 }
 0x5aa   : > { %v3219_v33 = vsel %vm437_vm2, %v3213_v27, %v3215_v0 }
 0x5ab   : > { %3467 = vmatprep.subr.bf16.mxu0 %v3219_v33 }
 0x5ac   : > { %3468 = vmatpush1.bf16.msra.mxu0 %v3218_v61 }
 0x5ad   : > { %v3239_v15 = vpop.permute.xlu0 %3238  ;;  %v3217_v2 = vpop.permute.xlu1 %3216 }
 0x5ae   : > { %v3220_v34 = vsel %vm437_vm2, %v3215_v0, %v3217_v2  ;;  %v3221_v45 = vsel %vm437_vm2, %v3217_v2, %v6245_v25  ;;  %v3246_v51 = vsel %vm367_vm1, %v3239_v15, %v3241_v52 }
 0x5af   : > { %3549 = vmatprep.subr.bf16.mxu1 %v3221_v45 }
 0x5b0   : > { %3550 = vmatpush1.bf16.msra.mxu1 %v3220_v34 }
 0x5b1   : > { %v3243_v56 = vpop.permute.xlu1 %3242  ;;  %v3269_v36 = vpop.permute.xlu0 %3268 }
 0x5b2   : > { %v3247_v38 = vsel %vm367_vm1, %v3241_v52, %v3243_v56 }
 0x5b3   : > { %3469 = vmatprep.subr.bf16.mxu0 %v3247_v38 }
 0x5b4   : > { %3470 = vmatpush1.bf16.msra.mxu0 %v3246_v51 }
 0x5b5   : > { %v3245_v13 = vpop.permute.xlu1 %3244  ;;  %v3267_v57 = vpop.permute.xlu0 %3266 }
 0x5b6   : > { %v3248_v1 = vsel %vm367_vm1, %v3243_v56, %v3245_v13  ;;  %v3249_v12 = vsel %vm367_vm1, %v3245_v13, %v6246_v39  ;;  %v3274_v55 = vsel %vm285_vm0, %v3267_v57, %v3269_v36 }
 0x5b7   : > { %3551 = vmatprep.subr.bf16.mxu1 %v3249_v12 }
 0x5b8   : > { %3552 = vmatpush1.bf16.msra.mxu1 %v3248_v1 }
 0x5b9   : > { %v3271_v16 = vpop.permute.xlu1 %3270 }
 0x5ba   : > { %v3275_v62 = vsel %vm285_vm0, %v3269_v36, %v3271_v16 }
 0x5bb   : > { %3471 = vmatprep.subr.bf16.mxu0 %v3275_v62 }
 0x5bc   : > { %3472 = vmatpush1.bf16.msra.mxu0 %v3274_v55 }
 0x5bd   : > { %v3273_v24 = vpop.permute.xlu1 %3272 }
 0x5be   : > { %v3276_v43 = vsel %vm285_vm0, %v3271_v16, %v3273_v24  ;;  %v3277_v4 = vsel %vm285_vm0, %v3273_v24, %v6247_v37 }
 0x5bf   : > { %3484 = vmatmul.mubr.bf16.vlgmr.msra.gmra.mrb[4].mxu0 %v3700_v63  ;;  %3553 = vmatprep.subr.bf16.mxu1 %v3277_v4 }
 0x5c0   : > { %3554 = vmatpush1.bf16.msra.mxu1 %v3276_v43 }
 0x5c3   : > { %3566 = vmatmul.mubr.bf16.vlgmr.msra.gmra.mrb[4].mxu1 %v3700_v63 }
 0x692   : > { %v3485_v11 = vpop.f32.mrb[4].mxu0 }
 0x693   : > { %v3487_v17 = vpop.f32.mrb[5].mxu0 }
 0x694   : > { %v3574_v50 = vadd.f32 %v3487_v17, %v3485_v11  ;;  %v3489_v6 = vpop.f32.mrb[6].mxu0 }
 0x695   : > { %v3490_v21 = vpop.f32.mrb[7].mxu0 }
 0x696   : > { %v3567_v35 = vpop.f32.mrb[4].mxu1 }
 0x697   : > { %v3575_v5 = vadd.f32 %v3574_v50, %v3567_v35  ;;  %v3569_v53 = vpop.f32.mrb[5].mxu1 }
 0x698   : > { %v3571_v19 = vpop.f32.mrb[6].mxu1 }
 0x699   : > { %v3576_v40 = vadd.f32 %v3575_v5, %v3569_v53  ;;  %v3572_v41 = vpop.f32.mrb[7].mxu1 }
 0x69b   : > { %3577 = vadd.xlane.f32.xlu0 %v3576_v40 }
 0x728   : > { %v3578_v54 = vpop.xlane.xlu0 %3577 }
 0x729   : > { %v3579_v29 = vmul.f32 0.001953125, %v3578_v54 }
 0x72b   : > { %v3580_v28 = vsub.f32 %v3485_v11, %v3579_v29  ;;  %v3581_v47 = vsub.f32 %v3487_v17, %v3579_v29  ;;  %v3582_v60 = vsub.f32 %v3567_v35, %v3579_v29  ;;  %v3583_v18 = vsub.f32 %v3569_v53, %v3579_v29 }
 0x72d   : > { %v3584_v42 = vmul.f32 %v3580_v28, %v3580_v28  ;;  %v3585_v58 = vmul.f32 %v3581_v47, %v3581_v47  ;;  %v3586_v30 = vmul.f32 %v3582_v60, %v3582_v60  ;;  %v3587_v26 = vmul.f32 %v3583_v18, %v3583_v18 }
 0x72f   : > { %v3588_v9 = vadd.f32 %v3585_v58, %v3584_v42 }
 0x731   : > { %v3589_v14 = vadd.f32 %v3588_v9, %v3586_v30 }
 0x733   : > { %v3590_v32 = vadd.f32 %v3589_v14, %v3587_v26 }
 0x735   : > { %3591 = vadd.xlane.f32.xlu1 %v3590_v32 }
 0x7c2   : > { %v3592_v8 = vpop.xlane.xlu1 %3591 }
 0x7c3   : > { %v3593_v10 = vmul.f32 0.001953125, %v3592_v8 }
 0x7c5   : > { %v3594_v59 = vadd.f32 1e-05, %v3593_v10 }
 0x7c7   : > { %3785 = vrsqrt.f32 %v3594_v59 }
 0x7d1   : > { %v3786_v22 = vpop.eup %3785 }
 0x7d2   : > { %v3596_v44 = vmul.f32 %v3786_v22, %v3580_v28  ;;  %v3597_v27 = vmul.f32 %v3786_v22, %v3581_v47  ;;  %v3598_v3 = vmul.f32 %v3786_v22, %v3582_v60  ;;  %v3599_v20 = vmul.f32 %v3786_v22, %v3583_v18 }
 0x7d4   : > { %v3600_v48 = vmax.f32 %v3596_v44, 0.0  ;;  %v3601_v31 = vmax.f32 %v3597_v27, 0.0  ;;  %v3602_v46 = vmax.f32 %v3598_v3, 0.0  ;;  %v3603_v7 = vmax.f32 %v3599_v20, 0.0 }
 0x7d6   : > { %3604 = vst [vmem:[%s197_s29] sm:$0xff] %v3600_v48  ;;  %3605 = vst [vmem:[%s197_s29 + $0x8] sm:$0xff] %v3601_v31 }
 0x7d7   : > { %3606 = vst [vmem:[%s197_s29 + $0x10] sm:$0xff] %v3602_v46  ;;  %3607 = vst [vmem:[%s197_s29 + $0x18] sm:$0xff] %v3603_v7 }
 0x7d8 PF: > { %s14_s15 = sadd.s32 1, %s3797_s15  }
 0x7d9   : > { %p11_p4 = scmp.ge.s32.totalorder %s14_s15, 4  }
 0x7db   :  { %13 = sbr.rel (!%p11_p4) target bundleno = 1 (0x1), region = 66 }

</bundles_post_ra>
